<compile_context>
chip_gen: v7x
topology: tpu7x:2x2x1
jax: 0.10.0
libtpu: 0.0.40
codegen_flags: <defaults>
</compile_context>

<pallas_src>
import numpy as np
import jax
import jax.numpy as jnp
from jax.experimental import pallas as pl
from jax.experimental.pallas import tpu as pltpu
from jax.scipy.linalg import expm as jax_expm

# ----------------------------- configuration --------------------------------
N_HILBERT = 2                        # n = sqrt(data_dim + 1)
DD = N_HILBERT * N_HILBERT - 1       # data_dim = 3 (single qubit / SU(2))
M1 = DD + 1                          # 4x4 Liouvillian
B = 16                               # batch size (small test shape)
BLOCK_B = 8                          # per-grid-step batch block
HID = 256                            # hidden width of v_x / v_y nets
NF = 5                               # FourierLayer N_freq
FOURIER_THRESHOLD = 1e-3
DT = 0.1
K_EXPMV = 12                         # Taylor terms for exp(dt*L) @ x_ext
NPROD = 3 * DD * DD * DD             # 81 quadratic-product lanes (xx|yy|xy)
OUT_LANES = 128                      # lane-dense kernel output width

# NOTE (correctness): the fixed K_EXPMV-term Taylor expmv assumes ||dt*L|| <~ 1
# (guaranteed here by dt=0.1 and the /50, /10 output scalings). torch uses an
# adaptive Pade matrix_exp; if the nets are trained out of this regime, raise
# K_EXPMV or re-introduce scaling.  Truncation error ~ ||dtL||^(K+1)/(K+1)!.


# ------------------------- structure constants f, d -------------------------
def _gell_mann_basis(n):
    mats = []
    for i in range(n):
        for j in range(i + 1, n):
            m = np.zeros((n, n), np.complex128); m[i, j] = 1.0; m[j, i] = 1.0
            mats.append(m)
    for i in range(n):
        for j in range(i + 1, n):
            m = np.zeros((n, n), np.complex128); m[i, j] = -1.0j; m[j, i] = 1.0j
            mats.append(m)
    for l in range(1, n):
        m = np.zeros((n, n), np.complex128)
        m[:l, :l] = np.eye(l); m[l, l] = -l
        mats.append(np.sqrt(2.0 / (l * (l + 1))) * m)
    return np.stack(mats)            # (n^2-1, n, n), Tr(l_a l_b) = 2 delta_ab


def pauli_s_const(n=N_HILBERT):
    # TODO(synk): original pauli_s_const() source not provided; standard SU(n)
    # structure constants f_abc (antisym) and d_abc (sym) are used.
    lam = _gell_mann_basis(n)
    dd = n * n - 1
    f = np.zeros((dd, dd, dd)); d = np.zeros((dd, dd, dd))
    for a in range(dd):
        for b in range(dd):
            comm = lam[a] @ lam[b] - lam[b] @ lam[a]
            anti = lam[a] @ lam[b] + lam[b] @ lam[a]
            for c in range(dd):
                f[a, b, c] = np.real(-0.25j * np.trace(comm @ lam[c]))
                d[a, b, c] = np.real(0.25 * np.trace(anti @ lam[c]))
    return f.astype(np.float64), d.astype(np.float64)


# ----------------------- constant (host-side) maps ---------------------------
def build_liouville_maps(f, d, dt):
    """Maps c_re_flat / c_im_flat / omega -> dt*L flattened row-major 4x4.

    blk[s, 4*i + j] = dt * L_s[i, j], with L[1+m,1+n] = (dsx+hcom)[m,n],
    L[1+m,0] = tr_id[m], L[0,:] = 0.
    """
    dd = f.shape[0]
    m1 = dd + 1
    ff1 = np.einsum('mjk,nik->mnij', f, f)
    ff2 = np.einsum('mik,njk->mnij', f, f)
    mre = (-4.0 * (ff1 + ff2)).reshape(dd * dd, dd * dd)       # c_re -> dsx_re
    fd1 = np.einsum('mjk,nik->mnij', f, d)
    fd2 = np.einsum('mik,njk->mnij', f, d)
    mim = (-4.0 * fd1 + 4.0 * fd2).reshape(dd * dd, dd * dd)   # c_im -> dsx_im
    tmat = (-4.0 * np.transpose(f, (1, 0, 2))).reshape(dd, dd * dd)   # c_im -> tr_id
    hmat = (4.0 * np.transpose(f, (1, 0, 2))).reshape(dd * dd, dd)    # omega -> hcom (j,i)

    lplace = np.zeros((dd * dd, m1 * m1), np.float64)   # dsx[m*dd+n] -> blk[4(1+m)+1+n]
    tplace = np.zeros((dd, m1 * m1), np.float64)        # trid[m]     -> blk[4(1+m)+0]
    for m in range(dd):
        tplace[m, (1 + m) * m1 + 0] = 1.0
        for n in range(dd):
            lplace[m * dd + n, (1 + m) * m1 + (1 + n)] = 1.0

    map_re = dt * (mre.T @ lplace)                      # (9, 16)
    map_im = dt * (mim.T @ lplace + tmat.T @ tplace)    # (9, 16)
    map_om = dt * (hmat.T @ lplace)                     # (3, 16)
    return map_re, map_im, map_om


def build_quadratic_maps():
    """Column-gather indices and linear maps for the Kossakowski products.

    prod[s, m] = u[s, pa[m]] * u[s, pb[m]],  u = [vx_flat | vy_flat] (18 cols)
    c_re_flat = prod @ R_re,  c_im_flat = prod @ R_im.
    Lane groups: [0:27] vx_ki*vx_kj, [27:54] vy_ki*vy_kj, [54:81] vx_ki*vy_kj.
    """
    idx_x = lambda k, i: k * DD + i
    idx_y = lambda k, i: DD * DD + k * DD + i
    pa, pb = [], []
    R_re = np.zeros((NPROD, DD * DD), np.float64)
    R_im = np.zeros((NPROD, DD * DD), np.float64)
    lane = 0
    for k in range(DD):                       # xx -> c_re
        for i in range(DD):
            for j in range(DD):
                pa.append(idx_x(k, i)); pb.append(idx_x(k, j))
                R_re[lane, i * DD + j] += 1.0
                lane += 1
    for k in range(DD):                       # yy -> c_re
        for i in range(DD):
            for j in range(DD):
                pa.append(idx_y(k, i)); pb.append(idx_y(k, j))
                R_re[lane, i * DD + j] += 1.0
                lane += 1
    for k in range(DD):                       # xy -> c_im (antisymmetrized)
        for i in range(DD):
            for j in range(DD):
                pa.append(idx_x(k, i)); pb.append(idx_y(k, j))
                R_im[lane, i * DD + j] += 1.0
                R_im[lane, j * DD + i] -= 1.0
                lane += 1
    assert lane == NPROD
    return np.array(pa), np.array(pb), R_re, R_im


def pack_params(params, map_re, map_im, map_om, pa, pb, R_re, R_im):
    """Repack torch-style parameters into the fused-kernel constant arrays."""
    w1x, w2x, b2x, w1y, w2y, b2y, freqs, ac, asn = [
        np.asarray(p, np.float64) for p in params]

    w1 = np.concatenate([w1x, w1y], axis=1)                 # (1, 2*HID)
    W_u = np.zeros((2 * HID, 2 * DD * DD), np.float64)      # block-diag w2x/w2y
    W_u[:HID, :DD * DD] = w2x
    W_u[HID:, DD * DD:] = w2y
    b_u = np.concatenate([b2x, b2y], axis=1)                # (1, 18)
    W_u *= (1.0 / 50.0)                                     # fold the /50
    b_u *= (1.0 / 50.0)

    W_A = W_u[:, pa]; b_A = b_u[:, pa]                      # (512, 81), (1, 81)
    W_B = W_u[:, pb]; b_B = b_u[:, pb]

    mapP = R_re @ map_re + R_im @ map_im                    # (81, 16)
    mapF = (np.concatenate([ac, asn], axis=0) / 10.0) @ map_om   # (10, 16)

    freq2 = np.concatenate([freqs, freqs], axis=1)          # (1, 10)
    shift2 = np.concatenate([np.full((1, NF), np.pi / 2.0),
                             np.zeros((1, NF))], axis=1)    # cos = sin(.+pi/2)

    to32 = lambda a: jnp.asarray(a, jnp.float32)
    return tuple(to32(a) for a in
                 (w1, W_A, b_A, W_B, b_B, freq2, shift2, mapF, mapP))


# --------------------------------- kernel ------------------------------------
def fused_kernel(t_ref, x_ref, w1_ref, wa_ref, ba_ref, wb_ref, bb_ref,
                 freq2_ref, shift2_ref, mapf_ref, mapp_ref, out_ref):
    f32 = jnp.float32
    t = t_ref[...]                                           # (BLOCK_B, 1)

    # Both v-net hidden layers in ONE lane-dense tile; Snake(a=4).
    # TODO(synk): Snake source not provided; x + sin(a*x)^2 / a assumed.
    h = t * w1_ref[...]                                      # (BLOCK_B, 2*HID)
    h = h + 0.25 * jnp.sin(4.0 * h) ** 2

    # All Kossakowski quadratic terms via two lane-dense MXU matmuls (weights
    # carry duplicated/permuted w2x/w2y columns + the /50 scale) and one
    # elementwise multiply:  prod[s,m] = (v/50)[pa(m)] * (v/50)[pb(m)].
    av = jnp.dot(h, wa_ref[...], preferred_element_type=f32) + ba_ref[...]
    bv = jnp.dot(h, wb_ref[...], preferred_element_type=f32) + bb_ref[...]
    prod = av * bv                                           # (BLOCK_B, 81)

    # FourierLayer features [cos(k t) | sin(k t)] via one shifted sin().
    cs = jnp.sin(t * freq2_ref[...] + shift2_ref[...])       # (BLOCK_B, 10)

    # dt * Liouvillian, flattened row-major 4x4 (row 0 identically zero).
    # Structure constants, Liouvillian assembly, Fourier coefficients, the
    # /10 scale and dt are all folded into the two constant maps.
    blk = (jnp.dot(prod, mapp_ref[...], preferred_element_type=f32)
           + jnp.dot(cs, mapf_ref[...], preferred_element_type=f32))  # (B,16)

    # ---- expmv:  y = exp(dt*L) @ [1, x], rows 1..DD only -------------------
    # Taylor on the UNscaled dt*L (||dt*L|| << 1 by construction); unscaled
    # powers in the recurrence, 1/k! applied off the critical chain.
    a = [[blk[:, M1 * i + j: M1 * i + j + 1] for j in range(M1)]
         for i in range(1, M1)]                              # a[i-1][j] = dtL[i,j]
    xc = [x_ref[:, j:j + 1] for j in range(DD)]              # (BLOCK_B,1) each

    # k = 1 term: (dt*L) @ x_ext  (x_ext[0] == 1 -> column 0 enters directly)
    p = [a[i][0] + a[i][1] * xc[0] + a[i][2] * xc[1] + a[i][3] * xc[2]
         for i in range(DD)]
    y = [xc[i] + p[i] for i in range(DD)]
    inv_fact = 1.0
    for k in range(2, K_EXPMV + 1):
        p = [a[i][1] * p[0] + a[i][2] * p[1] + a[i][3] * p[2]
             for i in range(DD)]                             # p = (dtL)^k x_ext
        inv_fact /= k
        y = [y[i] + f32(inv_fact) * p[i] for i in range(DD)]

    # Lane-dense output: zero the tile once, store the DD result columns.
    out_ref[...] = jnp.zeros((t.shape[0], OUT_LANES), f32)
    for j in range(DD):
        out_ref[:, j:j + 1] = y[j]


# ------------------------------ host wrapper ---------------------------------
def make_forward(packed):
    assert B % BLOCK_B == 0
    grid = (B // BLOCK_B,)

    def batch_spec(width):
        return pl.BlockSpec((BLOCK_B, width), lambda i: (i, 0))

    def const_spec(arr):
        # Full-array block, constant index_map -> stays resident in VMEM.
        return pl.BlockSpec(arr.shape, lambda i: (0, 0))

    fused_call = pl.pallas_call(
        fused_kernel,
        out_shape=jax.ShapeDtypeStruct((B, OUT_LANES), jnp.float32),
        grid=grid,
        in_specs=[batch_spec(1), batch_spec(DD)] + [const_spec(a) for a in packed],
        out_specs=batch_spec(OUT_LANES),
        compiler_params=pltpu.CompilerParams(
            dimension_semantics=("parallel",),        # v7x: shard batch blocks
            vmem_limit_bytes=16 * 1024 * 1024),
    )

    @jax.jit
    def forward(t, x):
        t2 = t[:, None].astype(jnp.float32)           # torch: t.unsqueeze_(1)
        out_full = fused_call(t2, x.astype(jnp.float32), *packed)
        return out_full[:, :DD]

    return forward


# ---------------------------- pure-JAX reference -----------------------------
def forward_reference(t, x, params, f, d):
    w1x, w2x, b2x, w1y, w2y, b2y, freqs, ac, asn = params
    t2 = t[:, None]

    def snake(z):
        return z + jnp.sin(4.0 * z) ** 2 * 0.25

    vx = ((snake(t2 @ w1x) @ w2x + b2x) / 50.0).reshape(B, DD, DD)
    vy = ((snake(t2 @ w1y) @ w2y + b2y) / 50.0).reshape(B, DD, DD)
    ph = t2 * freqs
    omega = (jnp.cos(ph) @ ac + jnp.sin(ph) @ asn) / 10.0
    c_re = jnp.einsum('ski,skj->sij', vx, vx) + jnp.einsum('ski,skj->sij', vy, vy)
    c_im = jnp.einsum('ski,skj->sij', vx, vy) - jnp.einsum('ski,skj->sij', vy, vx)
    re1 = -4.0 * jnp.einsum('mjk,nik,sij->smn', f, f, c_re)
    re2 = -4.0 * jnp.einsum('mik,njk,sij->smn', f, f, c_re)
    im1 = -4.0 * jnp.einsum('mjk,nik,sij->smn', f, d, c_im)
    im2 = 4.0 * jnp.einsum('mik,njk,sij->smn', f, d, c_im)
    dsx = re1 + re2 + im1 + im2
    trid = -4.0 * jnp.einsum('imj,sij->sm', f, c_im)
    hcom = 4.0 * jnp.einsum('ijk,sk->sji', f, omega)
    L = jnp.zeros((B, DD + 1, DD + 1), jnp.float32)
    L = L.at[:, 1:, 1:].set(hcom + dsx)
    L = L.at[:, 1:, 0].set(trid)
    E = jax.vmap(jax_expm)(DT * L)
    return E[:, 1:, 0] + jnp.einsum('si,sij->sj', x,
                                    jnp.transpose(E[:, 1:, 1:], (0, 2, 1)))


# ----------------------------------- main ------------------------------------
if __name__ == "__main__":
    f_const, d_const = pauli_s_const(N_HILBERT)
    map_re, map_im, map_om = build_liouville_maps(f_const, d_const, DT)
    pa, pb, R_re, R_im = build_quadratic_maps()

    # deterministic parameter init
    # TODO(synk): init_weights source not provided; N(0, 0.1) assumed.
    key = jax.random.PRNGKey(0)
    ks = jax.random.split(key, 10)
    scale = 0.1
    w1x = scale * jax.random.normal(ks[0], (1, HID), jnp.float32)
    w2x = scale * jax.random.normal(ks[1], (HID, DD * DD), jnp.float32)
    b2x = scale * jax.random.normal(ks[2], (1, DD * DD), jnp.float32)
    w1y = scale * jax.random.normal(ks[3], (1, HID), jnp.float32)
    w2y = scale * jax.random.normal(ks[4], (HID, DD * DD), jnp.float32)
    b2y = scale * jax.random.normal(ks[5], (1, DD * DD), jnp.float32)
    freqs = jnp.arange(1, NF + 1, dtype=jnp.float32)[None, :]
    ac = 0.3 * jax.random.normal(ks[6], (NF, DD), jnp.float32)
    asn = 0.3 * jax.random.normal(ks[7], (NF, DD), jnp.float32)
    # TODO(synk): FourierLayer source not provided; sum_k a_k cos(kt)+b_k sin(kt)
    # with |coef| >= threshold assumed.
    ac = jnp.where(jnp.abs(ac) >= FOURIER_THRESHOLD, ac, 0.0)
    asn = jnp.where(jnp.abs(asn) >= FOURIER_THRESHOLD, asn, 0.0)
    params = (w1x, w2x, b2x, w1y, w2y, b2y, freqs, ac, asn)

    packed = pack_params(params, map_re, map_im, map_om, pa, pb, R_re, R_im)

    t = jax.random.uniform(ks[8], (B,), jnp.float32)
    x = 0.5 * jax.random.normal(ks[9], (B, DD), jnp.float32)

    forward = make_forward(packed)
    out = jax.block_until_ready(forward(t, x))

    ref = forward_reference(t, x, params,
                            jnp.asarray(f_const, jnp.float32),
                            jnp.asarray(d_const, jnp.float32))
    np.testing.assert_allclose(np.asarray(out), np.asarray(ref),
                               rtol=5e-3, atol=5e-4)
    print("KERNEL_OK")
</pallas_src>

<mosaic_0001>
module attributes {stable_mosaic.version = 11 : i64} {
  func.func @fused_kernel(%arg0: i32, %arg1: memref<8x1xf32, #tpu.memory_space<vmem>>, %arg2: memref<8x3xf32, #tpu.memory_space<vmem>>, %arg3: memref<1x512xf32, #tpu.memory_space<vmem>>, %arg4: memref<512x81xf32, #tpu.memory_space<vmem>>, %arg5: memref<1x81xf32, #tpu.memory_space<vmem>>, %arg6: memref<512x81xf32, #tpu.memory_space<vmem>>, %arg7: memref<1x81xf32, #tpu.memory_space<vmem>>, %arg8: memref<1x10xf32, #tpu.memory_space<vmem>>, %arg9: memref<1x10xf32, #tpu.memory_space<vmem>>, %arg10: memref<10x16xf32, #tpu.memory_space<vmem>>, %arg11: memref<81x16xf32, #tpu.memory_space<vmem>>, %arg12: memref<8x128xf32, #tpu.memory_space<vmem>>) attributes {dimension_semantics = [#tpu.dimension_semantics<parallel>], iteration_bounds = array<i64: 2>, scalar_prefetch = 0 : i64, scratch_operands = 0 : i64, tpu.core_type = #tpu.core_type<tc>, window_params = [{transform_indices = @transform_0, window_bounds = array<i64: 8, 1>}, {transform_indices = @transform_1, window_bounds = array<i64: 8, 3>}, {pipeline_mode = #tpu.pipeline_mode<synchronous>, transform_indices = @transform_2, window_bounds = array<i64: 1, 512>}, {pipeline_mode = #tpu.pipeline_mode<synchronous>, transform_indices = @transform_3, window_bounds = array<i64: 512, 81>}, {pipeline_mode = #tpu.pipeline_mode<synchronous>, transform_indices = @transform_4, window_bounds = array<i64: 1, 81>}, {pipeline_mode = #tpu.pipeline_mode<synchronous>, transform_indices = @transform_5, window_bounds = array<i64: 512, 81>}, {pipeline_mode = #tpu.pipeline_mode<synchronous>, transform_indices = @transform_6, window_bounds = array<i64: 1, 81>}, {pipeline_mode = #tpu.pipeline_mode<synchronous>, transform_indices = @transform_7, window_bounds = array<i64: 1, 10>}, {pipeline_mode = #tpu.pipeline_mode<synchronous>, transform_indices = @transform_8, window_bounds = array<i64: 1, 10>}, {pipeline_mode = #tpu.pipeline_mode<synchronous>, transform_indices = @transform_9, window_bounds = array<i64: 10, 16>}, {pipeline_mode = #tpu.pipeline_mode<synchronous>, transform_indices = @transform_10, window_bounds = array<i64: 81, 16>}, {transform_indices = @transform_11, window_bounds = array<i64: 8, 128>}]} {
    %c0 = arith.constant 0 : index
    %c0_0 = arith.constant 0 : index
    %0 = vector.load %arg1[%c0, %c0_0] : memref<8x1xf32, #tpu.memory_space<vmem>>, vector<8x1xf32>
    %c0_1 = arith.constant 0 : index
    %c0_2 = arith.constant 0 : index
    %1 = vector.load %arg3[%c0_1, %c0_2] : memref<1x512xf32, #tpu.memory_space<vmem>>, vector<1x512xf32>
    %2 = vector.broadcast %0 : vector<8x1xf32> to vector<8x512xf32>
    %3 = vector.broadcast %1 : vector<1x512xf32> to vector<8x512xf32>
    %4 = arith.mulf %2, %3 : vector<8x512xf32>
    %cst = arith.constant 4.000000e+00 : f32
    %5 = vector.broadcast %cst : f32 to vector<8x512xf32>
    %6 = arith.mulf %5, %4 : vector<8x512xf32>
    %7 = math.sin %6 : vector<8x512xf32>
    %8 = arith.mulf %7, %7 : vector<8x512xf32>
    %cst_3 = arith.constant 2.500000e-01 : f32
    %9 = vector.broadcast %cst_3 : f32 to vector<8x512xf32>
    %10 = arith.mulf %9, %8 : vector<8x512xf32>
    %11 = arith.addf %4, %10 : vector<8x512xf32>
    %c0_4 = arith.constant 0 : index
    %c0_5 = arith.constant 0 : index
    %12 = vector.load %arg4[%c0_4, %c0_5] : memref<512x81xf32, #tpu.memory_space<vmem>>, vector<512x81xf32>
    %cst_6 = arith.constant dense<0.000000e+00> : vector<8x81xf32>
    %13 = tpu.matmul %11, %12, %cst_6 {dimension_numbers = #tpu.dot_dimension_numbers<[1], [0], [0], [1], [0, 0, 1, 1], [], []>} : vector<8x512xf32>, vector<512x81xf32>, vector<8x81xf32> -> vector<8x81xf32>
    %c0_7 = arith.constant 0 : index
    %c0_8 = arith.constant 0 : index
    %14 = vector.load %arg5[%c0_7, %c0_8] : memref<1x81xf32, #tpu.memory_space<vmem>>, vector<1x81xf32>
    %15 = vector.broadcast %14 : vector<1x81xf32> to vector<8x81xf32>
    %16 = arith.addf %13, %15 : vector<8x81xf32>
    %c0_9 = arith.constant 0 : index
    %c0_10 = arith.constant 0 : index
    %17 = vector.load %arg6[%c0_9, %c0_10] : memref<512x81xf32, #tpu.memory_space<vmem>>, vector<512x81xf32>
    %cst_11 = arith.constant dense<0.000000e+00> : vector<8x81xf32>
    %18 = tpu.matmul %11, %17, %cst_11 {dimension_numbers = #tpu.dot_dimension_numbers<[1], [0], [0], [1], [0, 0, 1, 1], [], []>} : vector<8x512xf32>, vector<512x81xf32>, vector<8x81xf32> -> vector<8x81xf32>
    %c0_12 = arith.constant 0 : index
    %c0_13 = arith.constant 0 : index
    %19 = vector.load %arg7[%c0_12, %c0_13] : memref<1x81xf32, #tpu.memory_space<vmem>>, vector<1x81xf32>
    %20 = vector.broadcast %19 : vector<1x81xf32> to vector<8x81xf32>
    %21 = arith.addf %18, %20 : vector<8x81xf32>
    %22 = arith.mulf %16, %21 : vector<8x81xf32>
    %c0_14 = arith.constant 0 : index
    %c0_15 = arith.constant 0 : index
    %23 = vector.load %arg8[%c0_14, %c0_15] : memref<1x10xf32, #tpu.memory_space<vmem>>, vector<1x10xf32>
    %24 = vector.broadcast %0 : vector<8x1xf32> to vector<8x10xf32>
    %25 = vector.broadcast %23 : vector<1x10xf32> to vector<8x10xf32>
    %26 = arith.mulf %24, %25 : vector<8x10xf32>
    %c0_16 = arith.constant 0 : index
    %c0_17 = arith.constant 0 : index
    %27 = vector.load %arg9[%c0_16, %c0_17] : memref<1x10xf32, #tpu.memory_space<vmem>>, vector<1x10xf32>
    %28 = vector.broadcast %27 : vector<1x10xf32> to vector<8x10xf32>
    %29 = arith.addf %26, %28 : vector<8x10xf32>
    %30 = math.sin %29 : vector<8x10xf32>
    %c0_18 = arith.constant 0 : index
    %c0_19 = arith.constant 0 : index
    %31 = vector.load %arg11[%c0_18, %c0_19] : memref<81x16xf32, #tpu.memory_space<vmem>>, vector<81x16xf32>
    %cst_20 = arith.constant dense<0.000000e+00> : vector<8x16xf32>
    %32 = tpu.matmul %22, %31, %cst_20 {dimension_numbers = #tpu.dot_dimension_numbers<[1], [0], [0], [1], [0, 0, 1, 1], [], []>} : vector<8x81xf32>, vector<81x16xf32>, vector<8x16xf32> -> vector<8x16xf32>
    %c0_21 = arith.constant 0 : index
    %c0_22 = arith.constant 0 : index
    %33 = vector.load %arg10[%c0_21, %c0_22] : memref<10x16xf32, #tpu.memory_space<vmem>>, vector<10x16xf32>
    %cst_23 = arith.constant dense<0.000000e+00> : vector<8x16xf32>
    %34 = tpu.matmul %30, %33, %cst_23 {dimension_numbers = #tpu.dot_dimension_numbers<[1], [0], [0], [1], [0, 0, 1, 1], [], []>} : vector<8x10xf32>, vector<10x16xf32>, vector<8x16xf32> -> vector<8x16xf32>
    %35 = arith.addf %32, %34 : vector<8x16xf32>
    %36 = vector.extract_strided_slice %35 {offsets = [0, 4], sizes = [8, 1], strides = [1, 1]} : vector<8x16xf32> to vector<8x1xf32>
    %37 = vector.extract_strided_slice %35 {offsets = [0, 5], sizes = [8, 1], strides = [1, 1]} : vector<8x16xf32> to vector<8x1xf32>
    %38 = vector.extract_strided_slice %35 {offsets = [0, 6], sizes = [8, 1], strides = [1, 1]} : vector<8x16xf32> to vector<8x1xf32>
    %39 = vector.extract_strided_slice %35 {offsets = [0, 7], sizes = [8, 1], strides = [1, 1]} : vector<8x16xf32> to vector<8x1xf32>
    %40 = vector.extract_strided_slice %35 {offsets = [0, 8], sizes = [8, 1], strides = [1, 1]} : vector<8x16xf32> to vector<8x1xf32>
    %41 = vector.extract_strided_slice %35 {offsets = [0, 9], sizes = [8, 1], strides = [1, 1]} : vector<8x16xf32> to vector<8x1xf32>
    %42 = vector.extract_strided_slice %35 {offsets = [0, 10], sizes = [8, 1], strides = [1, 1]} : vector<8x16xf32> to vector<8x1xf32>
    %43 = vector.extract_strided_slice %35 {offsets = [0, 11], sizes = [8, 1], strides = [1, 1]} : vector<8x16xf32> to vector<8x1xf32>
    %44 = vector.extract_strided_slice %35 {offsets = [0, 12], sizes = [8, 1], strides = [1, 1]} : vector<8x16xf32> to vector<8x1xf32>
    %45 = vector.extract_strided_slice %35 {offsets = [0, 13], sizes = [8, 1], strides = [1, 1]} : vector<8x16xf32> to vector<8x1xf32>
    %46 = vector.extract_strided_slice %35 {offsets = [0, 14], sizes = [8, 1], strides = [1, 1]} : vector<8x16xf32> to vector<8x1xf32>
    %47 = vector.extract_strided_slice %35 {offsets = [0, 15], sizes = [8, 1], strides = [1, 1]} : vector<8x16xf32> to vector<8x1xf32>
    %c0_24 = arith.constant 0 : index
    %c0_25 = arith.constant 0 : index
    %48 = vector.load %arg2[%c0_24, %c0_25] : memref<8x3xf32, #tpu.memory_space<vmem>>, vector<8x1xf32>
    %c0_26 = arith.constant 0 : index
    %c1 = arith.constant 1 : index
    %49 = vector.load %arg2[%c0_26, %c1] : memref<8x3xf32, #tpu.memory_space<vmem>>, vector<8x1xf32>
    %c0_27 = arith.constant 0 : index
    %c2 = arith.constant 2 : index
    %50 = vector.load %arg2[%c0_27, %c2] : memref<8x3xf32, #tpu.memory_space<vmem>>, vector<8x1xf32>
    %51 = arith.mulf %37, %48 : vector<8x1xf32>
    %52 = arith.addf %36, %51 : vector<8x1xf32>
    %53 = arith.mulf %38, %49 : vector<8x1xf32>
    %54 = arith.addf %52, %53 : vector<8x1xf32>
    %55 = arith.mulf %39, %50 : vector<8x1xf32>
    %56 = arith.addf %54, %55 : vector<8x1xf32>
    %57 = arith.mulf %41, %48 : vector<8x1xf32>
    %58 = arith.addf %40, %57 : vector<8x1xf32>
    %59 = arith.mulf %42, %49 : vector<8x1xf32>
    %60 = arith.addf %58, %59 : vector<8x1xf32>
    %61 = arith.mulf %43, %50 : vector<8x1xf32>
    %62 = arith.addf %60, %61 : vector<8x1xf32>
    %63 = arith.mulf %45, %48 : vector<8x1xf32>
    %64 = arith.addf %44, %63 : vector<8x1xf32>
    %65 = arith.mulf %46, %49 : vector<8x1xf32>
    %66 = arith.addf %64, %65 : vector<8x1xf32>
    %67 = arith.mulf %47, %50 : vector<8x1xf32>
    %68 = arith.addf %66, %67 : vector<8x1xf32>
    %69 = arith.addf %48, %56 : vector<8x1xf32>
    %70 = arith.addf %49, %62 : vector<8x1xf32>
    %71 = arith.addf %50, %68 : vector<8x1xf32>
    %72 = arith.mulf %37, %56 : vector<8x1xf32>
    %73 = arith.mulf %38, %62 : vector<8x1xf32>
    %74 = arith.addf %72, %73 : vector<8x1xf32>
    %75 = arith.mulf %39, %68 : vector<8x1xf32>
    %76 = arith.addf %74, %75 : vector<8x1xf32>
    %77 = arith.mulf %41, %56 : vector<8x1xf32>
    %78 = arith.mulf %42, %62 : vector<8x1xf32>
    %79 = arith.addf %77, %78 : vector<8x1xf32>
    %80 = arith.mulf %43, %68 : vector<8x1xf32>
    %81 = arith.addf %79, %80 : vector<8x1xf32>
    %82 = arith.mulf %45, %56 : vector<8x1xf32>
    %83 = arith.mulf %46, %62 : vector<8x1xf32>
    %84 = arith.addf %82, %83 : vector<8x1xf32>
    %85 = arith.mulf %47, %68 : vector<8x1xf32>
    %86 = arith.addf %84, %85 : vector<8x1xf32>
    %cst_28 = arith.constant 5.000000e-01 : f32
    %87 = vector.broadcast %cst_28 : f32 to vector<8x1xf32>
    %88 = arith.mulf %87, %76 : vector<8x1xf32>
    %89 = arith.addf %69, %88 : vector<8x1xf32>
    %cst_29 = arith.constant 5.000000e-01 : f32
    %90 = vector.broadcast %cst_29 : f32 to vector<8x1xf32>
    %91 = arith.mulf %90, %81 : vector<8x1xf32>
    %92 = arith.addf %70, %91 : vector<8x1xf32>
    %cst_30 = arith.constant 5.000000e-01 : f32
    %93 = vector.broadcast %cst_30 : f32 to vector<8x1xf32>
    %94 = arith.mulf %93, %86 : vector<8x1xf32>
    %95 = arith.addf %71, %94 : vector<8x1xf32>
    %96 = arith.mulf %37, %76 : vector<8x1xf32>
    %97 = arith.mulf %38, %81 : vector<8x1xf32>
    %98 = arith.addf %96, %97 : vector<8x1xf32>
    %99 = arith.mulf %39, %86 : vector<8x1xf32>
    %100 = arith.addf %98, %99 : vector<8x1xf32>
    %101 = arith.mulf %41, %76 : vector<8x1xf32>
    %102 = arith.mulf %42, %81 : vector<8x1xf32>
    %103 = arith.addf %101, %102 : vector<8x1xf32>
    %104 = arith.mulf %43, %86 : vector<8x1xf32>
    %105 = arith.addf %103, %104 : vector<8x1xf32>
    %106 = arith.mulf %45, %76 : vector<8x1xf32>
    %107 = arith.mulf %46, %81 : vector<8x1xf32>
    %108 = arith.addf %106, %107 : vector<8x1xf32>
    %109 = arith.mulf %47, %86 : vector<8x1xf32>
    %110 = arith.addf %108, %109 : vector<8x1xf32>
    %cst_31 = arith.constant 0.166666672 : f32
    %111 = vector.broadcast %cst_31 : f32 to vector<8x1xf32>
    %112 = arith.mulf %111, %100 : vector<8x1xf32>
    %113 = arith.addf %89, %112 : vector<8x1xf32>
    %cst_32 = arith.constant 0.166666672 : f32
    %114 = vector.broadcast %cst_32 : f32 to vector<8x1xf32>
    %115 = arith.mulf %114, %105 : vector<8x1xf32>
    %116 = arith.addf %92, %115 : vector<8x1xf32>
    %cst_33 = arith.constant 0.166666672 : f32
    %117 = vector.broadcast %cst_33 : f32 to vector<8x1xf32>
    %118 = arith.mulf %117, %110 : vector<8x1xf32>
    %119 = arith.addf %95, %118 : vector<8x1xf32>
    %120 = arith.mulf %37, %100 : vector<8x1xf32>
    %121 = arith.mulf %38, %105 : vector<8x1xf32>
    %122 = arith.addf %120, %121 : vector<8x1xf32>
    %123 = arith.mulf %39, %110 : vector<8x1xf32>
    %124 = arith.addf %122, %123 : vector<8x1xf32>
    %125 = arith.mulf %41, %100 : vector<8x1xf32>
    %126 = arith.mulf %42, %105 : vector<8x1xf32>
    %127 = arith.addf %125, %126 : vector<8x1xf32>
    %128 = arith.mulf %43, %110 : vector<8x1xf32>
    %129 = arith.addf %127, %128 : vector<8x1xf32>
    %130 = arith.mulf %45, %100 : vector<8x1xf32>
    %131 = arith.mulf %46, %105 : vector<8x1xf32>
    %132 = arith.addf %130, %131 : vector<8x1xf32>
    %133 = arith.mulf %47, %110 : vector<8x1xf32>
    %134 = arith.addf %132, %133 : vector<8x1xf32>
    %cst_34 = arith.constant 0.0416666679 : f32
    %135 = vector.broadcast %cst_34 : f32 to vector<8x1xf32>
    %136 = arith.mulf %135, %124 : vector<8x1xf32>
    %137 = arith.addf %113, %136 : vector<8x1xf32>
    %cst_35 = arith.constant 0.0416666679 : f32
    %138 = vector.broadcast %cst_35 : f32 to vector<8x1xf32>
    %139 = arith.mulf %138, %129 : vector<8x1xf32>
    %140 = arith.addf %116, %139 : vector<8x1xf32>
    %cst_36 = arith.constant 0.0416666679 : f32
    %141 = vector.broadcast %cst_36 : f32 to vector<8x1xf32>
    %142 = arith.mulf %141, %134 : vector<8x1xf32>
    %143 = arith.addf %119, %142 : vector<8x1xf32>
    %144 = arith.mulf %37, %124 : vector<8x1xf32>
    %145 = arith.mulf %38, %129 : vector<8x1xf32>
    %146 = arith.addf %144, %145 : vector<8x1xf32>
    %147 = arith.mulf %39, %134 : vector<8x1xf32>
    %148 = arith.addf %146, %147 : vector<8x1xf32>
    %149 = arith.mulf %41, %124 : vector<8x1xf32>
    %150 = arith.mulf %42, %129 : vector<8x1xf32>
    %151 = arith.addf %149, %150 : vector<8x1xf32>
    %152 = arith.mulf %43, %134 : vector<8x1xf32>
    %153 = arith.addf %151, %152 : vector<8x1xf32>
    %154 = arith.mulf %45, %124 : vector<8x1xf32>
    %155 = arith.mulf %46, %129 : vector<8x1xf32>
    %156 = arith.addf %154, %155 : vector<8x1xf32>
    %157 = arith.mulf %47, %134 : vector<8x1xf32>
    %158 = arith.addf %156, %157 : vector<8x1xf32>
    %cst_37 = arith.constant 0.00833333377 : f32
    %159 = vector.broadcast %cst_37 : f32 to vector<8x1xf32>
    %160 = arith.mulf %159, %148 : vector<8x1xf32>
    %161 = arith.addf %137, %160 : vector<8x1xf32>
    %cst_38 = arith.constant 0.00833333377 : f32
    %162 = vector.broadcast %cst_38 : f32 to vector<8x1xf32>
    %163 = arith.mulf %162, %153 : vector<8x1xf32>
    %164 = arith.addf %140, %163 : vector<8x1xf32>
    %cst_39 = arith.constant 0.00833333377 : f32
    %165 = vector.broadcast %cst_39 : f32 to vector<8x1xf32>
    %166 = arith.mulf %165, %158 : vector<8x1xf32>
    %167 = arith.addf %143, %166 : vector<8x1xf32>
    %168 = arith.mulf %37, %148 : vector<8x1xf32>
    %169 = arith.mulf %38, %153 : vector<8x1xf32>
    %170 = arith.addf %168, %169 : vector<8x1xf32>
    %171 = arith.mulf %39, %158 : vector<8x1xf32>
    %172 = arith.addf %170, %171 : vector<8x1xf32>
    %173 = arith.mulf %41, %148 : vector<8x1xf32>
    %174 = arith.mulf %42, %153 : vector<8x1xf32>
    %175 = arith.addf %173, %174 : vector<8x1xf32>
    %176 = arith.mulf %43, %158 : vector<8x1xf32>
    %177 = arith.addf %175, %176 : vector<8x1xf32>
    %178 = arith.mulf %45, %148 : vector<8x1xf32>
    %179 = arith.mulf %46, %153 : vector<8x1xf32>
    %180 = arith.addf %178, %179 : vector<8x1xf32>
    %181 = arith.mulf %47, %158 : vector<8x1xf32>
    %182 = arith.addf %180, %181 : vector<8x1xf32>
    %cst_40 = arith.constant 0.00138888892 : f32
    %183 = vector.broadcast %cst_40 : f32 to vector<8x1xf32>
    %184 = arith.mulf %183, %172 : vector<8x1xf32>
    %185 = arith.addf %161, %184 : vector<8x1xf32>
    %cst_41 = arith.constant 0.00138888892 : f32
    %186 = vector.broadcast %cst_41 : f32 to vector<8x1xf32>
    %187 = arith.mulf %186, %177 : vector<8x1xf32>
    %188 = arith.addf %164, %187 : vector<8x1xf32>
    %cst_42 = arith.constant 0.00138888892 : f32
    %189 = vector.broadcast %cst_42 : f32 to vector<8x1xf32>
    %190 = arith.mulf %189, %182 : vector<8x1xf32>
    %191 = arith.addf %167, %190 : vector<8x1xf32>
    %192 = arith.mulf %37, %172 : vector<8x1xf32>
    %193 = arith.mulf %38, %177 : vector<8x1xf32>
    %194 = arith.addf %192, %193 : vector<8x1xf32>
    %195 = arith.mulf %39, %182 : vector<8x1xf32>
    %196 = arith.addf %194, %195 : vector<8x1xf32>
    %197 = arith.mulf %41, %172 : vector<8x1xf32>
    %198 = arith.mulf %42, %177 : vector<8x1xf32>
    %199 = arith.addf %197, %198 : vector<8x1xf32>
    %200 = arith.mulf %43, %182 : vector<8x1xf32>
    %201 = arith.addf %199, %200 : vector<8x1xf32>
    %202 = arith.mulf %45, %172 : vector<8x1xf32>
    %203 = arith.mulf %46, %177 : vector<8x1xf32>
    %204 = arith.addf %202, %203 : vector<8x1xf32>
    %205 = arith.mulf %47, %182 : vector<8x1xf32>
    %206 = arith.addf %204, %205 : vector<8x1xf32>
    %cst_43 = arith.constant 1.98412701E-4 : f32
    %207 = vector.broadcast %cst_43 : f32 to vector<8x1xf32>
    %208 = arith.mulf %207, %196 : vector<8x1xf32>
    %209 = arith.addf %185, %208 : vector<8x1xf32>
    %cst_44 = arith.constant 1.98412701E-4 : f32
    %210 = vector.broadcast %cst_44 : f32 to vector<8x1xf32>
    %211 = arith.mulf %210, %201 : vector<8x1xf32>
    %212 = arith.addf %188, %211 : vector<8x1xf32>
    %cst_45 = arith.constant 1.98412701E-4 : f32
    %213 = vector.broadcast %cst_45 : f32 to vector<8x1xf32>
    %214 = arith.mulf %213, %206 : vector<8x1xf32>
    %215 = arith.addf %191, %214 : vector<8x1xf32>
    %216 = arith.mulf %37, %196 : vector<8x1xf32>
    %217 = arith.mulf %38, %201 : vector<8x1xf32>
    %218 = arith.addf %216, %217 : vector<8x1xf32>
    %219 = arith.mulf %39, %206 : vector<8x1xf32>
    %220 = arith.addf %218, %219 : vector<8x1xf32>
    %221 = arith.mulf %41, %196 : vector<8x1xf32>
    %222 = arith.mulf %42, %201 : vector<8x1xf32>
    %223 = arith.addf %221, %222 : vector<8x1xf32>
    %224 = arith.mulf %43, %206 : vector<8x1xf32>
    %225 = arith.addf %223, %224 : vector<8x1xf32>
    %226 = arith.mulf %45, %196 : vector<8x1xf32>
    %227 = arith.mulf %46, %201 : vector<8x1xf32>
    %228 = arith.addf %226, %227 : vector<8x1xf32>
    %229 = arith.mulf %47, %206 : vector<8x1xf32>
    %230 = arith.addf %228, %229 : vector<8x1xf32>
    %cst_46 = arith.constant 2.48015876E-5 : f32
    %231 = vector.broadcast %cst_46 : f32 to vector<8x1xf32>
    %232 = arith.mulf %231, %220 : vector<8x1xf32>
    %233 = arith.addf %209, %232 : vector<8x1xf32>
    %cst_47 = arith.constant 2.48015876E-5 : f32
    %234 = vector.broadcast %cst_47 : f32 to vector<8x1xf32>
    %235 = arith.mulf %234, %225 : vector<8x1xf32>
    %236 = arith.addf %212, %235 : vector<8x1xf32>
    %cst_48 = arith.constant 2.48015876E-5 : f32
    %237 = vector.broadcast %cst_48 : f32 to vector<8x1xf32>
    %238 = arith.mulf %237, %230 : vector<8x1xf32>
    %239 = arith.addf %215, %238 : vector<8x1xf32>
    %240 = arith.mulf %37, %220 : vector<8x1xf32>
    %241 = arith.mulf %38, %225 : vector<8x1xf32>
    %242 = arith.addf %240, %241 : vector<8x1xf32>
    %243 = arith.mulf %39, %230 : vector<8x1xf32>
    %244 = arith.addf %242, %243 : vector<8x1xf32>
    %245 = arith.mulf %41, %220 : vector<8x1xf32>
    %246 = arith.mulf %42, %225 : vector<8x1xf32>
    %247 = arith.addf %245, %246 : vector<8x1xf32>
    %248 = arith.mulf %43, %230 : vector<8x1xf32>
    %249 = arith.addf %247, %248 : vector<8x1xf32>
    %250 = arith.mulf %45, %220 : vector<8x1xf32>
    %251 = arith.mulf %46, %225 : vector<8x1xf32>
    %252 = arith.addf %250, %251 : vector<8x1xf32>
    %253 = arith.mulf %47, %230 : vector<8x1xf32>
    %254 = arith.addf %252, %253 : vector<8x1xf32>
    %cst_49 = arith.constant 2.75573188E-6 : f32
    %255 = vector.broadcast %cst_49 : f32 to vector<8x1xf32>
    %256 = arith.mulf %255, %244 : vector<8x1xf32>
    %257 = arith.addf %233, %256 : vector<8x1xf32>
    %cst_50 = arith.constant 2.75573188E-6 : f32
    %258 = vector.broadcast %cst_50 : f32 to vector<8x1xf32>
    %259 = arith.mulf %258, %249 : vector<8x1xf32>
    %260 = arith.addf %236, %259 : vector<8x1xf32>
    %cst_51 = arith.constant 2.75573188E-6 : f32
    %261 = vector.broadcast %cst_51 : f32 to vector<8x1xf32>
    %262 = arith.mulf %261, %254 : vector<8x1xf32>
    %263 = arith.addf %239, %262 : vector<8x1xf32>
    %264 = arith.mulf %37, %244 : vector<8x1xf32>
    %265 = arith.mulf %38, %249 : vector<8x1xf32>
    %266 = arith.addf %264, %265 : vector<8x1xf32>
    %267 = arith.mulf %39, %254 : vector<8x1xf32>
    %268 = arith.addf %266, %267 : vector<8x1xf32>
    %269 = arith.mulf %41, %244 : vector<8x1xf32>
    %270 = arith.mulf %42, %249 : vector<8x1xf32>
    %271 = arith.addf %269, %270 : vector<8x1xf32>
    %272 = arith.mulf %43, %254 : vector<8x1xf32>
    %273 = arith.addf %271, %272 : vector<8x1xf32>
    %274 = arith.mulf %45, %244 : vector<8x1xf32>
    %275 = arith.mulf %46, %249 : vector<8x1xf32>
    %276 = arith.addf %274, %275 : vector<8x1xf32>
    %277 = arith.mulf %47, %254 : vector<8x1xf32>
    %278 = arith.addf %276, %277 : vector<8x1xf32>
    %cst_52 = arith.constant 2.755732E-7 : f32
    %279 = vector.broadcast %cst_52 : f32 to vector<8x1xf32>
    %280 = arith.mulf %279, %268 : vector<8x1xf32>
    %281 = arith.addf %257, %280 : vector<8x1xf32>
    %cst_53 = arith.constant 2.755732E-7 : f32
    %282 = vector.broadcast %cst_53 : f32 to vector<8x1xf32>
    %283 = arith.mulf %282, %273 : vector<8x1xf32>
    %284 = arith.addf %260, %283 : vector<8x1xf32>
    %cst_54 = arith.constant 2.755732E-7 : f32
    %285 = vector.broadcast %cst_54 : f32 to vector<8x1xf32>
    %286 = arith.mulf %285, %278 : vector<8x1xf32>
    %287 = arith.addf %263, %286 : vector<8x1xf32>
    %288 = arith.mulf %37, %268 : vector<8x1xf32>
    %289 = arith.mulf %38, %273 : vector<8x1xf32>
    %290 = arith.addf %288, %289 : vector<8x1xf32>
    %291 = arith.mulf %39, %278 : vector<8x1xf32>
    %292 = arith.addf %290, %291 : vector<8x1xf32>
    %293 = arith.mulf %41, %268 : vector<8x1xf32>
    %294 = arith.mulf %42, %273 : vector<8x1xf32>
    %295 = arith.addf %293, %294 : vector<8x1xf32>
    %296 = arith.mulf %43, %278 : vector<8x1xf32>
    %297 = arith.addf %295, %296 : vector<8x1xf32>
    %298 = arith.mulf %45, %268 : vector<8x1xf32>
    %299 = arith.mulf %46, %273 : vector<8x1xf32>
    %300 = arith.addf %298, %299 : vector<8x1xf32>
    %301 = arith.mulf %47, %278 : vector<8x1xf32>
    %302 = arith.addf %300, %301 : vector<8x1xf32>
    %cst_55 = arith.constant 2.50521079E-8 : f32
    %303 = vector.broadcast %cst_55 : f32 to vector<8x1xf32>
    %304 = arith.mulf %303, %292 : vector<8x1xf32>
    %305 = arith.addf %281, %304 : vector<8x1xf32>
    %cst_56 = arith.constant 2.50521079E-8 : f32
    %306 = vector.broadcast %cst_56 : f32 to vector<8x1xf32>
    %307 = arith.mulf %306, %297 : vector<8x1xf32>
    %308 = arith.addf %284, %307 : vector<8x1xf32>
    %cst_57 = arith.constant 2.50521079E-8 : f32
    %309 = vector.broadcast %cst_57 : f32 to vector<8x1xf32>
    %310 = arith.mulf %309, %302 : vector<8x1xf32>
    %311 = arith.addf %287, %310 : vector<8x1xf32>
    %312 = arith.mulf %37, %292 : vector<8x1xf32>
    %313 = arith.mulf %38, %297 : vector<8x1xf32>
    %314 = arith.addf %312, %313 : vector<8x1xf32>
    %315 = arith.mulf %39, %302 : vector<8x1xf32>
    %316 = arith.addf %314, %315 : vector<8x1xf32>
    %317 = arith.mulf %41, %292 : vector<8x1xf32>
    %318 = arith.mulf %42, %297 : vector<8x1xf32>
    %319 = arith.addf %317, %318 : vector<8x1xf32>
    %320 = arith.mulf %43, %302 : vector<8x1xf32>
    %321 = arith.addf %319, %320 : vector<8x1xf32>
    %322 = arith.mulf %45, %292 : vector<8x1xf32>
    %323 = arith.mulf %46, %297 : vector<8x1xf32>
    %324 = arith.addf %322, %323 : vector<8x1xf32>
    %325 = arith.mulf %47, %302 : vector<8x1xf32>
    %326 = arith.addf %324, %325 : vector<8x1xf32>
    %cst_58 = arith.constant 2.08767559E-9 : f32
    %327 = vector.broadcast %cst_58 : f32 to vector<8x1xf32>
    %328 = arith.mulf %327, %316 : vector<8x1xf32>
    %329 = arith.addf %305, %328 : vector<8x1xf32>
    %cst_59 = arith.constant 2.08767559E-9 : f32
    %330 = vector.broadcast %cst_59 : f32 to vector<8x1xf32>
    %331 = arith.mulf %330, %321 : vector<8x1xf32>
    %332 = arith.addf %308, %331 : vector<8x1xf32>
    %cst_60 = arith.constant 2.08767559E-9 : f32
    %333 = vector.broadcast %cst_60 : f32 to vector<8x1xf32>
    %334 = arith.mulf %333, %326 : vector<8x1xf32>
    %335 = arith.addf %311, %334 : vector<8x1xf32>
    %cst_61 = arith.constant 0.000000e+00 : f32
    %336 = vector.broadcast %cst_61 : f32 to vector<8x128xf32>
    %c0_62 = arith.constant 0 : index
    %c0_63 = arith.constant 0 : index
    %337 = vector.load %arg12[%c0_62, %c0_63] : memref<8x128xf32, #tpu.memory_space<vmem>>, vector<8x128xf32>
    tpu.vector_store %arg12[%c0_62, %c0_63], %336 {strides = array<i32>} : memref<8x128xf32, #tpu.memory_space<vmem>>, vector<8x128xf32>,
    %c0_64 = arith.constant 0 : index
    %c0_65 = arith.constant 0 : index
    %338 = vector.load %arg12[%c0_64, %c0_65] : memref<8x128xf32, #tpu.memory_space<vmem>>, vector<8x1xf32>
    tpu.vector_store %arg12[%c0_64, %c0_65], %329 {strides = array<i32>} : memref<8x128xf32, #tpu.memory_space<vmem>>, vector<8x1xf32>,
    %c0_66 = arith.constant 0 : index
    %c1_67 = arith.constant 1 : index
    %339 = vector.load %arg12[%c0_66, %c1_67] : memref<8x128xf32, #tpu.memory_space<vmem>>, vector<8x1xf32>
    tpu.vector_store %arg12[%c0_66, %c1_67], %332 {strides = array<i32>} : memref<8x128xf32, #tpu.memory_space<vmem>>, vector<8x1xf32>,
    %c0_68 = arith.constant 0 : index
    %c2_69 = arith.constant 2 : index
    %340 = vector.load %arg12[%c0_68, %c2_69] : memref<8x128xf32, #tpu.memory_space<vmem>>, vector<8x1xf32>
    tpu.vector_store %arg12[%c0_68, %c2_69], %335 {strides = array<i32>} : memref<8x128xf32, #tpu.memory_space<vmem>>, vector<8x1xf32>,
    return
  }
  func.func @transform_0(%arg0: i32) -> (i32, i32) {
    %c0_i32 = arith.constant 0 : i32
    %c0_i32_0 = arith.constant 0 : i32
    return %arg0, %c0_i32 : i32, i32
  }
  func.func @transform_1(%arg0: i32) -> (i32, i32) {
    %c0_i32 = arith.constant 0 : i32
    %c0_i32_0 = arith.constant 0 : i32
    return %arg0, %c0_i32 : i32, i32
  }
  func.func @transform_2(%arg0: i32) -> (i32, i32) {
    %c0_i32 = arith.constant 0 : i32
    %c0_i32_0 = arith.constant 0 : i32
    %c0_i32_1 = arith.constant 0 : i32
    return %c0_i32, %c0_i32_0 : i32, i32
  }
  func.func @transform_3(%arg0: i32) -> (i32, i32) {
    %c0_i32 = arith.constant 0 : i32
    %c0_i32_0 = arith.constant 0 : i32
    %c0_i32_1 = arith.constant 0 : i32
    return %c0_i32, %c0_i32_0 : i32, i32
  }
  func.func @transform_4(%arg0: i32) -> (i32, i32) {
    %c0_i32 = arith.constant 0 : i32
    %c0_i32_0 = arith.constant 0 : i32
    %c0_i32_1 = arith.constant 0 : i32
    return %c0_i32, %c0_i32_0 : i32, i32
  }
  func.func @transform_5(%arg0: i32) -> (i32, i32) {
    %c0_i32 = arith.constant 0 : i32
    %c0_i32_0 = arith.constant 0 : i32
    %c0_i32_1 = arith.constant 0 : i32
    return %c0_i32, %c0_i32_0 : i32, i32
  }
  func.func @transform_6(%arg0: i32) -> (i32, i32) {
    %c0_i32 = arith.constant 0 : i32
    %c0_i32_0 = arith.constant 0 : i32
    %c0_i32_1 = arith.constant 0 : i32
    return %c0_i32, %c0_i32_0 : i32, i32
  }
  func.func @transform_7(%arg0: i32) -> (i32, i32) {
    %c0_i32 = arith.constant 0 : i32
    %c0_i32_0 = arith.constant 0 : i32
    %c0_i32_1 = arith.constant 0 : i32
    return %c0_i32, %c0_i32_0 : i32, i32
  }
  func.func @transform_8(%arg0: i32) -> (i32, i32) {
    %c0_i32 = arith.constant 0 : i32
    %c0_i32_0 = arith.constant 0 : i32
    %c0_i32_1 = arith.constant 0 : i32
    return %c0_i32, %c0_i32_0 : i32, i32
  }
  func.func @transform_9(%arg0: i32) -> (i32, i32) {
    %c0_i32 = arith.constant 0 : i32
    %c0_i32_0 = arith.constant 0 : i32
    %c0_i32_1 = arith.constant 0 : i32
    return %c0_i32, %c0_i32_0 : i32, i32
  }
  func.func @transform_10(%arg0: i32) -> (i32, i32) {
    %c0_i32 = arith.constant 0 : i32
    %c0_i32_0 = arith.constant 0 : i32
    %c0_i32_1 = arith.constant 0 : i32
    return %c0_i32, %c0_i32_0 : i32, i32
  }
  func.func @transform_11(%arg0: i32) -> (i32, i32) {
    %c0_i32 = arith.constant 0 : i32
    %c0_i32_0 = arith.constant 0 : i32
    return %arg0, %c0_i32 : i32, i32
  }
}

</mosaic_0001>

<bundles_post_ra>
// kernel: forward.1
= control target key start
LH: loop header
LB: loop body
LE: loop exit
PB: predicated region body
PF: predicated region fallthrough
CT: control target
= control target key end

     0   :  { %16 = vsyncpa [#allocation3], 0  ;;  %s4529_s0 = inlined_call_operand.vmem [shape: f32[16,1], index: 0, kind: input, shape index: {}]   ;;  %s4530_s1 = inlined_call_operand.vmem [shape: f32[16,3], index: 1, kind: input, shape index: {}]   ;;  %s4531_s2 = inlined_call_operand.vmem [shape: f32[1,512], index: 2, kind: input, shape index: {}]   ;;  %s4532_s3 = inlined_call_operand.hbm [shape: f32[512,81], index: 3, kind: input, shape index: {}]   ;;  %s4533_s4 = inlined_call_operand.vmem [shape: f32[1,81], index: 4, kind: input, shape index: {}]   ;;  %s4534_s5 = inlined_call_operand.hbm [shape: f32[512,81], index: 5, kind: input, shape index: {}]   ;;  %s4535_s6 = inlined_call_operand.vmem [shape: f32[1,81], index: 6, kind: input, shape index: {}]   ;;  %s4536_s7 = inlined_call_operand.vmem [shape: f32[1,10], index: 7, kind: input, shape index: {}]   ;;  %s4537_s8 = inlined_call_operand.vmem [shape: f32[1,10], index: 8, kind: input, shape index: {}]   ;;  %s4538_s9 = inlined_call_operand.vmem [shape: f32[10,16], index: 9, kind: input, shape index: {}]   ;;  %s4539_s10 = inlined_call_operand.hbm [shape: f32[81,16], index: 10, kind: input, shape index: {}]   ;;  %s4540_s11 = inlined_call_operand.vmem [shape: f32[16,128], index: 11, kind: output, shape index: {}]  }
   0x1   :  { %17 = vsyncpa [#allocation5], 0  ;;  %s3401_s17 = smov 0  }
   0x2 LB: > { %s3407_s18 = sadd.s32 4294967295, %s3304_s17   ;;  %p2716_p0 = scmp.ge.s32.totalorder %s3304_s17, 1  ;;  %s3304_s17 = sphi %s3401_s17, %s23_s17  }
   0x3   : > { %p295_p1 = scmp.lt.s32.totalorder %s3304_s17, 3  ;;  %p4541_p2 = scmp.eq.s32.totalorder %s3407_s18, 0 }
   0x4   : > { %s3306_s20 = smov [#allocation4]   ;;  %s3307_s22 = smov [#allocation2]  }
   0x5   : > { %p3412_p3 = pnand %p2716_p0, %p295_p1  ;;  %s326_s21 = sshll.u32 %s3306_s20, 4  ;;  %s327_s21 = int_to_ptr.vmem [resolvable:$true] %s326_s21 }
   0x6   : > { %s310_s23 = sshll.u32 %s3307_s22, 4  ;;  %s3308_s25 = smov [#allocation6]   ;;  %s3424_s23 = int_to_ptr.vmem [resolvable:$true] %s310_s23 }
   0x7   : > { %s4543_s19 = scalar_select %p3412_p3, 1, 0 }
   0x8   : > { %p3125_p4 = pneg %p3412_p3  ;;  %s351_s26 = sshll.u32 %s3308_s25, 4  ;;  %s3426_s26 = int_to_ptr.vmem [resolvable:$true] %s351_s26 }
   0x9   : > { %s3206_s29 = scalar_lea.hbm %s4534_s5, 8192 }
   0xa   : > { %p3420_p5 = pnand %p4541_p2, %p3125_p4  ;;  %p3207_p6 = scmp.ne.s32.totalorder %s4534_s5, %s3206_s29 }
   0xb   : > { %p3213_p10 = scmp.lt.u32.totalorder %s3206_s29, %s4534_s5 }
   0xc   : > { %p3436_p7 = pneg %p3420_p5 }
   0xe   : > { %p3209_p8 = pnand %p3436_p7, %p3207_p6 }
  0x10   : > { %p3210_p9 = pneg %p3209_p8 }
  0x12   : > { %p3215_p11 = pnand %p3213_p10, %p3210_p9 }
  0x14   : > { %3218 = shalt.err (!%p3215_p11)
}
  0x15   : > { %s3219_s16 = scalar_lea.vmem %s327_s21, 8192  ;;  %p3227_p1 = scmp.lt.s32.totalorder %s327_s21, %s327_s21 }
  0x16   : > { %p3220_p12 = scmp.ne.s32.totalorder %s327_s21, %s3219_s16  ;;  %p3228_p4 = scmp.lt.s32.totalorder %s3219_s16, %s3219_s16 }
  0x18   : > { %p3222_p13 = pnand %p3220_p12, %p3436_p7  ;;  %p3229_p2 = por %p3228_p4, %p3227_p1 }
  0x1a   : > { %p3223_p0 = pneg %p3222_p13 }
  0x1c   : > { %p3230_p3 = pnand %p3229_p2, %p3223_p0 }
  0x1e   : > { %3233 = shalt.err (!%p3230_p3)
}
  0x1f   : > { %s3309_s20 = smov 128   ;;  %s3310_s22 = smov 8  }
  0x20   : > { %3131 = dma.hbm_to_vmem [thread:$0]  (!%p3420_p5), %s4534_s5, 8192, %s327_s21, [#allocation5], %s3309_s20, %s3309_s20, %s3310_s22  }
  0x21   : > { %s3234_s30 = scalar_lea.hbm %s4532_s3, 8192 }
  0x22   : > { %p3235_p2 = scmp.ne.s32.totalorder %s4532_s3, %s3234_s30  ;;  %p3241_p8 = scmp.lt.u32.totalorder %s3234_s30, %s4532_s3 }
  0x24   : > { %p3237_p3 = pnand %p3235_p2, %p3436_p7 }
  0x26   : > { %p3238_p6 = pneg %p3237_p3 }
  0x28   : > { %p3243_p9 = pnand %p3241_p8, %p3238_p6 }
  0x2a   : > { %3246 = shalt.err (!%p3243_p9)
}
  0x2b   : > { %s3247_s21 = scalar_lea.vmem %s3424_s23, 8192  ;;  %p3255_p13 = scmp.lt.s32.totalorder %s3424_s23, %s3424_s23 }
  0x2c   : > { %p3248_p10 = scmp.ne.s32.totalorder %s3424_s23, %s3247_s21  ;;  %p3256_p0 = scmp.lt.s32.totalorder %s3247_s21, %s3247_s21 }
  0x2e   : > { %p3250_p11 = pnand %p3248_p10, %p3436_p7  ;;  %p3257_p1 = por %p3256_p0, %p3255_p13 }
  0x30   : > { %p3251_p12 = pneg %p3250_p11 }
  0x32   : > { %p3258_p4 = pnand %p3257_p1, %p3251_p12 }
  0x34   : > { %3261 = shalt.err (!%p3258_p4)
}
  0x35   : > { %3128 = dma.hbm_to_vmem [thread:$0]  (!%p3420_p5), %s4532_s3, 8192, %s3424_s23, [#allocation3], %s3309_s20, %s3309_s20, %s3310_s22  }
  0x36   : > { %s3262_s30 = scalar_lea.hbm %s4539_s10, 1408 }
  0x37   : > { %p3263_p2 = scmp.ne.s32.totalorder %s4539_s10, %s3262_s30  ;;  %p3269_p8 = scmp.lt.u32.totalorder %s3262_s30, %s4539_s10 }
  0x39   : > { %p3265_p3 = pnand %p3263_p2, %p3436_p7 }
  0x3b   : > { %p3266_p6 = pneg %p3265_p3 }
  0x3d   : > { %p3271_p9 = pnand %p3269_p8, %p3266_p6 }
  0x3f   : > { %3274 = shalt.err (!%p3271_p9)
}
  0x40   : > { %s3275_s23 = scalar_lea.vmem %s3426_s26, 1408  ;;  %p3283_p13 = scmp.lt.s32.totalorder %s3426_s26, %s3426_s26 }
  0x41   : > { %p3276_p10 = scmp.ne.s32.totalorder %s3426_s26, %s3275_s23  ;;  %p3284_p0 = scmp.lt.s32.totalorder %s3275_s23, %s3275_s23 }
  0x43   : > { %p3278_p11 = pnand %p3276_p10, %p3436_p7  ;;  %p3285_p1 = por %p3284_p0, %p3283_p13 }
  0x45   : > { %p3279_p12 = pneg %p3278_p11 }
  0x47   : > { %p3286_p4 = pnand %p3285_p1, %p3279_p12 }
  0x49   : > { %3289 = shalt.err (!%p3286_p4)
}
  0x4a   : > { %3134 = dma.hbm_to_vmem [thread:$0]  (!%p3420_p5), %s4539_s10, 1408, %s3426_s26, [#allocation5], %s3309_s20, %s3309_s20, %s3310_s22  }
  0x4b   : > { %p4546_p2 = scmp.ne.s32.totalorder %s4543_s19, 0 }
  0x4c   : > { %p4547_p7 = scmp.eq.s32.totalorder (!%p4546_p2), %s3407_s18, 0 }
  0x4d   : > { %381 = sbr.rel (%p4546_p2) target bundleno = 3710 (0xe7e), region = 64 }
  0x54   : > { %3295 = dma.done.wait (%p4547_p7), [#allocation3], 8192   ;;  %p4548_p3 = pmov %p4547_p7 }
  0x56   : > { %3297 = vsyncadd (%p4548_p3), [#allocation3], 4294959104  ;;  %p4549_p6 = pmov %p4548_p3 }
  0x57   : > { %p4550_p8 = pmov %p4548_p3 }
  0x58   : > { %3299 = dma.done.wait (%p4549_p6), [#allocation5], 9600  }
  0x59   : > { %3301 = vsyncadd (%p4550_p8), [#allocation5], 4294957696  ;;  %p431_p9 = scmp.lt.s32.totalorder %s3407_s18, 1  ;;  %v3311_v0 = vmov 0   ;;  %v923_v2 = vld [vmem:[#allocation2 + $0x80] sm:$0xff]  ;;  %v924_v3 = vld [vmem:[#allocation2 + $0x88] sm:$0xff] }
  0x5a   : > { %3184 = vset.pattern.permute.xlu0 %v3311_v0  ;;  %v955_v4 = vld [vmem:[#allocation2 + $0x180] sm:$0xff]  ;;  %v2945_v5 = vpack.c.bf16 %v924_v3, %v923_v2  ;;  %v956_v6 = vld [vmem:[#allocation2 + $0x188] sm:$0xff]  ;;  %v925_v13 = vld [vmem:[#allocation2 + $0x90] sm:$0xff]  ;;  %s3324_s20 = smov 5   ;;  %s3325_s29 = smov 126  }
  0x5b   : > { %s4560_s18 = smov (!%p431_p9, %s3407_s18), 1  ;;  %v907_v7 = vld [vmem:[#allocation2] sm:$0xff]  ;;  %v908_v8 = vld [vmem:[#allocation2 + $0x8] sm:$0xff]  ;;  %v2977_v9 = vpack.c.bf16 %v956_v6, %v955_v4  ;;  %v926_v15 = vld [vmem:[#allocation2 + $0x98] sm:$0xff]  ;;  %s3326_s30 = smov 127  }
  0x5c   : > { %s3519_s19 = sshll.u32 %s4560_s18, 3  ;;  %v2947_v10 = vpack.c.bf16 %v908_v8, %v907_v7  ;;  %v939_v11 = vld [vmem:[#allocation2 + $0x100] sm:$0xff]  ;;  %v940_v12 = vld [vmem:[#allocation2 + $0x108] sm:$0xff]  ;;  %2946 = vmatprep.subr.bf16.mxu0 %v2945_v5  ;;  %v957_v16 = vld [vmem:[#allocation2 + $0x190] sm:$0xff]  ;;  %v2949_v18 = vpack.c.bf16 %v926_v15, %v925_v13  ;;  %s3323_s18 = smov 9  }
  0x5d   : > { %s434_s13 = scalar_lea.vmem %s4529_s0, %s3519_s19  ;;  %v2979_v14 = vpack.c.bf16 %v940_v12, %v939_v11  ;;  %v958_v17 = vld [vmem:[#allocation2 + $0x198] sm:$0xff]  ;;  %2978 = vmatprep.subr.bf16.mxu1 %v2977_v9  ;;  %v909_v20 = vld [vmem:[#allocation2 + $0x10] sm:$0xff]  ;;  %v927_v25 = vld [vmem:[#allocation2 + $0xa0] sm:$0xff]  ;;  %s3859_s14 = scalar_lea.vmem %s4540_s11, %s3519_s19 }
  0x5e   : > { %v443_v1 = vld [vmem:[%s434_s13] sm:$0xff]  ;;  %2948 = vmatpush3.bf16.msra.mxu0 %v2947_v10  ;;  %v2981_v19 = vpack.c.bf16 %v958_v17, %v957_v16  ;;  %v910_v21 = vld [vmem:[#allocation2 + $0x18] sm:$0xff]  ;;  %v941_v22 = vld [vmem:[#allocation2 + $0x110] sm:$0xff]  ;;  %s4009_s26 = scalar_lea.vmem %s4530_s1, %s3519_s19  ;;  %s3322_s13 = smov 13  }
  0x5f   : > { %447 = vperm.xlu0 %3184, %v443_v1   ;;  %2980 = vmatpush3.bf16.msra.mxu1 %v2979_v14  ;;  %v2951_v23 = vpack.c.bf16 %v910_v21, %v909_v20  ;;  %v942_v24 = vld [vmem:[#allocation2 + $0x118] sm:$0xff]  ;;  %v928_v26 = vld [vmem:[#allocation2 + $0xa8] sm:$0xff]  ;;  %v959_v29 = vld [vmem:[#allocation2 + $0x1a0] sm:$0xff]  ;;  %s3327_s12 = smov 125   ;;  %s3328_s15 = smov 2  }
  0x60   : > { %2950 = vmatprep.subr.bf16.mxu0 %v2949_v18  ;;  %2982 = vmatprep.subr.bf16.mxu1 %v2981_v19  ;;  %v2983_v27 = vpack.c.bf16 %v942_v24, %v941_v22  ;;  %v2953_v28 = vpack.c.bf16 %v928_v26, %v927_v25  ;;  %v960_v30 = vld [vmem:[#allocation2 + $0x1a8] sm:$0xff]  ;;  %v911_v31 = vld [vmem:[#allocation2 + $0x20] sm:$0xff]  ;;  %v929_v37 = vld [vmem:[#allocation2 + $0xb0] sm:$0xff]  ;;  %s3329_s16 = smov 6   ;;  %s3330_s23 = smov 3  }
  0x61   : > { %v2985_v32 = vpack.c.bf16 %v960_v30, %v959_v29  ;;  %v912_v33 = vld [vmem:[#allocation2 + $0x28] sm:$0xff]  ;;  %v943_v34 = vld [vmem:[#allocation2 + $0x120] sm:$0xff]  ;;  %v930_v38 = vld [vmem:[#allocation2 + $0xb8] sm:$0xff]  ;;  %s3331_s21 = smov 123   ;;  %s3332_s25 = smov 1  }
  0x62   : > { %v944_v35 = vld [vmem:[#allocation2 + $0x128] sm:$0xff]  ;;  %2952 = vmatpush3.bf16.msra.mxu0 %v2951_v23  ;;  %v2955_v36 = vpack.c.bf16 %v912_v33, %v911_v31  ;;  %v961_v39 = vld [vmem:[#allocation2 + $0x1b0] sm:$0xff]  ;;  %v2957_v41 = vpack.c.bf16 %v930_v38, %v929_v37  ;;  %v962_v42 = vld [vmem:[#allocation2 + $0x1b8] sm:$0xff]  ;;  %s3333_s24 = smov 122   ;;  %s3336_s19 = smov 121  }
  0x63   : > { %2984 = vmatpush3.bf16.msra.mxu1 %v2983_v27  ;;  %2954 = vmatprep.subr.bf16.mxu0 %v2953_v28  ;;  %v2987_v40 = vpack.c.bf16 %v944_v35, %v943_v34  ;;  %v913_v43 = vld [vmem:[#allocation2 + $0x30] sm:$0xff]  ;;  %v914_v44 = vld [vmem:[#allocation2 + $0x38] sm:$0xff]  ;;  %v2989_v45 = vpack.c.bf16 %v962_v42, %v961_v39  ;;  %v931_v48 = vld [vmem:[#allocation2 + $0xc0] sm:$0xff]  ;;  %s3337_s22 = smov 124   ;;  %s3339_s27 = smov 120  }
  0x64   : > { %2986 = vmatprep.subr.bf16.mxu1 %v2985_v32  ;;  %v945_v46 = vld [vmem:[#allocation2 + $0x130] sm:$0xff]  ;;  %v946_v47 = vld [vmem:[#allocation2 + $0x138] sm:$0xff]  ;;  %v932_v49 = vld [vmem:[#allocation2 + $0xc8] sm:$0xff]  ;;  %v2959_v52 = vpack.c.bf16 %v914_v44, %v913_v43  ;;  %s3340_s28 = smov 117  }
  0x65   : > { %v963_v50 = vld [vmem:[#allocation2 + $0x1c0] sm:$0xff]  ;;  %v964_v51 = vld [vmem:[#allocation2 + $0x1c8] sm:$0xff]  ;;  %v2991_v53 = vpack.c.bf16 %v946_v47, %v945_v46  ;;  %v2961_v54 = vpack.c.bf16 %v932_v49, %v931_v48  ;;  %v933_v60 = vld [vmem:[#allocation2 + $0xd0] sm:$0xff] }
  0x66   : > { %2956 = vmatpush3.bf16.msra.mxu0 %v2955_v36  ;;  %v915_v55 = vld [vmem:[#allocation2 + $0x40] sm:$0xff]  ;;  %v916_v56 = vld [vmem:[#allocation2 + $0x48] sm:$0xff]  ;;  %v2993_v58 = vpack.c.bf16 %v964_v51, %v963_v50  ;;  %v934_v61 = vld [vmem:[#allocation2 + $0xd8] sm:$0xff] }
  0x67   : > { %2988 = vmatpush3.bf16.msra.mxu1 %v2987_v40  ;;  %2958 = vmatprep.subr.bf16.mxu0 %v2957_v41  ;;  %v947_v57 = vld [vmem:[#allocation2 + $0x140] sm:$0xff]  ;;  %v948_v59 = vld [vmem:[#allocation2 + $0x148] sm:$0xff]  ;;  %v965_v62 = vld [vmem:[#allocation2 + $0x1d0] sm:$0xff]  ;;  %v2963_v0 = vpack.c.bf16 %v916_v56, %v915_v55  ;;  %v2965_v2 = vpack.c.bf16 %v934_v61, %v933_v60  ;;  %v451_v40 = vlaneseq }
  0x68   : > { %2990 = vmatprep.subr.bf16.mxu1 %v2989_v45  ;;  %v966_v63 = vld [vmem:[#allocation2 + $0x1d8] sm:$0xff]  ;;  %v2995_v1 = vpack.c.bf16 %v948_v59, %v947_v57  ;;  %v917_v3 = vld [vmem:[#allocation2 + $0x50] sm:$0xff]  ;;  %v935_v8 = vld [vmem:[#allocation2 + $0xe0] sm:$0xff] }
  0x69   : > { %v918_v4 = vld [vmem:[#allocation2 + $0x58] sm:$0xff]  ;;  %v949_v5 = vld [vmem:[#allocation2 + $0x150] sm:$0xff]  ;;  %v2997_v6 = vpack.c.bf16 %v966_v63, %v965_v62  ;;  %v936_v9 = vld [vmem:[#allocation2 + $0xe8] sm:$0xff]  ;;  %v452_v41 = vshrl.u32 %v451_v40, 7 }
  0x6a   : > { %2960 = vmatpush3.bf16.msra.mxu0 %v2959_v52  ;;  %v950_v7 = vld [vmem:[#allocation2 + $0x158] sm:$0xff]  ;;  %v967_v10 = vld [vmem:[#allocation2 + $0x1e0] sm:$0xff]  ;;  %v968_v11 = vld [vmem:[#allocation2 + $0x1e8] sm:$0xff]  ;;  %v2967_v12 = vpack.c.bf16 %v918_v4, %v917_v3  ;;  %v2969_v14 = vpack.c.bf16 %v936_v9, %v935_v8 }
  0x6b   : > { %2992 = vmatpush3.bf16.msra.mxu1 %v2991_v53  ;;  %2962 = vmatprep.subr.bf16.mxu0 %v2961_v54  ;;  %v2999_v13 = vpack.c.bf16 %v950_v7, %v949_v5  ;;  %v919_v15 = vld [vmem:[#allocation2 + $0x60] sm:$0xff]  ;;  %v920_v16 = vld [vmem:[#allocation2 + $0x68] sm:$0xff]  ;;  %v3001_v18 = vpack.c.bf16 %v968_v11, %v967_v10  ;;  %v937_v20 = vld [vmem:[#allocation2 + $0xf0] sm:$0xff]  ;;  %v457_v42 = vsub.s32 1, %v452_v41  ;;  %v465_v43 = vsub.s32 3, %v452_v41 }
  0x6c   : > { %2994 = vmatprep.subr.bf16.mxu1 %v2993_v58  ;;  %v951_v17 = vld [vmem:[#allocation2 + $0x160] sm:$0xff]  ;;  %v952_v19 = vld [vmem:[#allocation2 + $0x168] sm:$0xff]  ;;  %v938_v21 = vld [vmem:[#allocation2 + $0xf8] sm:$0xff]  ;;  %v2971_v24 = vpack.c.bf16 %v920_v16, %v919_v15  ;;  %v453_v45 = vsub.s32 0, %v452_v41  ;;  %v461_v5 = vsub.s32 2, %v452_v41 }
  0x6d   : > { %v969_v22 = vld [vmem:[#allocation2 + $0x1f0] sm:$0xff]  ;;  %v970_v23 = vld [vmem:[#allocation2 + $0x1f8] sm:$0xff]  ;;  %v3003_v25 = vpack.c.bf16 %v952_v19, %v951_v17  ;;  %v2973_v26 = vpack.c.bf16 %v938_v21, %v937_v20  ;;  %v1134_v34 = vld [vmem:[#allocation4 + $0x80] sm:$0xff]  ;;  %v3312_v21 = vmov 683565275  }
  0x6e   : > { %2964 = vmatpush3.bf16.msra.mxu0 %v2963_v0  ;;  %v921_v27 = vld [vmem:[#allocation2 + $0x70] sm:$0xff]  ;;  %v922_v28 = vld [vmem:[#allocation2 + $0x78] sm:$0xff]  ;;  %v3005_v29 = vpack.c.bf16 %v970_v23, %v969_v22  ;;  %v1135_v35 = vld [vmem:[#allocation4 + $0x88] sm:$0xff] }
  0x6f   : > { %2996 = vmatpush3.bf16.msra.mxu1 %v2995_v1  ;;  %2966 = vmatprep.subr.bf16.mxu0 %v2965_v2  ;;  %v953_v30 = vld [vmem:[#allocation2 + $0x170] sm:$0xff]  ;;  %v954_v31 = vld [vmem:[#allocation2 + $0x178] sm:$0xff]  ;;  %v2975_v32 = vpack.c.bf16 %v922_v28, %v921_v27  ;;  %v1166_v36 = vld [vmem:[#allocation4 + $0x180] sm:$0xff]  ;;  %v3009_v37 = vpack.c.bf16 %v1135_v35, %v1134_v34  ;;  %v3314_v27 = vmov 2131351028  }
  0x70   : > { %2998 = vmatprep.subr.bf16.mxu1 %v2997_v6  ;;  %v3007_v33 = vpack.c.bf16 %v954_v31, %v953_v30  ;;  %v1167_v38 = vld [vmem:[#allocation4 + $0x188] sm:$0xff]  ;;  %v444_v44 = vld [vmem:[%s4531_s2] sm:$0xf]  ;;  %v3316_v31 = vmov 920167782  }
  0x71   : > { %v3041_v39 = vpack.c.bf16 %v1167_v38, %v1166_v36  ;;  %v458_v46 = vrot.slane %v444_v44, %v457_v42  ;;  %v466_v47 = vrot.slane %v444_v44, %v465_v43  ;;  %v454_v48 = vrot.slane %v444_v44, %v453_v45  ;;  %v2746_v0 = vld [vmem:[%s4536_s7] ss:$0 sm:$0xff] }
  0x72   : > { %2968 = vmatpush3.bf16.msra.mxu0 %v2967_v12  ;;  %v2747_v6 = vld [vmem:[%s4537_s8] ss:$0 sm:$0xff]  ;;  %v3564_v15 = vrot.slane %v444_v44, %v461_v5  ;;  %v3317_v38 = vmov 1326507024  }
  0x73   : > { %3000 = vmatpush3.bf16.msra.mxu1 %v2999_v13  ;;  %2970 = vmatprep.subr.bf16.mxu0 %v2969_v14 }
  0x74   : > { %3002 = vmatprep.subr.bf16.mxu1 %v3001_v18 }
  0x76   : > { %2972 = vmatpush3.bf16.msra.mxu0 %v2971_v24 }
  0x77   : > { %3004 = vmatpush3.bf16.msra.mxu1 %v3003_v25  ;;  %2974 = vmatprep.subr.bf16.mxu0 %v2973_v26  ;;  %v3313_v25 = vmov 2475754826  }
  0x78   : > { %3006 = vmatprep.subr.bf16.mxu1 %v3005_v29  ;;  %v3315_v29 = vmov 2102212464  }
  0x7a   : > { %2976 = vmatpush3.bf16.msra.mxu0 %v2975_v32 }
  0x7b   : > { %3008 = vmatpush3.bf16.msra.mxu1 %v3007_v33  ;;  %3010 = vmatprep.subr.bf16.mxu0 %v3009_v37 }
  0x7c   : > { %3042 = vmatprep.subr.bf16.mxu1 %v3041_v39 }
  0xde   : > { %v3528_v49 = vpop.permute.xlu0 %447 }
  0xdf   : > { %v3531_v50 = vmul.f32 %v458_v46, %v3528_v49  ;;  %v3534_v51 = vmul.f32 %v466_v47, %v3528_v49  ;;  %v3537_v52 = vmul.f32 %v454_v48, %v3528_v49  ;;  %v1337_v7 = vmul.f32 %v2746_v0, %v3528_v49 }
  0xe1   : > { %v3540_v53 = vmul.f32 4.0, %v3531_v50  ;;  %v3543_v54 = vmul.f32 4.0, %v3534_v51  ;;  %v3550_v59 = vmul.f32 4.0, %v3537_v52  ;;  %v3566_v16 = vadd.f32 %v2747_v6, %v1337_v7 }
  0xe3   : > { %v583_v55 = vand.u32 2147483647, %v3540_v53  ;;  %v586_v56 = vand.u32 2139095040, %v3540_v53  ;;  %v791_v57 = vand.u32 2147483647, %v3543_v54  ;;  %v794_v58 = vand.u32 2139095040, %v3543_v54 }
  0xe4   : > { %v482_v3 = vand.u32 2139095040, %v3550_v59  ;;  %v479_v19 = vand.u32 2147483647, %v3550_v59  ;;  %vm585_vm13 = vcmp.lt.s32.totalorder %v3540_v53, 0 }
  0xe5   : > { %v587_v60 = vshrl.u32 %v586_v56, 23  ;;  %v590_v61 = vand.u32 8388607, %v583_v55  ;;  %v795_v62 = vshrl.u32 %v794_v58, 23  ;;  %v798_v63 = vand.u32 8388607, %v791_v57 }
  0xe6   : > { %v483_v11 = vshrl.u32 %v482_v3, 23  ;;  %vm3667_vm14 = vcmp.le.f32.partialorder %v583_v55, 0.7853982 }
  0xe7   : > { %v2732_v1 = vadd.s32 4294967169, %v587_v60  ;;  %v2740_v2 = vadd.s32 4294967169, %v795_v62  ;;  %v591_v8 = vor.u32 8388608, %v590_v61  ;;  %v799_v9 = vor.u32 8388608, %v798_v63 }
  0xe8   : > { %v2728_v24 = vadd.s32 4294967169, %v483_v11 }
  0xe9   : > { %v593_v4 = vadd.s32 1, %v2732_v1  ;;  %v801_v10 = vadd.s32 1, %v2740_v2  ;;  %v3568_v17 = vshll.u32 %v591_v8, 8  ;;  %v3570_v18 = vshll.u32 %v799_v9, 8 }
  0xea   : > { %v489_v2 = vadd.s32 1, %v2728_v24 }
  0xeb   : > { %vm594_vm0 = vcmp.gt.s32.totalorder %v593_v4, 0  ;;  %vm802_vm1 = vcmp.gt.s32.totalorder %v801_v10, 0 }
  0xec   : > { %v595_v12 = vsel %vm594_vm0, %v593_v4, 0  ;;  %v803_v23 = vsel %vm802_vm1, %v801_v10, 0  ;;  %vm490_vm11 = vcmp.gt.s32.totalorder %v489_v2, 0  ;;  %vm793_vm1 = vcmp.lt.s32.totalorder %v3543_v54, 0 }
  0xed   : > { %v596_v13 = vshrl.u32 %v595_v12, 5  ;;  %v597_v14 = vand.u32 31, %v595_v12  ;;  %v805_v45 = vand.u32 31, %v803_v23  ;;  %v804_v5 = vshrl.u32 %v803_v23, 5 }
  0xef   : > { %v598_v20 = vsub.s32 32, %v597_v14  ;;  %v600_v22 = vshll.u32 %v3312_v21, %v597_v14  ;;  %v603_v26 = vshll.u32 %v3313_v25, %v597_v14  ;;  %v606_v28 = vshll.u32 %v3314_v27, %v597_v14 }
  0xf0   : > { %v609_v30 = vshll.u32 %v3315_v29, %v597_v14  ;;  %v612_v32 = vshll.u32 %v3316_v31, %v597_v14  ;;  %vm615_vm2 = vcmp.lt.s32.totalorder %v596_v13, 1  ;;  %vm616_vm3 = vcmp.lt.s32.totalorder %v596_v13, 2 }
  0xf1   : > { %v601_v33 = vshrl.u32 %v3313_v25, %v598_v20  ;;  %v604_v34 = vshrl.u32 %v3314_v27, %v598_v20  ;;  %v607_v35 = vshrl.u32 %v3315_v29, %v598_v20  ;;  %v599_v36 = vshrl.u32 %v3312_v21, %v598_v20 }
  0xf2   : > { %v610_v37 = vshrl.u32 %v3316_v31, %v598_v20  ;;  %v613_v39 = vshrl.u32 %v3317_v38, %v598_v20  ;;  %vm617_vm4 = vcmp.lt.s32.totalorder %v596_v13, 3  ;;  %vm618_vm5 = vcmp.lt.s32.totalorder %v596_v13, 4 }
  0xf3   : > { %v602_v40 = vor.u32 %v601_v33, %v600_v22  ;;  %v605_v41 = vor.u32 %v604_v34, %v603_v26  ;;  %v608_v42 = vor.u32 %v607_v35, %v606_v28  ;;  %v806_v62 = vsub.s32 32, %v805_v45 }
  0xf4   : > { %v611_v43 = vor.u32 %v610_v37, %v609_v30  ;;  %v614_v44 = vor.u32 %v613_v39, %v612_v32  ;;  %v808_v6 = vshll.u32 %v3312_v21, %v805_v45  ;;  %v811_v14 = vshll.u32 %v3313_v25, %v805_v45 }
  0xf5   : > { %v619_v46 = vsel %vm615_vm2, %v599_v36, %v602_v40  ;;  %v620_v47 = vsel %vm618_vm5, %v608_v42, 2102212464  ;;  %v623_v48 = vsel %vm615_vm2, %v602_v40, %v605_v41  ;;  %v627_v56 = vsel %vm615_vm2, %v605_v41, %v608_v42 }
  0xf6   : > { %v621_v58 = vsel %vm617_vm4, %v605_v41, %v620_v47  ;;  %v624_v60 = vsel %vm618_vm5, %v611_v43, 920167782  ;;  %v628_v61 = vsel %vm618_vm5, %v614_v44, 1326507024  ;;  %v809_v12 = vshrl.u32 %v3313_v25, %v806_v62 }
  0xf7   : > { %v622_v63 = vsel %vm616_vm3, %v619_v46, %v621_v58  ;;  %v625_v0 = vsel %vm617_vm4, %v608_v42, %v624_v60  ;;  %v629_v1 = vsel %vm617_vm4, %v611_v43, %v628_v61  ;;  %v812_v13 = vshrl.u32 %v3314_v27, %v806_v62 }
  0xf8   : > { %v626_v3 = vsel %vm616_vm3, %v623_v48, %v625_v0  ;;  %v630_v4 = vsel %vm616_vm3, %v627_v56, %v629_v1  ;;  %v638_v11 = vmul.u32 %v3568_v17, %v622_v63  ;;  %v814_v20 = vshll.u32 %v3314_v27, %v805_v45 }
  0xf9   : > { %v3592_v7 = vmul.u32.u64.low %v3568_v17, %v630_v4  ;;  %v3593_v8 = vmul.u32.u64.high %v3568_v17, %v630_v4, %v3592_v7  ;;  %v3596_v9 = vmul.u32.u64.low %v3568_v17, %v626_v3  ;;  %v3597_v10 = vmul.u32.u64.high %v3568_v17, %v626_v3, %v3596_v9 }
  0xfa   : > { %v815_v22 = vshrl.u32 %v3315_v29, %v806_v62  ;;  %v817_v23 = vshll.u32 %v3315_v29, %v805_v45  ;;  %v818_v24 = vshrl.u32 %v3316_v31, %v806_v62  ;;  %v810_v26 = vor.u32 %v809_v12, %v808_v6 }
  0xfb   : > { %v813_v28 = vor.u32 %v812_v13, %v811_v14  ;;  %v820_v30 = vshll.u32 %v3316_v31, %v805_v45  ;;  %v821_v17 = vshrl.u32 %v3317_v38, %v806_v62  ;;  %vm640_vm6 = vc.u32 %v3593_v8, %v3596_v9 }
  0xfc   : > { %v641_v32 = vadd.s32 1, %v3597_v10  ;;  %v807_v33 = vshrl.u32 %v3312_v21, %v806_v62  ;;  %v816_v34 = vor.u32 %v815_v22, %v814_v20  ;;  %v819_v35 = vor.u32 %v818_v24, %v817_v23 }
  0xfd   : > { %v822_v36 = vor.u32 %v821_v17, %v820_v30  ;;  %vm823_vm7 = vcmp.lt.s32.totalorder %v804_v5, 1  ;;  %vm824_vm8 = vcmp.lt.s32.totalorder %v804_v5, 2  ;;  %vm825_vm9 = vcmp.lt.s32.totalorder %v804_v5, 3 }
  0xfe   : > { %v642_v37 = vsel %vm640_vm6, %v641_v32, %v3597_v10  ;;  %vm826_vm10 = vcmp.lt.s32.totalorder %v804_v5, 4  ;;  %v831_v39 = vsel %vm823_vm7, %v810_v26, %v813_v28  ;;  %v835_v43 = vsel %vm823_vm7, %v813_v28, %v816_v34 }
  0xff   : > { %v643_v40 = vadd.s32 %v642_v37, %v638_v11  ;;  %v828_v41 = vsel %vm826_vm10, %v816_v34, 2102212464  ;;  %v832_v42 = vsel %vm826_vm10, %v819_v35, 920167782  ;;  %v827_v44 = vsel %vm823_vm7, %v807_v33, %v810_v26 }
 0x100   : > { %v833_v45 = vsel %vm825_vm9, %v816_v34, %v832_v42  ;;  %v836_v46 = vsel %vm826_vm10, %v822_v36, 1326507024  ;;  %v829_v48 = vsel %vm825_vm9, %v813_v28, %v828_v41  ;;  %v486_v63 = vand.u32 8388607, %v479_v19 }
 0x101   : > { %v644_v47 = vadd.s32 536870912, %v643_v40  ;;  %v834_v56 = vsel %vm824_vm8, %v831_v39, %v833_v45  ;;  %v837_v58 = vsel %vm825_vm9, %v819_v35, %v836_v46  ;;  %v491_v4 = vsel %vm490_vm11, %v489_v2, 0 }
 0x102   : > { %v838_v60 = vsel %vm824_vm8, %v835_v43, %v837_v58  ;;  %v3618_v61 = vmul.u32.u64.low %v3570_v18, %v834_v56  ;;  %v3619_v62 = vmul.u32.u64.high %v3570_v18, %v834_v56, %v3618_v61  ;;  %v830_v6 = vsel %vm824_vm8, %v827_v44, %v829_v48 }
 0x103   : > { %v645_v0 = vshrl.u32 %v644_v47, 30  ;;  %v3625_v1 = vmul.u32.u64.low %v3570_v18, %v838_v60  ;;  %v3626_v3 = vmul.u32.u64.high %v3570_v18, %v838_v60, %v3625_v1  ;;  %v493_v7 = vand.u32 31, %v491_v4 }
 0x104   : > { %v3631_v11 = vmul.f32 %v3564_v15, %v3528_v49  ;;  %v1349_v12 = vand.u32 2139095040, %v3566_v16  ;;  %v849_v14 = vadd.s32 1, %v3619_v62  ;;  %v487_v13 = vor.u32 8388608, %v486_v63 }
 0x105   : > { %v646_v10 = vshll.u32 %v645_v0, 30  ;;  %v846_v22 = vmul.u32 %v3570_v18, %v830_v6  ;;  %vm848_vm12 = vc.u32 %v3626_v3, %v3618_v61  ;;  %v494_v2 = vsub.s32 32, %v493_v7 }
 0x106   : > { %v850_v5 = vsel %vm848_vm12, %v849_v14, %v3619_v62  ;;  %v3644_v23 = vmul.f32 4.0, %v3631_v11  ;;  %v3646_v24 = vshrl.u32 %v1349_v12, 23  ;;  %v639_v26 = vadd.s32 %v3596_v9, %v3593_v8 }
 0x107   : > { %v3635_v20 = vsub.s32 %v643_v40, %v646_v10  ;;  %v851_v15 = vadd.s32 %v850_v5, %v846_v22  ;;  %v3650_v18 = vshrl.u32 %v491_v4, 5  ;;  %v3652_v28 = vshll.u32 %v487_v13, 8 }
 0x108   : > { %v497_v32 = vshrl.u32 %v3313_v25, %v494_v2  ;;  %v500_v33 = vshrl.u32 %v3314_v27, %v494_v2  ;;  %v669_v34 = vsub.s32 4, %v645_v0  ;;  %v503_v35 = vshrl.u32 %v3315_v29, %v494_v2 }
 0x109   : > { %v649_v49 = vsub.s32 0, %v3635_v20  ;;  %v852_v17 = vadd.s32 536870912, %v851_v15  ;;  %v505_v36 = vshll.u32 %v3315_v29, %v493_v7  ;;  %v506_v37 = vshrl.u32 %v3316_v31, %v494_v2 }
 0x10a   : > { %v496_v8 = vshll.u32 %v3312_v21, %v493_v7  ;;  %v499_v9 = vshll.u32 %v3313_v25, %v493_v7  ;;  %v509_v40 = vshrl.u32 %v3317_v38, %v494_v2  ;;  %v502_v42 = vshll.u32 %v3314_v27, %v493_v7 }
 0x10b   : > { %v2733_v30 = vmin.u32 %v649_v49, %v3635_v20  ;;  %v853_v41 = vshrl.u32 %v852_v17, 30  ;;  %v507_v43 = vor.u32 %v506_v37, %v505_v36  ;;  %v690_v44 = vand.u32 2139095040, %v3644_v23 }
 0x10c   : > { %v498_v47 = vor.u32 %v497_v32, %v496_v8  ;;  %v501_v48 = vor.u32 %v500_v33, %v499_v9  ;;  %v508_v56 = vshll.u32 %v3316_v31, %v493_v7  ;;  %v670_v58 = vsel %vm585_vm13, %v669_v34, %v645_v0 }
 0x10d   : > { %v651_v39 = vclz %v2733_v30  ;;  %v854_v60 = vshll.u32 %v853_v41, 30  ;;  %v504_v62 = vor.u32 %v503_v35, %v502_v42  ;;  %vm514_vm15 = vcmp.lt.s32.totalorder %v3650_v18, 4 }
 0x10e   : > { %v495_v63 = vshrl.u32 %v3312_v21, %v494_v2  ;;  %v510_v1 = vor.u32 %v509_v40, %v508_v56  ;;  %v520_v55 = vsel %vm514_vm15, %v507_v43, 920167782  ;;  %vm511_vm2 = vcmp.lt.s32.totalorder %v3650_v18, 1 }
 0x10f   : > { %v2734_v46 = vadd.s32 4294967294, %v651_v39  ;;  %v3679_v6 = vsub.s32 %v851_v15, %v854_v60  ;;  %vm512_vm3 = vcmp.lt.s32.totalorder %v3650_v18, 2  ;;  %vm513_vm4 = vcmp.lt.s32.totalorder %v3650_v18, 3 }
 0x110   : > { %v519_v10 = vsel %vm511_vm2, %v498_v47, %v501_v48  ;;  %v877_v14 = vsub.s32 4, %v853_v41  ;;  %v521_v13 = vsel %vm513_vm4, %v504_v62, %v520_v55  ;;  %v523_v22 = vsel %vm511_vm2, %v501_v48, %v504_v62 }
 0x111   : > { %vm2735_vm0 = vcmp.lt.s32.totalorder %v2734_v46, 0  ;;  %v857_v12 = vsub.s32 0, %v3679_v6  ;;  %v524_v15 = vsel %vm514_vm15, %v510_v1, 1326507024  ;;  %v516_v17 = vsel %vm514_vm15, %v504_v62, 2102212464 }
 0x112   : > { %v654_v4 = vsel %vm2735_vm0, 0, %v2734_v46  ;;  %v522_v32 = vsel %vm512_vm3, %v519_v10, %v521_v13  ;;  %v525_v33 = vsel %vm513_vm4, %v507_v43, %v524_v15  ;;  %v672_v36 = vsel %vm3667_vm14, 0, %v670_v58 }
 0x113   : > { %v655_v0 = vsub.s32 32, %v654_v4  ;;  %v659_v7 = vsub.s32 4294967266, %v654_v4  ;;  %v656_v2 = vshll.u32 %v3635_v20, %v654_v4  ;;  %v2741_v30 = vmin.u32 %v857_v12, %v3679_v6 }
 0x114   : > { %v526_v20 = vsel %vm512_vm3, %v523_v22, %v525_v33  ;;  %vm3707_vm5 = vcmp.le.f32.partialorder %v791_v57, 0.7853982  ;;  %v515_v8 = vsel %vm511_vm2, %v495_v63, %v498_v47  ;;  %v517_v40 = vsel %vm513_vm4, %v501_v48, %v516_v17 }
 0x115   : > { %v657_v5 = vshrl.u32 %v639_v26, %v655_v0  ;;  %v660_v49 = vadd.s32 127, %v659_v7  ;;  %v691_v26 = vshrl.u32 %v690_v44, 23  ;;  %v859_v39 = vclz %v2741_v30 }
 0x116   : > { %v3716_v42 = vmul.u32.u64.low %v3652_v28, %v526_v20  ;;  %v3717_v43 = vmul.u32.u64.high %v3652_v28, %v526_v20, %v3716_v42  ;;  %v3720_v46 = vmul.u32.u64.low %v3652_v28, %v522_v32  ;;  %v3721_v56 = vmul.u32.u64.high %v3652_v28, %v522_v32, %v3720_v46 }
 0x117   : > { %v658_v34 = vor.u32 %v657_v5, %v656_v2  ;;  %v661_v35 = vshll.u32 %v660_v49, 23  ;;  %v2742_v44 = vadd.s32 4294967294, %v859_v39  ;;  %v2736_v57 = vadd.s32 4294967169, %v691_v26 }
 0x118   : > { %v2748_v58 = vadd.s32 4294967169, %v3646_v24  ;;  %v878_v47 = vsel %vm793_vm1, %v877_v14, %v853_v41  ;;  %v847_v48 = vadd.s32 %v3618_v61, %v3626_v3  ;;  %v518_v63 = vsel %vm512_vm3, %v515_v8, %v517_v40 }
 0x119   : > { %v662_v9 = vor.u32 4788187, %v661_v35  ;;  %v665_v62 = vcvt.s32.f32 %v658_v34  ;;  %vm2743_vm6 = vcmp.lt.s32.totalorder %v2742_v44, 0  ;;  %v697_v1 = vadd.s32 1, %v2736_v57 }
 0x11a   : > { %v676_v4 = vadd.s32 3, %v672_v36  ;;  %v862_v0 = vsel %vm2743_vm6, 0, %v2742_v44  ;;  %vm536_vm7 = vc.u32 %v3717_v43, %v3720_v46  ;;  %v880_v10 = vsel %vm3707_vm5, 0, %v878_v47 }
 0x11b   : > { %v663_v60 = vand.u32 2147483647, %v662_v9  ;;  %v863_v24 = vsub.s32 32, %v862_v0  ;;  %v867_v7 = vsub.s32 4294967266, %v862_v0  ;;  %v537_v41 = vadd.s32 1, %v3721_v56 }
 0x11c   : > { %v864_v61 = vshll.u32 %v3679_v6, %v862_v0  ;;  %v534_v3 = vmul.u32 %v3652_v28, %v518_v63  ;;  %vm698_vm8 = vcmp.gt.s32.totalorder %v697_v1, 0  ;;  %v687_v49 = vand.u32 2147483647, %v3644_v23 }
 0x11d   : > { %v666_v55 = vmul.f32 %v665_v62, %v663_v60  ;;  %v865_v18 = vshrl.u32 %v847_v48, %v863_v24  ;;  %v868_v14 = vadd.s32 127, %v867_v7  ;;  %v538_v13 = vsel %vm536_vm7, %v537_v41, %v3721_v56 }
 0x11e   : > { %v699_v22 = vsel %vm698_vm8, %v697_v1, 0  ;;  %v539_v5 = vadd.s32 %v538_v13, %v534_v3  ;;  %v3745_v6 = vand.u32 3, %v676_v4  ;;  %v884_v32 = vadd.s32 3, %v880_v10 }
 0x11f   : > { %v667_v12 = vxor.u32 2147483648, %v666_v55  ;;  %v701_v15 = vand.u32 31, %v699_v22  ;;  %v866_v28 = vor.u32 %v865_v18, %v864_v61  ;;  %v869_v17 = vshll.u32 %v868_v14, 23 }
 0x120   : > { %v540_v33 = vadd.s32 536870912, %v539_v5  ;;  %v3749_v26 = vadd.s32 1, %v2748_v58  ;;  %v694_v45 = vand.u32 8388607, %v687_v49  ;;  %vm682_vm9 = vcmp.eq.s32.totalorder %v3745_v6, 2 }
 0x121   : > { %v668_v2 = vsel %vm585_vm13, %v667_v12, %v666_v55  ;;  %v702_v34 = vsub.s32 32, %v701_v15  ;;  %v870_v35 = vor.u32 4788187, %v869_v17  ;;  %v873_v39 = vcvt.s32.f32 %v866_v28 }
 0x122   : > { %v671_v30 = vsel %vm3667_vm14, %v3540_v53, %v668_v2  ;;  %v3747_v20 = vshrl.u32 %v540_v33, 30  ;;  %v3754_v8 = vand.u32 3, %v884_v32  ;;  %vm679_vm10 = vcmp.eq.s32.totalorder %v3745_v6, 0 }
 0x123   : > { %3185 = vcosq.f32 %v671_v30  ;;  %v871_v36 = vand.u32 2147483647, %v870_v35  ;;  %v705_v40 = vshrl.u32 %v3313_v25, %v702_v34  ;;  %v708_v44 = vshrl.u32 %v3314_v27, %v702_v34 }
 0x124   : > { %3187 = vsinq.f32 %v671_v30  ;;  %v542_v9 = vshll.u32 %v3747_v20, 30  ;;  %v713_v56 = vshll.u32 %v3315_v29, %v701_v15  ;;  %v714_v57 = vshrl.u32 %v3316_v31, %v702_v34 }
 0x125   : > { %v874_v42 = vmul.f32 %v873_v39, %v871_v36  ;;  %vm678_vm11 = vcmp.lt.s32.totalorder %v3745_v6, 2  ;;  %v3765_v60 = vshrl.u32 %v699_v22, 5  ;;  %v704_v62 = vshll.u32 %v3312_v21, %v701_v15 }
 0x126   : > { %v3763_v58 = vsub.s32 %v539_v5, %v542_v9  ;;  %v711_v47 = vshrl.u32 %v3315_v29, %v702_v34  ;;  %vm675_vm12 = vweird.f32 %v3540_v53  ;;  %v707_v63 = vshll.u32 %v3313_v25, %v701_v15 }
 0x127   : > { %v875_v48 = vxor.u32 2147483648, %v874_v42  ;;  %v715_v1 = vor.u32 %v714_v57, %v713_v56  ;;  %v717_v55 = vshrl.u32 %v3317_v38, %v702_v34  ;;  %v535_v4 = vadd.s32 %v3720_v46, %v3717_v43 }
 0x128   : > { %v545_v0 = vsub.s32 0, %v3763_v58  ;;  %v695_v24 = vor.u32 8388608, %v694_v45  ;;  %v710_v7 = vshll.u32 %v3314_v27, %v701_v15  ;;  %v706_v41 = vor.u32 %v705_v40, %v704_v62 }
 0x129   : > { %v876_v10 = vsel %vm793_vm1, %v875_v48, %v874_v42  ;;  %v709_v12 = vor.u32 %v708_v44, %v707_v63  ;;  %v716_v61 = vshll.u32 %v3316_v31, %v701_v15  ;;  %vm722_vm13 = vcmp.lt.s32.totalorder %v3765_v60, 4 }
 0x12a   : > { %v879_v18 = vsel %vm3707_vm5, %v3543_v54, %v876_v10  ;;  %v2729_v14 = vmin.u32 %v545_v0, %v3763_v58  ;;  %v712_v43 = vor.u32 %v711_v47, %v710_v7  ;;  %v728_v2 = vsel %vm722_vm13, %v715_v1, 920167782 }
 0x12b   : > { %3189 = vcosq.f32 %v879_v18  ;;  %v718_v22 = vor.u32 %v717_v55, %v716_v61  ;;  %vm719_vm14 = vcmp.lt.s32.totalorder %v3765_v60, 1  ;;  %vm721_vm15 = vcmp.lt.s32.totalorder %v3765_v60, 3 }
 0x12c   : > { %3191 = vsinq.f32 %v879_v18  ;;  %v547_v15 = vclz %v2729_v14  ;;  %v727_v30 = vsel %vm719_vm14, %v706_v41, %v709_v12  ;;  %v735_v28 = vshll.u32 %v695_v24, 8 }
 0x12d   : > { %v3186_v3 = vpop.eup %3185  ;;  %v729_v33 = vsel %vm721_vm15, %v712_v43, %v728_v2  ;;  %v731_v35 = vsel %vm719_vm14, %v709_v12, %v712_v43  ;;  %v703_v39 = vshrl.u32 %v3312_v21, %v702_v34  ;;  %v724_v45 = vsel %vm722_vm13, %v712_v43, 2102212464 }
 0x12e   : > { %v3188_v46 = vpop.eup %3187  ;;  %v683_v13 = vxor.u32 2147483648, %v3186_v3  ;;  %v2730_v32 = vadd.s32 4294967294, %v547_v15  ;;  %v732_v9 = vsel %vm722_vm13, %v718_v22, 1326507024  ;;  %vm720_vm1 = vcmp.lt.s32.totalorder %v3765_v60, 2 }
 0x12f   : > { %v680_v5 = vxor.u32 2147483648, %v3188_v46  ;;  %v733_v42 = vsel %vm721_vm15, %v715_v1, %v732_v9  ;;  %v730_v34 = vsel %vm720_vm1, %v727_v30, %v729_v33  ;;  %v723_v53 = vsel %vm719_vm14, %v703_v39, %v706_v41 }
 0x130   : > { %v684_v37 = vsel %vm682_vm9, %v683_v13, %v3188_v46  ;;  %vm2731_vm0 = vcmp.lt.s32.totalorder %v2730_v32, 0  ;;  %v734_v56 = vsel %vm720_vm1, %v731_v35, %v733_v42  ;;  %v725_v47 = vsel %vm721_vm15, %v709_v12, %v724_v45 }
 0x131   : > { %v681_v17 = vsel %vm679_vm10, %v3186_v3, %v680_v5  ;;  %v550_v6 = vsel %vm2731_vm0, 0, %v2730_v32  ;;  %v3819_v1 = vmul.u32.u64.low %v735_v28, %v734_v56  ;;  %v3820_v55 = vmul.u32.u64.high %v735_v28, %v734_v56, %v3819_v1 }
 0x132   : > { %v685_v36 = vsel %vm678_vm11, %v681_v17, %v684_v37  ;;  %v551_v57 = vsub.s32 32, %v550_v6  ;;  %v555_v62 = vsub.s32 4294967266, %v550_v6  ;;  %v552_v63 = vshll.u32 %v3763_v58, %v550_v6 }
 0x133   : > { %v686_v40 = vsel %vm675_vm12, nan, %v685_v36  ;;  %v3822_v7 = vmul.u32.u64.low %v735_v28, %v730_v34  ;;  %v3823_v10 = vmul.u32.u64.high %v735_v28, %v730_v34, %v3822_v7  ;;  %vm883_vm2 = vweird.f32 %v3543_v54 }
 0x134   : > { %v896_v44 = vmul.f32 %v686_v40, %v686_v40  ;;  %v553_v0 = vshrl.u32 %v535_v4, %v551_v57  ;;  %v556_v24 = vadd.s32 127, %v555_v62  ;;  %vm481_vm3 = vcmp.lt.s32.totalorder %v3550_v59, 0 }
 0x135   : > { %v3190_v61 = vpop.eup %3189  ;;  %v565_v41 = vsub.s32 4, %v3747_v20  ;;  %v726_v4 = vsel %vm720_vm1, %v723_v53, %v725_v47  ;;  %vm1357_vm4 = vcmp.gt.s32.totalorder %v3749_v26, 0  ;;  %vm890_vm5 = vcmp.eq.s32.totalorder %v3754_v8, 2 }
 0x136   : > { %v900_v48 = vmul.f32 0.25, %v896_v44  ;;  %v3192_v58 = vpop.eup %3191  ;;  %v891_v12 = vxor.u32 2147483648, %v3190_v61  ;;  %v554_v18 = vor.u32 %v553_v0, %v552_v63  ;;  %v557_v14 = vshll.u32 %v556_v24, 23 }
 0x137   : > { %v888_v43 = vxor.u32 2147483648, %v3192_v58  ;;  %vm744_vm6 = vc.u32 %v3820_v55, %v3822_v7  ;;  %vm887_vm7 = vcmp.eq.s32.totalorder %v3754_v8, 0  ;;  %v745_v13 = vadd.s32 1, %v3823_v10 }
 0x138   : > { %v3827_v3 = vadd.f32 %v900_v48, %v3531_v50  ;;  %v892_v50 = vsel %vm890_vm5, %v891_v12, %v3192_v58  ;;  %v558_v46 = vor.u32 4788187, %v557_v14  ;;  %vm886_vm8 = vcmp.lt.s32.totalorder %v3754_v8, 2 }
 0x139   : > { %v889_v60 = vsel %vm887_vm7, %v3190_v61, %v888_v43  ;;  %v566_v22 = vsel %vm481_vm3, %v565_v41, %v3747_v20  ;;  %v742_v2 = vmul.u32 %v735_v28, %v726_v4  ;;  %v561_v37 = vcvt.s32.f32 %v554_v18 }
 0x13a   : > { %1042 = vmatprep.mubr.f32.mxu0 %v3827_v3  ;;  %v893_v5 = vsel %vm886_vm8, %v889_v60, %v892_v50  ;;  %v559_v15 = vand.u32 2147483647, %v558_v46  ;;  %v746_v30 = vsel %vm744_vm6, %v745_v13, %v3823_v10  ;;  %v1358_v17 = vsel %vm1357_vm4, %v3749_v26, 0 }
 0x13b   : > { %v894_v32 = vsel %vm883_vm2, nan, %v893_v5  ;;  %vm480_vm9 = vcmp.le.f32.partialorder %v479_v19, 0.7853982  ;;  %v747_v8 = vadd.s32 %v746_v30, %v742_v2  ;;  %v1360_v36 = vand.u32 31, %v1358_v17 }
 0x13c   : > { %v898_v33 = vmul.f32 %v894_v32, %v894_v32  ;;  %v562_v20 = vmul.f32 %v561_v37, %v559_v15  ;;  %v568_v28 = vsel %vm480_vm9, 0, %v566_v22  ;;  %v3318_v56 = vmov 0.0  }
 0x13d   : > { %v748_v35 = vadd.s32 536870912, %v747_v8  ;;  %v572_v9 = vadd.s32 3, %v568_v28  ;;  %v1361_v44 = vsub.s32 32, %v1360_v36  ;;  %2611 = vst [vmem:[%s3859_s14] sm:$0xff] %v3318_v56  ;;  %v3875_v62 = vshrl.u32 %v1358_v17, 5 }
 0x13e   : > { %v902_v39 = vmul.f32 0.25, %v898_v33  ;;  %v563_v45 = vxor.u32 2147483648, %v562_v20  ;;  %v1363_v53 = vshll.u32 %v3312_v21, %v1360_v36  ;;  %v1366_v0 = vshll.u32 %v3313_v25, %v1360_v36 }
 0x13f   : > { %v3853_v40 = vshrl.u32 %v748_v35, 30  ;;  %v573_v6 = vand.u32 3, %v572_v9  ;;  %v1364_v47 = vshrl.u32 %v3313_v25, %v1361_v44  ;;  %v1367_v48 = vshrl.u32 %v3314_v27, %v1361_v44 }
 0x140   : > { %v3862_v54 = vadd.f32 %v902_v39, %v3534_v51  ;;  %v564_v19 = vsel %vm481_vm3, %v563_v45, %v562_v20  ;;  %v1346_v51 = vand.u32 2147483647, %v3566_v16  ;;  %v1370_v24 = vshrl.u32 %v3315_v29, %v1361_v44 }
 0x141   : > { %v567_v26 = vsel %vm480_vm9, %v3550_v59, %v564_v19  ;;  %v750_v42 = vshll.u32 %v3853_v40, 30  ;;  %vm575_vm10 = vcmp.eq.s32.totalorder %v573_v6, 0  ;;  %vm574_vm11 = vcmp.lt.s32.totalorder %v573_v6, 2 }
 0x142   : > { %1112 = vmatprep.mubr.f32.mxu1 %v3862_v54  ;;  %3193 = vcosq.f32 %v567_v26  ;;  %v1353_v1 = vand.u32 8388607, %v1346_v51  ;;  %vm578_vm12 = vcmp.eq.s32.totalorder %v573_v6, 2  ;;  %v1369_v10 = vshll.u32 %v3314_v27, %v1360_v36  ;;  %v1118_v6 = vld [vmem:[#allocation4] sm:$0xff] }
 0x143   : > { %3195 = vsinq.f32 %v567_v26  ;;  %v3869_v34 = vsub.s32 %v747_v8, %v750_v42  ;;  %v1372_v61 = vshll.u32 %v3315_v29, %v1360_v36  ;;  %v1373_v41 = vshrl.u32 %v3316_v31, %v1361_v44 }
 0x144   : > { %vm571_vm13 = vweird.f32 %v3550_v59  ;;  %v743_v58 = vadd.s32 %v3822_v7, %v3820_v55  ;;  %v1365_v18 = vor.u32 %v1364_v47, %v1363_v53  ;;  %v1368_v14 = vor.u32 %v1367_v48, %v1366_v0  ;;  %v1136_v47 = vld [vmem:[#allocation4 + $0x90] sm:$0xff]  ;;  %v1137_v48 = vld [vmem:[#allocation4 + $0x98] sm:$0xff] }
 0x145   : > { %v753_v57 = vsub.s32 0, %v3869_v34  ;;  %v1371_v4 = vor.u32 %v1370_v24, %v1369_v10  ;;  %v1374_v25 = vor.u32 %v1373_v41, %v1372_v61  ;;  %v1375_v43 = vshll.u32 %v3316_v31, %v1360_v36 }
 0x146   : > { %v1376_v50 = vshrl.u32 %v3317_v38, %v1361_v44  ;;  %v1354_v27 = vor.u32 8388608, %v1353_v1  ;;  %v1362_v29 = vshrl.u32 %v3312_v21, %v1361_v44  ;;  %vm1378_vm14 = vcmp.lt.s32.totalorder %v3875_v62, 1 }
 0x147   : > { %v2737_v63 = vmin.u32 %v753_v57, %v3869_v34  ;;  %vm1379_vm15 = vcmp.lt.s32.totalorder %v3875_v62, 2  ;;  %vm1380_vm0 = vcmp.lt.s32.totalorder %v3875_v62, 3  ;;  %vm1381_vm1 = vcmp.lt.s32.totalorder %v3875_v62, 4  ;;  %v1119_v57 = vld [vmem:[#allocation4 + $0x8] sm:$0xff] }
 0x148   : > { %v1377_v60 = vor.u32 %v1376_v50, %v1375_v43  ;;  %v1386_v31 = vsel %vm1378_vm14, %v1365_v18, %v1368_v14  ;;  %v1387_v38 = vsel %vm1381_vm1, %v1374_v25, 920167782  ;;  %v1382_v2 = vsel %vm1378_vm14, %v1362_v29, %v1365_v18  ;;  %v1138_v43 = vld [vmem:[#allocation4 + $0xa0] sm:$0xff]  ;;  %v1139_v50 = vld [vmem:[#allocation4 + $0xa8] sm:$0xff] }
 0x149   : > { %v755_v12 = vclz %v2737_v63  ;;  %v1388_v5 = vsel %vm1380_vm0, %v1371_v4, %v1387_v38  ;;  %v1383_v17 = vsel %vm1381_vm1, %v1371_v4, 2102212464  ;;  %v1390_v20 = vsel %vm1378_vm14, %v1368_v14, %v1371_v4  ;;  %v1120_v4 = vld [vmem:[#allocation4 + $0x10] sm:$0xff] }
 0x14a   : > { %v1389_v33 = vsel %vm1379_vm15, %v1386_v31, %v1388_v5  ;;  %v1391_v39 = vsel %vm1381_vm1, %v1377_v60, 1326507024  ;;  %v1384_v9 = vsel %vm1380_vm0, %v1368_v14, %v1383_v17  ;;  %v1394_v26 = vshll.u32 %v1354_v27, 8  ;;  %v1123_v31 = vld [vmem:[#allocation4 + $0x28] sm:$0xff] }
 0x14b   : > { %v2738_v46 = vadd.s32 4294967294, %v755_v12  ;;  %v1392_v19 = vsel %vm1380_vm0, %v1374_v25, %v1391_v39  ;;  %v3011_v61 = vpack.c.bf16 %v1119_v57, %v1118_v6  ;;  %v1385_v41 = vsel %vm1379_vm15, %v1382_v2, %v1384_v9  ;;  %v1121_v25 = vld [vmem:[#allocation4 + $0x18] sm:$0xff]  ;;  %v1127_v9 = vld [vmem:[#allocation4 + $0x48] sm:$0xff] }
 0x14c   : > { %v3194_v13 = vpop.eup %3193  ;;  %v1393_v53 = vsel %vm1379_vm15, %v1390_v20, %v1392_v19  ;;  %v3929_v1 = vmul.u32.u64.low %v1394_v26, %v1389_v33  ;;  %v3930_v0 = vmul.u32.u64.high %v1394_v26, %v1389_v33, %v3929_v1  ;;  %v3013_v14 = vpack.c.bf16 %v1137_v48, %v1136_v47  ;;  %v1142_v20 = vld [vmem:[#allocation4 + $0xc0] sm:$0xff]  ;;  %v1129_v47 = vld [vmem:[#allocation4 + $0x58] sm:$0xff] }
 0x14d   : > { %v3196_v55 = vpop.eup %3195  ;;  %v579_v7 = vxor.u32 2147483648, %v3194_v13  ;;  %vm2739_vm2 = vcmp.lt.s32.totalorder %v2738_v46, 0  ;;  %v3926_v63 = vmul.u32.u64.low %v1394_v26, %v1393_v53  ;;  %v3927_v59 = vmul.u32.u64.high %v1394_v26, %v1393_v53, %v3926_v63  ;;  %v1128_v53 = vld [vmem:[#allocation4 + $0x50] sm:$0xff] }
 0x14e   : > { %v576_v21 = vxor.u32 2147483648, %v3196_v55  ;;  %v758_v22 = vsel %vm2739_vm2, 0, %v2738_v46  ;;  %v1404_v46 = vadd.s32 1, %v3930_v0  ;;  %v773_v62 = vsub.s32 4, %v3853_v40  ;;  %v1146_v63 = vld [vmem:[#allocation4 + $0xe0] sm:$0xff] }
 0x14f   : > { %v580_v15 = vsel %vm578_vm12, %v579_v7, %v3196_v55  ;;  %v759_v37 = vsub.s32 32, %v758_v22  ;;  %v763_v30 = vsub.s32 4294967266, %v758_v22  ;;  %v760_v8 = vshll.u32 %v3869_v34, %v758_v22  ;;  %v1122_v7 = vld [vmem:[#allocation4 + $0x20] sm:$0xff]  ;;  %v1141_v22 = vld [vmem:[#allocation4 + $0xb8] sm:$0xff] }
 0x150   : > { %v577_v32 = vsel %vm575_vm10, %v3194_v13, %v576_v21  ;;  %vm1403_vm3 = vc.u32 %v3927_v59, %v3929_v1  ;;  %v1401_v29 = vmul.u32 %v1394_v26, %v1385_v41  ;;  %v3017_v55 = vpack.c.bf16 %v1139_v50, %v1138_v43  ;;  %v1140_v21 = vld [vmem:[#allocation4 + $0xb0] sm:$0xff]  ;;  %v1149_v50 = vld [vmem:[#allocation4 + $0xf8] sm:$0xff] }
 0x151   : > { %v581_v28 = vsel %vm574_vm11, %v577_v32, %v580_v15  ;;  %v761_v35 = vshrl.u32 %v743_v58, %v759_v37  ;;  %v764_v36 = vadd.s32 127, %v763_v30  ;;  %v1405_v13 = vsel %vm1403_vm3, %v1404_v46, %v3930_v0  ;;  %v1124_v32 = vld [vmem:[#allocation4 + $0x30] sm:$0xff]  ;;  %v1147_v0 = vld [vmem:[#allocation4 + $0xe8] sm:$0xff] }
 0x152   : > { %v582_v45 = vsel %vm571_vm13, nan, %v581_v28  ;;  %v1406_v38 = vadd.s32 %v1405_v13, %v1401_v29  ;;  %vm689_vm4 = vcmp.lt.s32.totalorder %v3644_v23, 0  ;;  %vm3948_vm5 = vcmp.le.f32.partialorder %v687_v49, 0.7853982  ;;  %v1144_v26 = vld [vmem:[#allocation4 + $0xd0] sm:$0xff] }
 0x153   : > { %v895_v42 = vmul.f32 %v582_v45, %v582_v45  ;;  %v762_v44 = vor.u32 %v761_v35, %v760_v8  ;;  %v765_v34 = vshll.u32 %v764_v36, 23  ;;  %v774_v5 = vsel %vm689_vm4, %v773_v62, %v3853_v40  ;;  %v1125_v8 = vld [vmem:[#allocation4 + $0x38] sm:$0xff]  ;;  %v1143_v40 = vld [vmem:[#allocation4 + $0xc8] sm:$0xff]  ;;  %v1126_v45 = vld [vmem:[#allocation4 + $0x40] sm:$0xff] }
 0x154   : > { %v1407_v15 = vadd.s32 536870912, %v1406_v38  ;;  %v3019_v30 = vpack.c.bf16 %v1123_v31, %v1122_v7  ;;  %v3021_v17 = vpack.c.bf16 %v1141_v22, %v1140_v21  ;;  %v776_v49 = vsel %vm3948_vm5, 0, %v774_v5  ;;  %v1148_v43 = vld [vmem:[#allocation4 + $0xf0] sm:$0xff]  ;;  %v1133_v31 = vld [vmem:[#allocation4 + $0x78] sm:$0xff] }
 0x155   : > { %v899_v24 = vmul.f32 0.25, %v895_v42  ;;  %v766_v10 = vor.u32 4788187, %v765_v34  ;;  %v769_v18 = vcvt.s32.f32 %v762_v44  ;;  %v3023_v35 = vpack.c.bf16 %v1125_v8, %v1124_v32  ;;  %v1145_v42 = vld [vmem:[#allocation4 + $0xd8] sm:$0xff]  ;;  %v1132_v7 = vld [vmem:[#allocation4 + $0x70] sm:$0xff] }
 0x156   : > { %v3956_v33 = vshrl.u32 %v1407_v15, 30  ;;  %v780_v36 = vadd.s32 3, %v776_v49  ;;  %v3025_v39 = vpack.c.bf16 %v1143_v40, %v1142_v20  ;;  %v3027_v34 = vpack.c.bf16 %v1127_v9, %v1126_v45  ;;  %v1168_v5 = vld [vmem:[#allocation4 + $0x190] sm:$0xff]  ;;  %v1169_v15 = vld [vmem:[#allocation4 + $0x198] sm:$0xff] }
 0x157   : > { %v3936_v58 = vadd.f32 %v899_v24, %v3537_v52  ;;  %v767_v12 = vand.u32 2147483647, %v766_v10  ;;  %v3015_v52 = vpack.c.bf16 %v1121_v25, %v1120_v4  ;;  %v3029_v57 = vpack.c.bf16 %v1145_v42, %v1144_v26  ;;  %v1131_v25 = vld [vmem:[#allocation4 + $0x68] sm:$0xff] }
 0x158   : > { %v1409_v28 = vshll.u32 %v3956_v33, 30  ;;  %v781_v6 = vand.u32 3, %v780_v36  ;;  %v3033_v4 = vpack.c.bf16 %v1147_v0, %v1146_v63  ;;  %vm779_vm8 = vweird.f32 %v3644_v23  ;;  %v1170_v36 = vld [vmem:[#allocation4 + $0x1a0] sm:$0xff]  ;;  %v1156_v63 = vld [vmem:[#allocation4 + $0x130] sm:$0xff]  ;;  %v1157_v0 = vld [vmem:[#allocation4 + $0x138] sm:$0xff] }
 0x159   : > { %1043 = vmatmul.mubr.f32.vlgmr.msra.gmra.mrb[0].mxu0 %v3936_v58  ;;  %v770_v27 = vmul.f32 %v769_v18, %v767_v12  ;;  %v3031_v12 = vpack.c.bf16 %v1129_v47, %v1128_v53  ;;  %v1130_v18 = vld [vmem:[#allocation4 + $0x60] sm:$0xff]  ;;  %v3037_v13 = vpack.c.bf16 %v1149_v50, %v1148_v43  ;;  %v3039_v8 = vpack.c.bf16 %v1133_v31, %v1132_v7  ;;  %v1176_v43 = vld [vmem:[#allocation4 + $0x1d0] sm:$0xff] }
 0x15a   : > { %3012 = vmatpush3.bf16.msra.mxu0 %v3011_v61  ;;  %1253 = vmatprep.mubr.f32.mxu0 %v3827_v3  ;;  %v1410_v19 = vsub.s32 %v1406_v38, %v1409_v28  ;;  %vm786_vm6 = vcmp.eq.s32.totalorder %v781_v6, 2  ;;  %vm783_vm7 = vcmp.eq.s32.totalorder %v781_v6, 0  ;;  %vm782_vm9 = vcmp.lt.s32.totalorder %v781_v6, 2  ;;  %v1172_v6 = vld [vmem:[#allocation4 + $0x1b0] sm:$0xff]  ;;  %v1162_v31 = vld [vmem:[#allocation4 + $0x160] sm:$0xff] }
 0x15b   : > { %v771_v60 = vxor.u32 2147483648, %v770_v27  ;;  %3014 = vmatprep.subr.bf16.mxu0 %v3013_v14  ;;  %v1402_v38 = vadd.s32 %v3929_v1, %v3927_v59  ;;  %v3045_v59 = vpack.c.bf16 %v1169_v15, %v1168_v5  ;;  %v1152_v1 = vld [vmem:[#allocation4 + $0x110] sm:$0xff]  ;;  %vm3320_vm11 = vmmov 0  }
 0x15c   : > { %v1412_v44 = vsub.s32 0, %v1410_v19  ;;  %vm1348_vm12 = vcmp.lt.s32.totalorder %v3566_v16, 0  ;;  %vm3976_vm13 = vcmp.le.f32.partialorder %v1346_v51, 0.7853982  ;;  %v1177_v51 = vld [vmem:[#allocation4 + $0x1d8] sm:$0xff]  ;;  %v1164_v15 = vld [vmem:[#allocation4 + $0x170] sm:$0xff] }
 0x15d   : > { %v772_v3 = vsel %vm689_vm4, %v771_v60, %v770_v27  ;;  %vm1467_vm14 = vcmask 1041408   ;;  %vm3321_vm1 = vmmov 1   ;;  %vm1463_vm4 = vcmask 80896  }
 0x15e   : > { %v775_v37 = vsel %vm3948_vm5, %v3644_v23, %v772_v3  ;;  %3016 = vmatpush3.bf16.msra.mxu0 %v3015_v52  ;;  %v2749_v48 = vmin.u32 %v1412_v44, %v1410_v19  ;;  %v3035_v52 = vpack.c.bf16 %v1131_v25, %v1130_v18  ;;  %v1150_v3 = vld [vmem:[#allocation4 + $0x100] sm:$0xff]  ;;  %v1151_v23 = vld [vmem:[#allocation4 + $0x108] sm:$0xff]  ;;  %v1432_v25 = vsub.s32 4, %v3956_v33  ;;  %vm3075_vm2 = vmpackc.low %vm1467_vm14, %vm3321_vm1 }
 0x15f   : > { %3197 = vcosq.f32 %v775_v37  ;;  %3018 = vmatprep.subr.bf16.mxu0 %v3017_v55  ;;  %v3043_v49 = vpack.c.bf16 %v1151_v23, %v1150_v3  ;;  %v1154_v44 = vld [vmem:[#allocation4 + $0x120] sm:$0xff]  ;;  %vm1438_vm5 = vweird.f32 %v3566_v16 }
 0x160   : > { %3199 = vsinq.f32 %v775_v37  ;;  %v1414_v10 = vclz %v2749_v48 }
 0x162   : > { %3020 = vmatpush3.bf16.msra.mxu0 %v3019_v30  ;;  %v2750_v46 = vadd.s32 4294967294, %v1414_v10  ;;  %v1175_v10 = vld [vmem:[#allocation4 + $0x1c8] sm:$0xff] }
 0x163   : > { %3022 = vmatprep.subr.bf16.mxu0 %v3021_v17 }
 0x164   : > { %vm2751_vm10 = vcmp.lt.s32.totalorder %v2750_v46, 0 }
 0x165   : > { %v1417_v60 = vsel %vm2751_vm10, 0, %v2750_v46  ;;  %v3061_v46 = vpack.c.bf16 %v1177_v51, %v1176_v43  ;;  %vm2616_vm10 = vcmask 23568  }
 0x166   : > { %3024 = vmatpush3.bf16.msra.mxu0 %v3023_v35  ;;  %v1418_v21 = vsub.s32 32, %v1417_v60  ;;  %v1422_v22 = vsub.s32 4294967266, %v1417_v60  ;;  %v1419_v37 = vshll.u32 %v1410_v19, %v1417_v60  ;;  %v1153_v35 = vld [vmem:[#allocation4 + $0x118] sm:$0xff] }
 0x167   : > { %3026 = vmatprep.subr.bf16.mxu0 %v3025_v39  ;;  %v1171_v39 = vld [vmem:[#allocation4 + $0x1a8] sm:$0xff]  ;;  %v3047_v9 = vpack.c.bf16 %v1153_v35, %v1152_v1 }
 0x168   : > { %v1420_v30 = vshrl.u32 %v1402_v38, %v1418_v21  ;;  %v1423_v17 = vadd.s32 127, %v1422_v22  ;;  %v3049_v42 = vpack.c.bf16 %v1171_v39, %v1170_v36  ;;  %v1163_v38 = vld [vmem:[#allocation4 + $0x168] sm:$0xff]  ;;  %v1180_v21 = vld [vmem:[#allocation4 + $0x1f0] sm:$0xff]  ;;  %v1181_v22 = vld [vmem:[#allocation4 + $0x1f8] sm:$0xff] }
 0x169   : > { %v3198_v24 = vpop.eup %3197  ;;  %v3067_v23 = vpack.c.bf16 %v1163_v38, %v1162_v31  ;;  %v1450_v39 = vld [vmem:[#allocation6] sm:$0xff] }
 0x16a   : > { %v3200_v61 = vpop.eup %3199  ;;  %v787_v41 = vxor.u32 2147483648, %v3198_v24  ;;  %3028 = vmatpush3.bf16.msra.mxu0 %v3027_v34  ;;  %v1421_v20 = vor.u32 %v1420_v30, %v1419_v37  ;;  %v1424_v40 = vshll.u32 %v1423_v17, 23  ;;  %v3319_v34 = vmov 0.0|0.0   ;;  %v1165_v37 = vld [vmem:[#allocation4 + $0x178] sm:$0xff] }
 0x16b   : > { %v784_v14 = vxor.u32 2147483648, %v3200_v61  ;;  %3030 = vmatprep.subr.bf16.mxu0 %v3029_v57  ;;  %v1173_v57 = vld [vmem:[#allocation4 + $0x1b8] sm:$0xff]  ;;  %v3071_v17 = vpack.c.bf16 %v1165_v37, %v1164_v15 }
 0x16c   : > { %v788_v27 = vsel %vm786_vm6, %v787_v41, %v3200_v61  ;;  %v1425_v45 = vor.u32 4788187, %v1424_v40  ;;  %v1428_v26 = vcvt.s32.f32 %v1421_v20  ;;  %v3053_v48 = vpack.c.bf16 %v1173_v57, %v1172_v6  ;;  %v1462_v20 = vld [vmem:[%s4538_s9 + $0x8] sm:$0x3]  ;;  %v1456_v6 = vld [vmem:[#allocation6 + $0x30] sm:$0xff]  ;;  %v1457_v57 = vld [vmem:[#allocation6 + $0x38] sm:$0xff] }
 0x16d   : > { %v785_v62 = vsel %vm783_vm7, %v3198_v24, %v784_v14  ;;  %v1174_v24 = vld [vmem:[#allocation4 + $0x1c0] sm:$0xff]  ;;  %vm1545_vm6 = vcmask 1040384   ;;  %vm1541_vm7 = vcmask 662528  }
 0x16e   : > { %v789_v29 = vsel %vm782_vm9, %v785_v62, %v788_v27  ;;  %3032 = vmatpush3.bf16.msra.mxu0 %v3031_v12  ;;  %v1426_v19 = vand.u32 2147483647, %v1425_v45  ;;  %v3055_v12 = vpack.c.bf16 %v1157_v0, %v1156_v63  ;;  %v3057_v18 = vpack.c.bf16 %v1175_v10, %v1174_v24  ;;  %v1158_v14 = vld [vmem:[#allocation4 + $0x140] sm:$0xff]  ;;  %v1160_v27 = vld [vmem:[#allocation4 + $0x150] sm:$0xff]  ;;  %v1161_v62 = vld [vmem:[#allocation4 + $0x158] sm:$0xff] }
 0x16f   : > { %v790_v55 = vsel %vm779_vm8, nan, %v789_v29  ;;  %3034 = vmatprep.subr.bf16.mxu0 %v3033_v4  ;;  %v1159_v4 = vld [vmem:[#allocation4 + $0x148] sm:$0xff]  ;;  %v1433_v29 = vsel %vm1348_vm12, %v1432_v25, %v3956_v33  ;;  %v3063_v60 = vpack.c.bf16 %v1161_v62, %v1160_v27  ;;  %v3069_v33 = vpack.c.bf16 %v1181_v22, %v1180_v21  ;;  %v1460_v63 = vld [vmem:[#allocation6 + $0x50] sm:$0x1] }
 0x170   : > { %v897_v2 = vmul.f32 %v790_v55, %v790_v55  ;;  %v1429_v53 = vmul.f32 %v1428_v26, %v1426_v19  ;;  %v3059_v50 = vpack.c.bf16 %v1159_v4, %v1158_v14  ;;  %v1435_v55 = vsel %vm3976_vm13, 0, %v1433_v29  ;;  %v1451_v45 = vld [vmem:[#allocation6 + $0x8] sm:$0xff]  ;;  %v1453_v26 = vld [vmem:[#allocation6 + $0x18] sm:$0xff] }
 0x171   : > { %v3078_v19 = vpack.c.bf16 %v1451_v45, %v1450_v39  ;;  %vm2612_vm8 = vcmask 7168   ;;  %vm2614_vm9 = vcmask 15368  }
 0x172   : > { %v901_v32 = vmul.f32 0.25, %v897_v2  ;;  %3036 = vmatpush3.bf16.msra.mxu0 %v3035_v52  ;;  %v1430_v47 = vxor.u32 2147483648, %v1429_v53  ;;  %v1178_v52 = vld [vmem:[#allocation4 + $0x1e0] sm:$0xff]  ;;  %v1439_v2 = vadd.s32 3, %v1435_v55 }
 0x173   : > { %3038 = vmatprep.subr.bf16.mxu0 %v3037_v13  ;;  %v1179_v13 = vld [vmem:[#allocation4 + $0x1e8] sm:$0xff] }
 0x174   : > { %v3965_v28 = vadd.f32 %v901_v32, %v3631_v11  ;;  %v1155_v11 = vld [vmem:[#allocation4 + $0x128] sm:$0xff]  ;;  %v1431_v61 = vsel %vm1348_vm12, %v1430_v47, %v1429_v53  ;;  %v3065_v7 = vpack.c.bf16 %v1179_v13, %v1178_v52  ;;  %v1440_v30 = vand.u32 3, %v1439_v2  ;;  %v1458_v53 = vld [vmem:[#allocation6 + $0x40] sm:$0xff] }
 0x175   : > { %v1434_v41 = vsel %vm3976_vm13, %v3566_v16, %v1431_v61  ;;  %v1619_v16 = vld [vmem:[%s4009_s26] sm:$0xff]  ;;  %v1459_v47 = vld [vmem:[#allocation6 + $0x48] sm:$0xff] }
 0x176   : > { %1113 = vmatmul.mubr.f32.vlgmr.msra.gmra.mrb[0].mxu1 %v3965_v28  ;;  %3040 = vmatpush3.bf16.msra.mxu0 %v3039_v8  ;;  %3201 = vcosq.f32 %v1434_v41  ;;  %vm1442_vm15 = vcmp.eq.s32.totalorder %v1440_v30, 0  ;;  %vm1445_vm0 = vcmp.eq.s32.totalorder %v1440_v30, 2  ;;  %vm1441_vm3 = vcmp.lt.s32.totalorder %v1440_v30, 2 }
 0x177   : > { %3044 = vmatpush3.bf16.msra.mxu1 %v3043_v49  ;;  %1323 = vmatprep.mubr.f32.mxu1 %v3862_v54  ;;  %v3051_v54 = vpack.c.bf16 %v1155_v11, %v1154_v44  ;;  %3203 = vsinq.f32 %v1434_v41  ;;  %v1461_v49 = vld [vmem:[%s4538_s9] sm:$0xff]  ;;  %v1455_v44 = vld [vmem:[#allocation6 + $0x28] sm:$0xff] }
 0x178   : > { %3046 = vmatprep.subr.bf16.mxu1 %v3045_v59  ;;  %3077 = vmatprep.subr.bf16.mxu0 %v3319_v34  ;;  %v3074_v40 = vpack.c.bf16 %v1462_v20, %v1461_v49 }
 0x179   : > { %1254 = vmatmul.mubr.f32.vlgmr.msra.gmra.mrb[2].mxu0 %v3936_v58  ;;  %1655 = vrot.lane.b32.xlu1 %v1619_v16, %s3322_s13  ;;  %v2744_v58 = vld [vmem:[%s4533_s4] ss:$0 sm:$0xff]  ;;  %s3334_s13 = smov 4  }
 0x17a   : > { %2942 = vmatprep.mubr.msk.f32.mxu0 %vm3320_vm11, %v3318_v56  ;;  %3079 = vmatpush3.bf16.msra.mxu0 %v3078_v19 }
 0x17b   : > { %3048 = vmatpush3.bf16.msra.mxu1 %v3047_v9  ;;  %v1452_v9 = vld [vmem:[#allocation6 + $0x10] sm:$0xff]  ;;  %3080 = vmatprep.subr.bf16.mxu0 %v3319_v34 }
 0x17c   : > { %3050 = vmatprep.subr.bf16.mxu1 %v3049_v42  ;;  %v3081_v42 = vpack.c.bf16 %v1453_v26, %v1452_v9  ;;  %1638 = vrot.lane.b32.xlu0 %v1619_v16, %s3323_s18 }
 0x17d   : > { %1621 = vrot.lane.b32.xlu1 %v1619_v16, %s3324_s20 }
 0x17e   : > { %3082 = vmatpush3.bf16.msra.mxu0 %v3081_v42 }
 0x17f   : > { %3052 = vmatpush3.bf16.msra.mxu1 %v3051_v54  ;;  %3083 = vmatprep.subr.bf16.mxu0 %v3319_v34  ;;  %v3087_v54 = vpack.c.bf16 %v1457_v57, %v1456_v6 }
 0x180   : > { %3054 = vmatprep.subr.bf16.mxu1 %v3053_v48  ;;  %v3202_v3 = vpop.eup %3201  ;;  %v3090_v48 = vpack.c.bf16 %v1459_v47, %v1458_v53 }
 0x181   : > { %v3204_v5 = vpop.eup %3203  ;;  %v1446_v8 = vxor.u32 2147483648, %v3202_v3 }
 0x182   : > { %v1443_v32 = vxor.u32 2147483648, %v3204_v5 }
 0x183   : > { %3056 = vmatpush3.bf16.msra.mxu1 %v3055_v12  ;;  %v1447_v1 = vsel %vm1445_vm0, %v1446_v8, %v3204_v5 }
 0x184   : > { %3058 = vmatprep.subr.bf16.mxu1 %v3057_v18  ;;  %v1444_v59 = vsel %vm1442_vm15, %v3202_v3, %v1443_v32 }
 0x185   : > { %v1448_v35 = vsel %vm1441_vm3, %v1444_v59, %v1447_v1 }
 0x186   : > { %v1449_v36 = vsel %vm1438_vm5, nan, %v1448_v35 }
 0x187   : > { %3060 = vmatpush3.bf16.msra.mxu1 %v3059_v50 }
 0x188   : > { %3062 = vmatprep.subr.bf16.mxu1 %v3061_v46 }
 0x18b   : > { %3064 = vmatpush3.bf16.msra.mxu1 %v3063_v60 }
 0x18c   : > { %3066 = vmatprep.subr.bf16.mxu1 %v3065_v7 }
 0x18f   : > { %3068 = vmatpush3.bf16.msra.mxu1 %v3067_v23 }
 0x190   : > { %3070 = vmatprep.subr.bf16.mxu1 %v3069_v33 }
 0x193   : > { %3072 = vmatpush3.bf16.msra.mxu1 %v3071_v17 }
 0x194   : > { %3073 = vmatprep.subr.bf16.mxu1 %v3319_v34 }
 0x196   : > { %1324 = vmatmul.mubr.f32.vlgmr.msra.gmra.mrb[2].mxu1 %v3965_v28  ;;  %v1454_v28 = vld [vmem:[#allocation6 + $0x20] sm:$0xff] }
 0x197   : > { %3076 = vmatpush3.bf16.msk.msra.mxu1 %vm3075_vm2, %v3074_v40  ;;  %2917 = vmatprep.mubr.msk.f32.mxu1 %vm3320_vm11, %v3318_v56  ;;  %v3084_v11 = vpack.c.bf16 %v1455_v44, %v1454_v28 }
 0x199   : > { %3085 = vmatpush3.bf16.msra.mxu0 %v3084_v11 }
 0x19a   : > { %2918 = vmatmul.mubr.msk.f32.vlgmr.msra.gmra.mrb[4].mxu1 %vm1463_vm4, %v1449_v36  ;;  %3086 = vmatprep.subr.bf16.mxu0 %v3319_v34 }
 0x19d   : > { %3088 = vmatpush3.bf16.msra.mxu0 %v3087_v54 }
 0x19e   : > { %3089 = vmatprep.subr.bf16.mxu0 %v3319_v34 }
 0x1a1   : > { %3091 = vmatpush3.bf16.msra.mxu0 %v3090_v48 }
 0x1a2   : > { %2940 = vmatprep.subr.mxu0 %v3318_v56  ;;  %v2745_v56 = vld [vmem:[%s4535_s6] ss:$0 sm:$0xff] }
 0x1a5   : > { %2941 = vmatpush3.msk.msra.mxu0 %vm1545_vm6, %v1460_v63 }
 0x1eb   : > { %v1656_v38 = vpop.permute.xlu1 %1655 }
 0x1ee   : > { %v1639_v60 = vpop.permute.xlu0 %1638 }
 0x1ef   : > { %v1622_v22 = vpop.permute.xlu1 %1621 }
 0x22c   : > { %v2790_v0 = vpop.f32.mrb[0].mxu0 }
 0x22d   : > { %v2791_v24 = vpop.f32.mrb[1].mxu0 }
 0x22e   : > { %v2792_v10 = vadd.f32 %v2791_v24, %v2790_v0 }
 0x230   : > { %v1045_v61 = vadd.f32 %v2792_v10, %v2744_v58 }
 0x249   : > { %v2825_v34 = vpop.f32.mrb[0].mxu1 }
 0x24a   : > { %v2826_v41 = vpop.f32.mrb[1].mxu1 }
 0x24b   : > { %v2827_v12 = vadd.f32 %v2826_v41, %v2825_v34 }
 0x24c   : > { %v2860_v18 = vpop.f32.mrb[2].mxu0 }
 0x24d   : > { %v1115_v14 = vadd.f32 %v2827_v12, %v1045_v61  ;;  %v2861_v4 = vpop.f32.mrb[3].mxu0 }
 0x24e   : > { %v2862_v25 = vadd.f32 %v2861_v4, %v2860_v18 }
 0x250   : > { %v1256_v51 = vadd.f32 %v2862_v25, %v2745_v56 }
 0x269   : > { %v2895_v43 = vpop.f32.mrb[2].mxu1 }
 0x26a   : > { %v2896_v50 = vpop.f32.mrb[3].mxu1 }
 0x26b   : > { %v2897_v46 = vadd.f32 %v2896_v50, %v2895_v43 }
 0x26d   : > { %v1326_v27 = vadd.f32 %v2897_v46, %v1256_v51  ;;  %v1537_v62 = vpop.f32.mrb[4].mxu1 }
 0x26e   : > { %v2919_v29 = vpop.f32.mrb[5].mxu1 }
 0x26f   : > { %v1329_v52 = vmul.f32 %v1326_v27, %v1115_v14 }
 0x271   : > { %2943 = vmatmul.mubr.msk.f32.vlgmr.msra.gmra.mrb[4].mxu0 %vm1541_vm7, %v1329_v52 }
 0x344   : > { %v1615_v13 = vpop.f32.mrb[4].mxu0 }
 0x345   : > { %v4022_v55 = vadd.f32 %v1615_v13, %v1537_v62  ;;  %v2944_v7 = vpop.f32.mrb[5].mxu0 }
 0x347   : > { %v1641_v31 = vmul.f32 %v1639_v60, %v4022_v55  ;;  %v1658_v21 = vmul.f32 %v1656_v38, %v4022_v55  ;;  %v1624_v2 = vmul.f32 %v1622_v22, %v4022_v55 }
 0x349   : > { %1647 = vrot.lane.b32.xlu1 %v1641_v31, %s3325_s29  ;;  %1643 = vrot.lane.b32.xlu0 %v1641_v31, %s3326_s30 }
 0x34d   : > { %1651 = vrot.lane.b32.xlu1 %v1641_v31, %s3327_s12  ;;  %1660 = vrot.lane.b32.xlu0 %v1658_v21, %s3326_s30 }
 0x351   : > { %1668 = vrot.lane.b32.xlu1 %v1658_v21, %s3327_s12  ;;  %1664 = vrot.lane.b32.xlu0 %v1658_v21, %s3325_s29 }
 0x355   : > { %1630 = vrot.lane.b32.xlu1 %v1624_v2, %s3325_s29  ;;  %1626 = vrot.lane.b32.xlu0 %v1624_v2, %s3326_s30 }
 0x359   : > { %1634 = vrot.lane.b32.xlu0 %v1624_v2, %s3327_s12 }
 0x3bb   : > { %v1648_v3 = vpop.permute.xlu1 %1647  ;;  %v1644_v23 = vpop.permute.xlu0 %1643 }
 0x3bc   : > { %v1646_v5 = vadd.f32 %v1644_v23, %v4022_v55 }
 0x3be   : > { %v1650_v33 = vadd.f32 %v1648_v3, %v1646_v5 }
 0x3bf   : > { %v1652_v15 = vpop.permute.xlu1 %1651  ;;  %v1661_v37 = vpop.permute.xlu0 %1660 }
 0x3c0   : > { %v4037_v30 = vadd.f32 %v1652_v15, %v1650_v33  ;;  %v1663_v17 = vadd.f32 %v1661_v37, %v4022_v55 }
 0x3c2   : > { %1713 = vrot.lane.b32.xlu1 %v4037_v30, %s3328_s15 }
 0x3c3   : > { %v1669_v32 = vpop.permute.xlu1 %1668  ;;  %v1665_v8 = vpop.permute.xlu0 %1664 }
 0x3c4   : > { %v1667_v49 = vadd.f32 %v1665_v8, %v1663_v17 }
 0x3c6   : > { %v4042_v20 = vadd.f32 %v1669_v32, %v1667_v49  ;;  %1735 = vrot.lane.b32.xlu1 %v4037_v30, %s3329_s16 }
 0x3c7   : > { %v1627_v40 = vpop.permute.xlu0 %1626  ;;  %v1631_v1 = vpop.permute.xlu1 %1630 }
 0x3c8   : > { %v1629_v59 = vadd.f32 %v1627_v40, %v4022_v55  ;;  %1722 = vrot.lane.b32.xlu0 %v4042_v20, %s3326_s30 }
 0x3ca   : > { %1691 = vrot.lane.b32.xlu1 %v4037_v30, %s3325_s29  ;;  %v1633_v35 = vadd.f32 %v1631_v1, %v1629_v59 }
 0x3cb   : > { %v1635_v36 = vpop.permute.xlu0 %1634 }
 0x3cc   : > { %1744 = vrot.lane.b32.xlu0 %v4042_v20, %s3330_s23  ;;  %v4051_v39 = vadd.f32 %v1635_v36, %v1633_v35 }
 0x3ce   : > { %1700 = vrot.lane.b32.xlu1 %v4042_v20, %s3331_s21 }
 0x3d0   : > { %1709 = vrot.lane.b32.xlu0 %v4051_v39, %s3324_s20 }
 0x3d2   : > { %1731 = vrot.lane.b32.xlu1 %v4051_v39, %s3323_s18  ;;  %s3335_s18 = smov 8  }
 0x434   : > { %v1714_v45 = vpop.permute.xlu1 %1713 }
 0x435   : > { %v1716_v9 = vmul.f32 %v1714_v45, %v4022_v55 }
 0x437   : > { %1718 = vrot.lane.b32.xlu0 %v1716_v9, %s3326_s30 }
 0x438   : > { %v1736_v19 = vpop.permute.xlu1 %1735 }
 0x439   : > { %v1738_v26 = vmul.f32 %v1736_v19, %v4022_v55 }
 0x43a   : > { %v1723_v42 = vpop.permute.xlu0 %1722 }
 0x43b   : > { %v1725_v28 = vmul.f32 %v1723_v42, %v4022_v55  ;;  %1740 = vrot.lane.b32.xlu1 %v1738_v26, %s3326_s30 }
 0x43c   : > { %v1692_v44 = vpop.permute.xlu1 %1691 }
 0x43d   : > { %1727 = vrot.lane.b32.xlu0 %v1725_v28, %s3325_s29  ;;  %v1694_v53 = vmul.f32 %v1692_v44, %v4022_v55 }
 0x43e   : > { %v1745_v11 = vpop.permute.xlu0 %1744 }
 0x43f   : > { %v1747_v16 = vmul.f32 %v1745_v11, %v4022_v55  ;;  %1687 = vrot.lane.b32.xlu1 %v4051_v39, %s3332_s25 }
 0x440   : > { %v1701_v6 = vpop.permute.xlu1 %1700 }
 0x441   : > { %v1703_v57 = vmul.f32 %v1701_v6, %v4022_v55  ;;  %1749 = vrot.lane.b32.xlu0 %v1747_v16, %s3325_s29 }
 0x442   : > { %v1710_v54 = vpop.permute.xlu0 %1709 }
 0x443   : > { %1705 = vrot.lane.b32.xlu1 %v1703_v57, %s3325_s29  ;;  %v1712_v63 = vmul.f32 %v1710_v54, %v4022_v55 }
 0x444   : > { %v1732_v47 = vpop.permute.xlu1 %1731 }
 0x445   : > { %1696 = vrot.lane.b32.xlu0 %v1694_v53, %s3326_s30  ;;  %v1734_v58 = vmul.f32 %v1732_v47, %v4022_v55 }
 0x4a9   : > { %v1719_v48 = vpop.permute.xlu0 %1718 }
 0x4aa   : > { %v1721_v24 = vadd.f32 %v1719_v48, %v1712_v63 }
 0x4ad   : > { %v1741_v0 = vpop.permute.xlu1 %1740 }
 0x4ae   : > { %v1743_v61 = vadd.f32 %v1741_v0, %v1734_v58 }
 0x4af   : > { %v1728_v10 = vpop.permute.xlu0 %1727 }
 0x4b0   : > { %v4075_v34 = vadd.f32 %v1728_v10, %v1721_v24 }
 0x4b1   : > { %v1688_v41 = vpop.permute.xlu1 %1687 }
 0x4b2   : > { %1797 = vrot.lane.b32.xlu0 %v4075_v34, %s3332_s25  ;;  %v1690_v14 = vmul.f32 %v1688_v41, %v4022_v55 }
 0x4b3   : > { %v1750_v12 = vpop.permute.xlu0 %1749 }
 0x4b4   : > { %v4079_v18 = vadd.f32 %v1750_v12, %v1743_v61 }
 0x4b5   : > { %v1706_v56 = vpop.permute.xlu1 %1705 }
 0x4b6   : > { %1819 = vrot.lane.b32.xlu0 %v4075_v34, %s3324_s20  ;;  %1806 = vrot.lane.b32.xlu1 %v4079_v18, %s3325_s29 }
 0x4b7   : > { %v1697_v4 = vpop.permute.xlu0 %1696 }
 0x4b8   : > { %v1699_v25 = vadd.f32 %v1697_v4, %v1690_v14 }
 0x4ba   : > { %1773 = vrot.lane.b32.xlu0 %v4075_v34, %s3327_s12  ;;  %1828 = vrot.lane.b32.xlu1 %v4079_v18, %s3328_s15  ;;  %v4090_v43 = vadd.f32 %v1706_v56, %v1699_v25 }
 0x4bc   : > { %v1771_v40 = vmul.f32 %v4090_v43, %v4022_v55 }
 0x4be   : > { %1783 = vrot.lane.b32.xlu0 %v4079_v18, %s3333_s24  ;;  %1793 = vrot.lane.b32.xlu1 %v4090_v43, %s3334_s13 }
 0x4c2   : > { %1815 = vrot.lane.b32.xlu0 %v4090_v43, %s3335_s18 }
 0x524   : > { %v1798_v51 = vpop.permute.xlu0 %1797 }
 0x525   : > { %v1800_v50 = vmul.f32 %v1798_v51, %v4022_v55 }
 0x527   : > { %1802 = vrot.lane.b32.xlu1 %v1800_v50, %s3326_s30 }
 0x528   : > { %v1807_v46 = vpop.permute.xlu1 %1806  ;;  %v1820_v27 = vpop.permute.xlu0 %1819 }
 0x529   : > { %v1809_v62 = vmul.f32 %v1807_v46, %v4022_v55  ;;  %v1822_v29 = vmul.f32 %v1820_v27, %v4022_v55 }
 0x52b   : > { %1811 = vrot.lane.b32.xlu1 %v1809_v62, %s3325_s29  ;;  %1824 = vrot.lane.b32.xlu0 %v1822_v29, %s3326_s30 }
 0x52c   : > { %v1829_v52 = vpop.permute.xlu1 %1828  ;;  %v1774_v13 = vpop.permute.xlu0 %1773 }
 0x52d   : > { %v1831_v60 = vmul.f32 %v1829_v52, %v4022_v55  ;;  %v1776_v7 = vmul.f32 %v1774_v13, %v4022_v55 }
 0x52f   : > { %1833 = vrot.lane.b32.xlu1 %v1831_v60, %s3325_s29  ;;  %1778 = vrot.lane.b32.xlu0 %v1776_v7, %s3326_s30 }
 0x530   : > { %v1784_v31 = vpop.permute.xlu0 %1783  ;;  %v1794_v21 = vpop.permute.xlu1 %1793 }
 0x531   : > { %v1786_v38 = vmul.f32 %v1784_v31, %v4022_v55  ;;  %v1796_v3 = vmul.f32 %v1794_v21, %v4022_v55 }
 0x533   : > { %1788 = vrot.lane.b32.xlu1 %v1786_v38, %s3325_s29 }
 0x534   : > { %v1816_v22 = vpop.permute.xlu0 %1815 }
 0x535   : > { %v1818_v15 = vmul.f32 %v1816_v22, %v4022_v55 }
 0x599   : > { %v1803_v2 = vpop.permute.xlu1 %1802 }
 0x59a   : > { %v1805_v23 = vadd.f32 %v1803_v2, %v1796_v3 }
 0x59d   : > { %v1812_v5 = vpop.permute.xlu1 %1811  ;;  %v1825_v33 = vpop.permute.xlu0 %1824 }
 0x59e   : > { %v4112_v37 = vadd.f32 %v1812_v5, %v1805_v23  ;;  %v1827_v17 = vadd.f32 %v1825_v33, %v1818_v15 }
 0x5a0   : > { %1881 = vrot.lane.b32.xlu0 %v4112_v37, %s3332_s25 }
 0x5a1   : > { %v1834_v32 = vpop.permute.xlu1 %1833  ;;  %v1779_v49 = vpop.permute.xlu0 %1778 }
 0x5a2   : > { %v4116_v8 = vadd.f32 %v1834_v32, %v1827_v17  ;;  %v1781_v1 = vadd.f32 %v1779_v49, %v1771_v40 }
 0x5a4   : > { %1903 = vrot.lane.b32.xlu0 %v4112_v37, %s3324_s20  ;;  %1890 = vrot.lane.b32.xlu1 %v4116_v8, %s3325_s29 }
 0x5a5   : > { %v1789_v59 = vpop.permute.xlu1 %1788 }
 0x5a6   : > { %v4128_v35 = vadd.f32 %v1789_v59, %v1781_v1 }
 0x5a8   : > { %1857 = vrot.lane.b32.xlu0 %v4112_v37, %s3327_s12  ;;  %1912 = vrot.lane.b32.xlu1 %v4116_v8, %s3328_s15  ;;  %v1855_v4 = vmul.f32 %v4128_v35, %v4022_v55 }
 0x5ac   : > { %1867 = vrot.lane.b32.xlu0 %v4116_v8, %s3333_s24  ;;  %1877 = vrot.lane.b32.xlu1 %v4128_v35, %s3334_s13 }
 0x5b0   : > { %1899 = vrot.lane.b32.xlu0 %v4128_v35, %s3335_s18 }
 0x612   : > { %v1882_v36 = vpop.permute.xlu0 %1881 }
 0x613   : > { %v1884_v45 = vmul.f32 %v1882_v36, %v4022_v55 }
 0x615   : > { %1886 = vrot.lane.b32.xlu1 %v1884_v45, %s3326_s30 }
 0x616   : > { %v1891_v9 = vpop.permute.xlu1 %1890  ;;  %v1904_v19 = vpop.permute.xlu0 %1903 }
 0x617   : > { %v1893_v26 = vmul.f32 %v1891_v9, %v4022_v55  ;;  %v1906_v42 = vmul.f32 %v1904_v19, %v4022_v55 }
 0x619   : > { %1895 = vrot.lane.b32.xlu1 %v1893_v26, %s3325_s29  ;;  %1908 = vrot.lane.b32.xlu0 %v1906_v42, %s3326_s30 }
 0x61a   : > { %v1913_v28 = vpop.permute.xlu1 %1912  ;;  %v1858_v44 = vpop.permute.xlu0 %1857 }
 0x61b   : > { %v1915_v11 = vmul.f32 %v1913_v28, %v4022_v55  ;;  %v1860_v16 = vmul.f32 %v1858_v44, %v4022_v55 }
 0x61d   : > { %1917 = vrot.lane.b32.xlu1 %v1915_v11, %s3325_s29  ;;  %1862 = vrot.lane.b32.xlu0 %v1860_v16, %s3326_s30 }
 0x61e   : > { %v1868_v6 = vpop.permute.xlu0 %1867  ;;  %v1878_v53 = vpop.permute.xlu1 %1877 }
 0x61f   : > { %v1870_v57 = vmul.f32 %v1868_v6, %v4022_v55  ;;  %v1880_v48 = vmul.f32 %v1878_v53, %v4022_v55 }
 0x621   : > { %1872 = vrot.lane.b32.xlu1 %v1870_v57, %s3325_s29 }
 0x622   : > { %v1900_v54 = vpop.permute.xlu0 %1899 }
 0x623   : > { %v1902_v10 = vmul.f32 %v1900_v54, %v4022_v55 }
 0x687   : > { %v1887_v47 = vpop.permute.xlu1 %1886 }
 0x688   : > { %v1889_v63 = vadd.f32 %v1887_v47, %v1880_v48 }
 0x68b   : > { %v1896_v0 = vpop.permute.xlu1 %1895  ;;  %v1909_v24 = vpop.permute.xlu0 %1908 }
 0x68c   : > { %v4150_v58 = vadd.f32 %v1896_v0, %v1889_v63  ;;  %v1911_v61 = vadd.f32 %v1909_v24, %v1902_v10 }
 0x68e   : > { %1965 = vrot.lane.b32.xlu0 %v4150_v58, %s3332_s25 }
 0x68f   : > { %v1918_v41 = vpop.permute.xlu1 %1917  ;;  %v1863_v14 = vpop.permute.xlu0 %1862 }
 0x690   : > { %v4154_v12 = vadd.f32 %v1918_v41, %v1911_v61  ;;  %v1865_v56 = vadd.f32 %v1863_v14, %v1855_v4 }
 0x692   : > { %1987 = vrot.lane.b32.xlu0 %v4150_v58, %s3324_s20  ;;  %1974 = vrot.lane.b32.xlu1 %v4154_v12, %s3325_s29 }
 0x693   : > { %v1873_v25 = vpop.permute.xlu1 %1872 }
 0x694   : > { %v4166_v51 = vadd.f32 %v1873_v25, %v1865_v56 }
 0x696   : > { %1941 = vrot.lane.b32.xlu0 %v4150_v58, %s3327_s12  ;;  %1996 = vrot.lane.b32.xlu1 %v4154_v12, %s3328_s15  ;;  %v1939_v36 = vmul.f32 %v4166_v51, %v4022_v55 }
 0x69a   : > { %1951 = vrot.lane.b32.xlu0 %v4154_v12, %s3333_s24  ;;  %1961 = vrot.lane.b32.xlu1 %v4166_v51, %s3334_s13 }
 0x69e   : > { %1983 = vrot.lane.b32.xlu0 %v4166_v51, %s3335_s18 }
 0x700   : > { %v1966_v50 = vpop.permute.xlu0 %1965 }
 0x701   : > { %v1968_v46 = vmul.f32 %v1966_v50, %v4022_v55 }
 0x703   : > { %1970 = vrot.lane.b32.xlu1 %v1968_v46, %s3326_s30 }
 0x704   : > { %v1975_v27 = vpop.permute.xlu1 %1974  ;;  %v1988_v62 = vpop.permute.xlu0 %1987 }
 0x705   : > { %v1977_v29 = vmul.f32 %v1975_v27, %v4022_v55  ;;  %v1990_v52 = vmul.f32 %v1988_v62, %v4022_v55 }
 0x707   : > { %1979 = vrot.lane.b32.xlu1 %v1977_v29, %s3325_s29  ;;  %1992 = vrot.lane.b32.xlu0 %v1990_v52, %s3326_s30 }
 0x708   : > { %v1997_v13 = vpop.permute.xlu1 %1996  ;;  %v1942_v60 = vpop.permute.xlu0 %1941 }
 0x709   : > { %v1999_v7 = vmul.f32 %v1997_v13, %v4022_v55  ;;  %v1944_v31 = vmul.f32 %v1942_v60, %v4022_v55 }
 0x70b   : > { %2001 = vrot.lane.b32.xlu1 %v1999_v7, %s3325_s29  ;;  %1946 = vrot.lane.b32.xlu0 %v1944_v31, %s3326_s30 }
 0x70c   : > { %v1952_v38 = vpop.permute.xlu0 %1951  ;;  %v1962_v22 = vpop.permute.xlu1 %1961 }
 0x70d   : > { %v1954_v21 = vmul.f32 %v1952_v38, %v4022_v55  ;;  %v1964_v23 = vmul.f32 %v1962_v22, %v4022_v55 }
 0x70f   : > { %1956 = vrot.lane.b32.xlu1 %v1954_v21, %s3325_s29 }
 0x710   : > { %v1984_v2 = vpop.permute.xlu0 %1983 }
 0x711   : > { %v1986_v17 = vmul.f32 %v1984_v2, %v4022_v55 }
 0x775   : > { %v1971_v3 = vpop.permute.xlu1 %1970 }
 0x776   : > { %v1973_v5 = vadd.f32 %v1971_v3, %v1964_v23 }
 0x779   : > { %v1980_v33 = vpop.permute.xlu1 %1979  ;;  %v1993_v15 = vpop.permute.xlu0 %1992 }
 0x77a   : > { %v4188_v32 = vadd.f32 %v1980_v33, %v1973_v5  ;;  %v1995_v49 = vadd.f32 %v1993_v15, %v1986_v17 }
 0x77c   : > { %2049 = vrot.lane.b32.xlu0 %v4188_v32, %s3332_s25 }
 0x77d   : > { %v2002_v40 = vpop.permute.xlu1 %2001  ;;  %v1947_v1 = vpop.permute.xlu0 %1946 }
 0x77e   : > { %v4192_v59 = vadd.f32 %v2002_v40, %v1995_v49  ;;  %v1949_v9 = vadd.f32 %v1947_v1, %v1939_v36 }
 0x780   : > { %2071 = vrot.lane.b32.xlu0 %v4188_v32, %s3324_s20  ;;  %2058 = vrot.lane.b32.xlu1 %v4192_v59, %s3325_s29 }
 0x781   : > { %v1957_v45 = vpop.permute.xlu1 %1956 }
 0x782   : > { %v4204_v19 = vadd.f32 %v1957_v45, %v1949_v9 }
 0x784   : > { %2025 = vrot.lane.b32.xlu0 %v4188_v32, %s3327_s12  ;;  %2080 = vrot.lane.b32.xlu1 %v4192_v59, %s3328_s15  ;;  %v2023_v62 = vmul.f32 %v4204_v19, %v4022_v55 }
 0x788   : > { %2035 = vrot.lane.b32.xlu0 %v4192_v59, %s3333_s24  ;;  %2045 = vrot.lane.b32.xlu1 %v4204_v19, %s3334_s13 }
 0x78c   : > { %2067 = vrot.lane.b32.xlu0 %v4204_v19, %s3335_s18 }
 0x7ee   : > { %v2050_v26 = vpop.permute.xlu0 %2049 }
 0x7ef   : > { %v2052_v42 = vmul.f32 %v2050_v26, %v4022_v55 }
 0x7f1   : > { %2054 = vrot.lane.b32.xlu1 %v2052_v42, %s3326_s30 }
 0x7f2   : > { %v2059_v28 = vpop.permute.xlu1 %2058  ;;  %v2072_v44 = vpop.permute.xlu0 %2071 }
 0x7f3   : > { %v2061_v11 = vmul.f32 %v2059_v28, %v4022_v55  ;;  %v2074_v16 = vmul.f32 %v2072_v44, %v4022_v55 }
 0x7f5   : > { %2063 = vrot.lane.b32.xlu1 %v2061_v11, %s3325_s29  ;;  %2076 = vrot.lane.b32.xlu0 %v2074_v16, %s3326_s30 }
 0x7f6   : > { %v2081_v6 = vpop.permute.xlu1 %2080  ;;  %v2026_v57 = vpop.permute.xlu0 %2025 }
 0x7f7   : > { %v2083_v53 = vmul.f32 %v2081_v6, %v4022_v55  ;;  %v2028_v54 = vmul.f32 %v2026_v57, %v4022_v55 }
 0x7f9   : > { %2085 = vrot.lane.b32.xlu1 %v2083_v53, %s3325_s29  ;;  %2030 = vrot.lane.b32.xlu0 %v2028_v54, %s3326_s30 }
 0x7fa   : > { %v2036_v47 = vpop.permute.xlu0 %2035  ;;  %v2046_v63 = vpop.permute.xlu1 %2045 }
 0x7fb   : > { %v2038_v48 = vmul.f32 %v2036_v47, %v4022_v55  ;;  %v2048_v10 = vmul.f32 %v2046_v63, %v4022_v55 }
 0x7fd   : > { %2040 = vrot.lane.b32.xlu1 %v2038_v48, %s3325_s29 }
 0x7fe   : > { %v2068_v0 = vpop.permute.xlu0 %2067 }
 0x7ff   : > { %v2070_v4 = vmul.f32 %v2068_v0, %v4022_v55 }
 0x863   : > { %v2055_v24 = vpop.permute.xlu1 %2054 }
 0x864   : > { %v2057_v61 = vadd.f32 %v2055_v24, %v2048_v10 }
 0x867   : > { %v2064_v41 = vpop.permute.xlu1 %2063  ;;  %v2077_v14 = vpop.permute.xlu0 %2076 }
 0x868   : > { %v4226_v25 = vadd.f32 %v2064_v41, %v2057_v61  ;;  %v2079_v56 = vadd.f32 %v2077_v14, %v2070_v4 }
 0x86a   : > { %2133 = vrot.lane.b32.xlu0 %v4226_v25, %s3332_s25 }
 0x86b   : > { %v2086_v50 = vpop.permute.xlu1 %2085  ;;  %v2031_v27 = vpop.permute.xlu0 %2030 }
 0x86c   : > { %v4230_v46 = vadd.f32 %v2086_v50, %v2079_v56  ;;  %v2033_v52 = vadd.f32 %v2031_v27, %v2023_v62 }
 0x86e   : > { %2155 = vrot.lane.b32.xlu0 %v4226_v25, %s3324_s20  ;;  %2142 = vrot.lane.b32.xlu1 %v4230_v46, %s3325_s29 }
 0x86f   : > { %v2041_v29 = vpop.permute.xlu1 %2040 }
 0x870   : > { %v4242_v13 = vadd.f32 %v2041_v29, %v2033_v52 }
 0x872   : > { %2109 = vrot.lane.b32.xlu0 %v4226_v25, %s3327_s12  ;;  %2164 = vrot.lane.b32.xlu1 %v4230_v46, %s3328_s15  ;;  %v2107_v6 = vmul.f32 %v4242_v13, %v4022_v55 }
 0x876   : > { %2119 = vrot.lane.b32.xlu0 %v4230_v46, %s3333_s24  ;;  %2129 = vrot.lane.b32.xlu1 %v4242_v13, %s3334_s13 }
 0x87a   : > { %2151 = vrot.lane.b32.xlu0 %v4242_v13, %s3335_s18 }
 0x8dc   : > { %v2134_v60 = vpop.permute.xlu0 %2133 }
 0x8dd   : > { %v2136_v7 = vmul.f32 %v2134_v60, %v4022_v55 }
 0x8df   : > { %2138 = vrot.lane.b32.xlu1 %v2136_v7, %s3326_s30 }
 0x8e0   : > { %v2143_v31 = vpop.permute.xlu1 %2142  ;;  %v2156_v38 = vpop.permute.xlu0 %2155 }
 0x8e1   : > { %v2145_v21 = vmul.f32 %v2143_v31, %v4022_v55  ;;  %v2158_v22 = vmul.f32 %v2156_v38, %v4022_v55 }
 0x8e3   : > { %2147 = vrot.lane.b32.xlu1 %v2145_v21, %s3325_s29  ;;  %2160 = vrot.lane.b32.xlu0 %v2158_v22, %s3326_s30 }
 0x8e4   : > { %v2165_v2 = vpop.permute.xlu1 %2164  ;;  %v2110_v3 = vpop.permute.xlu0 %2109 }
 0x8e5   : > { %v2167_v23 = vmul.f32 %v2165_v2, %v4022_v55  ;;  %v2112_v5 = vmul.f32 %v2110_v3, %v4022_v55 }
 0x8e7   : > { %2169 = vrot.lane.b32.xlu1 %v2167_v23, %s3325_s29  ;;  %2114 = vrot.lane.b32.xlu0 %v2112_v5, %s3326_s30 }
 0x8e8   : > { %v2120_v33 = vpop.permute.xlu0 %2119  ;;  %v2130_v17 = vpop.permute.xlu1 %2129 }
 0x8e9   : > { %v2122_v15 = vmul.f32 %v2120_v33, %v4022_v55  ;;  %v2132_v1 = vmul.f32 %v2130_v17, %v4022_v55 }
 0x8eb   : > { %2124 = vrot.lane.b32.xlu1 %v2122_v15, %s3325_s29 }
 0x8ec   : > { %v2152_v49 = vpop.permute.xlu0 %2151 }
 0x8ed   : > { %v2154_v26 = vmul.f32 %v2152_v49, %v4022_v55 }
 0x951   : > { %v2139_v40 = vpop.permute.xlu1 %2138 }
 0x952   : > { %v2141_v36 = vadd.f32 %v2139_v40, %v2132_v1 }
 0x955   : > { %v2148_v45 = vpop.permute.xlu1 %2147  ;;  %v2161_v9 = vpop.permute.xlu0 %2160 }
 0x956   : > { %v4264_v42 = vadd.f32 %v2148_v45, %v2141_v36  ;;  %v2163_v28 = vadd.f32 %v2161_v9, %v2154_v26 }
 0x958   : > { %2217 = vrot.lane.b32.xlu0 %v4264_v42, %s3332_s25 }
 0x959   : > { %v2170_v44 = vpop.permute.xlu1 %2169  ;;  %v2115_v16 = vpop.permute.xlu0 %2114 }
 0x95a   : > { %v4268_v11 = vadd.f32 %v2170_v44, %v2163_v28  ;;  %v2117_v53 = vadd.f32 %v2115_v16, %v2107_v6 }
 0x95c   : > { %2239 = vrot.lane.b32.xlu0 %v4264_v42, %s3324_s20  ;;  %2226 = vrot.lane.b32.xlu1 %v4268_v11, %s3325_s29 }
 0x95d   : > { %v2125_v57 = vpop.permute.xlu1 %2124 }
 0x95e   : > { %v4280_v54 = vadd.f32 %v2125_v57, %v2117_v53 }
 0x960   : > { %2193 = vrot.lane.b32.xlu0 %v4264_v42, %s3327_s12  ;;  %2248 = vrot.lane.b32.xlu1 %v4268_v11, %s3328_s15  ;;  %v2191_v5 = vmul.f32 %v4280_v54, %v4022_v55 }
 0x964   : > { %2203 = vrot.lane.b32.xlu0 %v4268_v11, %s3333_s24  ;;  %2213 = vrot.lane.b32.xlu1 %v4280_v54, %s3334_s13 }
 0x968   : > { %2235 = vrot.lane.b32.xlu0 %v4280_v54, %s3335_s18 }
 0x9ca   : > { %v2218_v47 = vpop.permute.xlu0 %2217 }
 0x9cb   : > { %v2220_v48 = vmul.f32 %v2218_v47, %v4022_v55 }
 0x9cd   : > { %2222 = vrot.lane.b32.xlu1 %v2220_v48, %s3326_s30 }
 0x9ce   : > { %v2227_v63 = vpop.permute.xlu1 %2226  ;;  %v2240_v0 = vpop.permute.xlu0 %2239 }
 0x9cf   : > { %v2229_v24 = vmul.f32 %v2227_v63, %v4022_v55  ;;  %v2242_v10 = vmul.f32 %v2240_v0, %v4022_v55 }
 0x9d1   : > { %2231 = vrot.lane.b32.xlu1 %v2229_v24, %s3325_s29  ;;  %2244 = vrot.lane.b32.xlu0 %v2242_v10, %s3326_s30 }
 0x9d2   : > { %v2249_v61 = vpop.permute.xlu1 %2248  ;;  %v2194_v41 = vpop.permute.xlu0 %2193 }
 0x9d3   : > { %v2251_v14 = vmul.f32 %v2249_v61, %v4022_v55  ;;  %v2196_v4 = vmul.f32 %v2194_v41, %v4022_v55 }
 0x9d5   : > { %2253 = vrot.lane.b32.xlu1 %v2251_v14, %s3325_s29  ;;  %2198 = vrot.lane.b32.xlu0 %v2196_v4, %s3326_s30 }
 0x9d6   : > { %v2204_v56 = vpop.permute.xlu0 %2203  ;;  %v2214_v27 = vpop.permute.xlu1 %2213 }
 0x9d7   : > { %v2206_v50 = vmul.f32 %v2204_v56, %v4022_v55  ;;  %v2216_v52 = vmul.f32 %v2214_v27, %v4022_v55 }
 0x9d9   : > { %2208 = vrot.lane.b32.xlu1 %v2206_v50, %s3325_s29 }
 0x9da   : > { %v2236_v62 = vpop.permute.xlu0 %2235 }
 0x9db   : > { %v2238_v38 = vmul.f32 %v2236_v62, %v4022_v55 }
 0xa3f   : > { %v2223_v29 = vpop.permute.xlu1 %2222 }
 0xa40   : > { %v2225_v60 = vadd.f32 %v2223_v29, %v2216_v52 }
 0xa43   : > { %v2232_v7 = vpop.permute.xlu1 %2231  ;;  %v2245_v31 = vpop.permute.xlu0 %2244 }
 0xa44   : > { %v4302_v21 = vadd.f32 %v2232_v7, %v2225_v60  ;;  %v2247_v22 = vadd.f32 %v2245_v31, %v2238_v38 }
 0xa46   : > { %2301 = vrot.lane.b32.xlu0 %v4302_v21, %s3332_s25 }
 0xa47   : > { %v2254_v2 = vpop.permute.xlu1 %2253  ;;  %v2199_v23 = vpop.permute.xlu0 %2198 }
 0xa48   : > { %v4306_v3 = vadd.f32 %v2254_v2, %v2247_v22  ;;  %v2201_v15 = vadd.f32 %v2199_v23, %v2191_v5 }
 0xa4a   : > { %2323 = vrot.lane.b32.xlu0 %v4302_v21, %s3324_s20  ;;  %2310 = vrot.lane.b32.xlu1 %v4306_v3, %s3325_s29 }
 0xa4b   : > { %v2209_v33 = vpop.permute.xlu1 %2208 }
 0xa4c   : > { %v4318_v17 = vadd.f32 %v2209_v33, %v2201_v15 }
 0xa4e   : > { %2277 = vrot.lane.b32.xlu0 %v4302_v21, %s3327_s12  ;;  %2332 = vrot.lane.b32.xlu1 %v4306_v3, %s3328_s15  ;;  %v2275_v27 = vmul.f32 %v4318_v17, %v4022_v55 }
 0xa52   : > { %2287 = vrot.lane.b32.xlu0 %v4306_v3, %s3333_s24  ;;  %2297 = vrot.lane.b32.xlu1 %v4318_v17, %s3334_s13 }
 0xa56   : > { %2319 = vrot.lane.b32.xlu0 %v4318_v17, %s3335_s18 }
 0xab8   : > { %v2302_v49 = vpop.permute.xlu0 %2301 }
 0xab9   : > { %v2304_v40 = vmul.f32 %v2302_v49, %v4022_v55 }
 0xabb   : > { %2306 = vrot.lane.b32.xlu1 %v2304_v40, %s3326_s30 }
 0xabc   : > { %v2311_v1 = vpop.permute.xlu1 %2310  ;;  %v2324_v36 = vpop.permute.xlu0 %2323 }
 0xabd   : > { %v2313_v45 = vmul.f32 %v2311_v1, %v4022_v55  ;;  %v2326_v9 = vmul.f32 %v2324_v36, %v4022_v55 }
 0xabf   : > { %2315 = vrot.lane.b32.xlu1 %v2313_v45, %s3325_s29  ;;  %2328 = vrot.lane.b32.xlu0 %v2326_v9, %s3326_s30 }
 0xac0   : > { %v2333_v26 = vpop.permute.xlu1 %2332  ;;  %v2278_v28 = vpop.permute.xlu0 %2277 }
 0xac1   : > { %v2335_v44 = vmul.f32 %v2333_v26, %v4022_v55  ;;  %v2280_v16 = vmul.f32 %v2278_v28, %v4022_v55 }
 0xac3   : > { %2337 = vrot.lane.b32.xlu1 %v2335_v44, %s3325_s29  ;;  %2282 = vrot.lane.b32.xlu0 %v2280_v16, %s3326_s30 }
 0xac4   : > { %v2288_v6 = vpop.permute.xlu0 %2287  ;;  %v2298_v53 = vpop.permute.xlu1 %2297 }
 0xac5   : > { %v2290_v57 = vmul.f32 %v2288_v6, %v4022_v55  ;;  %v2300_v63 = vmul.f32 %v2298_v53, %v4022_v55 }
 0xac7   : > { %2292 = vrot.lane.b32.xlu1 %v2290_v57, %s3325_s29 }
 0xac8   : > { %v2320_v47 = vpop.permute.xlu0 %2319 }
 0xac9   : > { %v2322_v61 = vmul.f32 %v2320_v47, %v4022_v55 }
 0xb2d   : > { %v2307_v48 = vpop.permute.xlu1 %2306 }
 0xb2e   : > { %v2309_v0 = vadd.f32 %v2307_v48, %v2300_v63 }
 0xb31   : > { %v2316_v24 = vpop.permute.xlu1 %2315  ;;  %v2329_v10 = vpop.permute.xlu0 %2328 }
 0xb32   : > { %v4340_v41 = vadd.f32 %v2316_v24, %v2309_v0  ;;  %v2331_v14 = vadd.f32 %v2329_v10, %v2322_v61 }
 0xb34   : > { %2385 = vrot.lane.b32.xlu0 %v4340_v41, %s3332_s25 }
 0xb35   : > { %v2338_v4 = vpop.permute.xlu1 %2337  ;;  %v2283_v50 = vpop.permute.xlu0 %2282 }
 0xb36   : > { %v4344_v56 = vadd.f32 %v2338_v4, %v2331_v14  ;;  %v2285_v29 = vadd.f32 %v2283_v50, %v2275_v27 }
 0xb38   : > { %2407 = vrot.lane.b32.xlu0 %v4340_v41, %s3324_s20  ;;  %2394 = vrot.lane.b32.xlu1 %v4344_v56, %s3325_s29 }
 0xb39   : > { %v2293_v62 = vpop.permute.xlu1 %2292 }
 0xb3a   : > { %v4356_v52 = vadd.f32 %v2293_v62, %v2285_v29 }
 0xb3c   : > { %2361 = vrot.lane.b32.xlu0 %v4340_v41, %s3327_s12  ;;  %2416 = vrot.lane.b32.xlu1 %v4344_v56, %s3328_s15  ;;  %v2359_v63 = vmul.f32 %v4356_v52, %v4022_v55 }
 0xb40   : > { %2371 = vrot.lane.b32.xlu0 %v4344_v56, %s3333_s24  ;;  %2381 = vrot.lane.b32.xlu1 %v4356_v52, %s3334_s13 }
 0xb44   : > { %2403 = vrot.lane.b32.xlu0 %v4356_v52, %s3335_s18 }
 0xba6   : > { %v2386_v60 = vpop.permute.xlu0 %2385 }
 0xba7   : > { %v2388_v7 = vmul.f32 %v2386_v60, %v4022_v55 }
 0xba9   : > { %2390 = vrot.lane.b32.xlu1 %v2388_v7, %s3326_s30 }
 0xbaa   : > { %v2395_v31 = vpop.permute.xlu1 %2394  ;;  %v2408_v38 = vpop.permute.xlu0 %2407 }
 0xbab   : > { %v2397_v22 = vmul.f32 %v2395_v31, %v4022_v55  ;;  %v2410_v2 = vmul.f32 %v2408_v38, %v4022_v55 }
 0xbad   : > { %2399 = vrot.lane.b32.xlu1 %v2397_v22, %s3325_s29  ;;  %2412 = vrot.lane.b32.xlu0 %v2410_v2, %s3326_s30 }
 0xbae   : > { %v2417_v23 = vpop.permute.xlu1 %2416  ;;  %v2362_v5 = vpop.permute.xlu0 %2361 }
 0xbaf   : > { %v2419_v33 = vmul.f32 %v2417_v23, %v4022_v55  ;;  %v2364_v15 = vmul.f32 %v2362_v5, %v4022_v55 }
 0xbb1   : > { %2421 = vrot.lane.b32.xlu1 %v2419_v33, %s3325_s29  ;;  %2366 = vrot.lane.b32.xlu0 %v2364_v15, %s3326_s30 }
 0xbb2   : > { %v2372_v49 = vpop.permute.xlu0 %2371  ;;  %v2382_v1 = vpop.permute.xlu1 %2381 }
 0xbb3   : > { %v2374_v40 = vmul.f32 %v2372_v49, %v4022_v55  ;;  %v2384_v9 = vmul.f32 %v2382_v1, %v4022_v55 }
 0xbb5   : > { %2376 = vrot.lane.b32.xlu1 %v2374_v40, %s3325_s29 }
 0xbb6   : > { %v2404_v36 = vpop.permute.xlu0 %2403 }
 0xbb7   : > { %v2406_v16 = vmul.f32 %v2404_v36, %v4022_v55 }
 0xc1b   : > { %v2391_v45 = vpop.permute.xlu1 %2390 }
 0xc1c   : > { %v2393_v26 = vadd.f32 %v2391_v45, %v2384_v9 }
 0xc1f   : > { %v2400_v28 = vpop.permute.xlu1 %2399  ;;  %v2413_v44 = vpop.permute.xlu0 %2412 }
 0xc20   : > { %v4378_v6 = vadd.f32 %v2400_v28, %v2393_v26  ;;  %v2415_v57 = vadd.f32 %v2413_v44, %v2406_v16 }
 0xc22   : > { %2469 = vrot.lane.b32.xlu0 %v4378_v6, %s3332_s25 }
 0xc23   : > { %v2422_v53 = vpop.permute.xlu1 %2421  ;;  %v2367_v47 = vpop.permute.xlu0 %2366 }
 0xc24   : > { %v4382_v48 = vadd.f32 %v2422_v53, %v2415_v57  ;;  %v2369_v0 = vadd.f32 %v2367_v47, %v2359_v63  ;;  %v1753_v57 = vmul.f32 0.5, %v4090_v43 }
 0xc26   : > { %2491 = vrot.lane.b32.xlu0 %v4378_v6, %s3324_s20  ;;  %2478 = vrot.lane.b32.xlu1 %v4382_v48, %s3325_s29 }
 0xc27   : > { %v2377_v24 = vpop.permute.xlu1 %2376 }
 0xc28   : > { %v4390_v10 = vadd.f32 %v2377_v24, %v2369_v0 }
 0xc2a   : > { %2500 = vrot.lane.b32.xlu1 %v4382_v48, %s3328_s15  ;;  %2465 = vrot.lane.b32.xlu0 %v4390_v10, %s3334_s13  ;;  %v2443_v44 = vmul.f32 %v4390_v10, %v4022_v55 }
 0xc2e   : > { %2445 = vrot.lane.b32.xlu1 %v4378_v6, %s3327_s12  ;;  %2455 = vrot.lane.b32.xlu0 %v4382_v48, %s3333_s24 }
 0xc32   : > { %2487 = vrot.lane.b32.xlu1 %v4390_v10, %s3335_s18 }
 0xc94   : > { %v2470_v61 = vpop.permute.xlu0 %2469 }
 0xc95   : > { %v2472_v14 = vmul.f32 %v2470_v61, %v4022_v55 }
 0xc97   : > { %2474 = vrot.lane.b32.xlu0 %v2472_v14, %s3326_s30 }
 0xc98   : > { %v2479_v4 = vpop.permute.xlu1 %2478  ;;  %v2492_v50 = vpop.permute.xlu0 %2491 }
 0xc99   : > { %v2481_v27 = vmul.f32 %v2479_v4, %v4022_v55  ;;  %v2494_v62 = vmul.f32 %v2492_v50, %v4022_v55 }
 0xc9b   : > { %2483 = vrot.lane.b32.xlu1 %v2481_v27, %s3325_s29  ;;  %2496 = vrot.lane.b32.xlu0 %v2494_v62, %s3326_s30  ;;  %v1759_v62 = vmul.f32 0.5, %v4075_v34  ;;  %v1921_v34 = vmul.f32 0.041666668, %v4166_v51  ;;  %v2095_v51 = vmul.f32 0.0013888889, %v4226_v25 }
 0xc9c   : > { %v2501_v29 = vpop.permute.xlu1 %2500  ;;  %v2466_v60 = vpop.permute.xlu0 %2465  ;;  %v2257_v25 = vmul.f32 2.4801588e-05, %v4318_v17  ;;  %v2431_v17 = vmul.f32 2.755732e-07, %v4378_v6 }
 0xc9d   : > { %v2503_v7 = vmul.f32 %v2501_v29, %v4022_v55  ;;  %v2468_v33 = vmul.f32 %v2466_v60, %v4022_v55  ;;  %v1765_v29 = vmul.f32 0.5, %v4079_v18  ;;  %v1837_v60 = vmul.f32 0.16666667, %v4128_v35 }
 0xc9e   : > { %v1933_v18 = vmul.f32 0.041666668, %v4154_v12  ;;  %v2005_v35 = vmul.f32 0.008333334, %v4204_v19  ;;  %v2101_v12 = vmul.f32 0.0013888889, %v4230_v46 }
 0xc9f   : > { %2505 = vrot.lane.b32.xlu1 %v2503_v7, %s3325_s29  ;;  %v1843_v7 = vmul.f32 0.16666667, %v4112_v37  ;;  %v2011_v37 = vmul.f32 0.008333334, %v4188_v32  ;;  %v2173_v19 = vmul.f32 0.0001984127, %v4280_v54 }
 0xca0   : > { %v2446_v31 = vpop.permute.xlu1 %2445  ;;  %v2456_v38 = vpop.permute.xlu0 %2455  ;;  %v2179_v32 = vmul.f32 0.0001984127, %v4264_v42  ;;  %v2269_v46 = vmul.f32 2.4801588e-05, %v4306_v3  ;;  %v2341_v54 = vmul.f32 2.7557319e-06, %v4356_v52 }
 0xca1   : > { %v2448_v22 = vmul.f32 %v2446_v31, %v4022_v55  ;;  %v2458_v2 = vmul.f32 %v2456_v38, %v4022_v55  ;;  %v1849_v31 = vmul.f32 0.16666667, %v4116_v8  ;;  %v1927_v38 = vmul.f32 0.041666668, %v4150_v58 }
 0xca2   : > { %v2017_v8 = vmul.f32 0.008333334, %v4192_v59  ;;  %v2089_v58 = vmul.f32 0.0013888889, %v4242_v13  ;;  %v2185_v59 = vmul.f32 0.0001984127, %v4268_v11 }
 0xca3   : > { %2450 = vrot.lane.b32.xlu0 %v2448_v22, %s3326_s30  ;;  %2460 = vrot.lane.b32.xlu1 %v2458_v2, %s3325_s29  ;;  %v2263_v13 = vmul.f32 2.4801588e-05, %v4302_v21  ;;  %v2347_v42 = vmul.f32 2.7557319e-06, %v4340_v41  ;;  %v2353_v11 = vmul.f32 2.7557319e-06, %v4344_v56 }
 0xca4   : > { %v2488_v23 = vpop.permute.xlu1 %2487  ;;  %v2425_v21 = vmul.f32 2.755732e-07, %v4390_v10  ;;  %v2437_v3 = vmul.f32 2.755732e-07, %v4382_v48 }
 0xca5   : > { %v2490_v1 = vmul.f32 %v2488_v23, %v4022_v55 }
 0xd09   : > { %v2475_v5 = vpop.permute.xlu0 %2474 }
 0xd0a   : > { %v2477_v15 = vadd.f32 %v2475_v5, %v2468_v33 }
 0xd0d   : > { %v2484_v49 = vpop.permute.xlu1 %2483  ;;  %v2497_v40 = vpop.permute.xlu0 %2496 }
 0xd0e   : > { %v4416_v36 = vadd.f32 %v2484_v49, %v2477_v15  ;;  %v2499_v45 = vadd.f32 %v2497_v40, %v2490_v1 }
 0xd10   : > { %2553 = vrot.lane.b32.xlu1 %v4416_v36, %s3332_s25  ;;  %2529 = vrot.lane.b32.xlu0 %v4416_v36, %s3327_s12  ;;  %v2515_v41 = vmul.f32 2.5052108e-08, %v4416_v36 }
 0xd11   : > { %v2506_v9 = vpop.permute.xlu1 %2505 }
 0xd12   : > { %v4422_v26 = vadd.f32 %v2506_v9, %v2499_v45 }
 0xd14   : > { %2575 = vrot.lane.b32.xlu1 %v4416_v36, %s3324_s20  ;;  %2539 = vrot.lane.b32.xlu0 %v4422_v26, %s3333_s24  ;;  %s3338_s20 = smov 118   ;;  %v2521_v56 = vmul.f32 2.5052108e-08, %v4422_v26 }
 0xd15   : > { %v2451_v28 = vpop.permute.xlu0 %2450  ;;  %v2461_v53 = vpop.permute.xlu1 %2460 }
 0xd16   : > { %v2453_v16 = vadd.f32 %v2451_v28, %v2443_v44 }
 0xd18   : > { %2584 = vrot.lane.b32.xlu1 %v4422_v26, %s3328_s15  ;;  %2562 = vrot.lane.b32.xlu0 %v4422_v26, %s3325_s29  ;;  %v4439_v47 = vadd.f32 %v2461_v53, %v2453_v16 }
 0xd1a   : > { %v2509_v52 = vmul.f32 2.5052108e-08, %v4439_v47  ;;  %v2527_v33 = vmul.f32 %v4439_v47, %v4022_v55 }
 0xd1c   : > { %1678 = vrot.lane.b32.xlu1 %v4037_v30, %s3336_s19  ;;  %1673 = vrot.lane.b32.xlu0 %v4051_v39, %s3337_s22 }
 0xd20   : > { %1755 = vrot.lane.b32.xlu1 %v1753_v57, %s3331_s21  ;;  %1683 = vrot.lane.b32.xlu0 %v4042_v20, %s3338_s20 }
 0xd24   : > { %2549 = vrot.lane.b32.xlu0 %v4439_v47, %s3334_s13 }
 0xd28   : > { %2571 = vrot.lane.b32.xlu0 %v4439_v47, %s3335_s18 }
 0xd82   : > { %v2554_v30 = vpop.permute.xlu1 %2553  ;;  %v2530_v63 = vpop.permute.xlu0 %2529 }
 0xd83   : > { %v2532_v39 = vmul.f32 %v2530_v63, %v4022_v55  ;;  %v2556_v24 = vmul.f32 %v2554_v30, %v4022_v55 }
 0xd85   : > { %2534 = vrot.lane.b32.xlu1 %v2532_v39, %s3326_s30 }
 0xd86   : > { %v2576_v43 = vpop.permute.xlu1 %2575  ;;  %v2540_v0 = vpop.permute.xlu0 %2539 }
 0xd87   : > { %v2542_v20 = vmul.f32 %v2540_v0, %v4022_v55  ;;  %v2578_v14 = vmul.f32 %v2576_v43, %v4022_v55 }
 0xd89   : > { %2558 = vrot.lane.b32.xlu1 %v2556_v24, %s3326_s30  ;;  %2544 = vrot.lane.b32.xlu0 %v2542_v20, %s3325_s29 }
 0xd8a   : > { %v2563_v61 = vpop.permute.xlu0 %2562  ;;  %v2585_v50 = vpop.permute.xlu1 %2584 }
 0xd8b   : > { %v2565_v4 = vmul.f32 %v2563_v61, %v4022_v55  ;;  %v2587_v27 = vmul.f32 %v2585_v50, %v4022_v55 }
 0xd8d   : > { %2580 = vrot.lane.b32.xlu1 %v2578_v14, %s3326_s30  ;;  %2567 = vrot.lane.b32.xlu0 %v2565_v4, %s3325_s29 }
 0xd8e   : > { %v1674_v6 = vpop.permute.xlu0 %1673  ;;  %v1679_v22 = vpop.permute.xlu1 %1678 }
 0xd91   : > { %2589 = vrot.lane.b32.xlu1 %v2587_v27, %s3325_s29  ;;  %1761 = vrot.lane.b32.xlu0 %v1759_v62, %s3339_s27 }
 0xd92   : > { %v1684_v10 = vpop.permute.xlu0 %1683  ;;  %v1756_v23 = vpop.permute.xlu1 %1755 }
 0xd95   : > { %1767 = vrot.lane.b32.xlu1 %v1765_v29, %s3340_s28  ;;  %1839 = vrot.lane.b32.xlu0 %v1837_v60, %s3331_s21 }
 0xd96   : > { %v2550_v2 = vpop.permute.xlu0 %2549 }
 0xd97   : > { %v2552_v1 = vmul.f32 %v2550_v2, %v4022_v55 }
 0xd99   : > { %1845 = vrot.lane.b32.xlu1 %v1843_v7, %s3339_s27  ;;  %1851 = vrot.lane.b32.xlu0 %v1849_v31, %s3340_s28 }
 0xd9a   : > { %v2572_v48 = vpop.permute.xlu0 %2571 }
 0xd9b   : > { %v2574_v44 = vmul.f32 %v2572_v48, %v4022_v55 }
 0xd9d   : > { %1923 = vrot.lane.b32.xlu1 %v1921_v34, %s3331_s21  ;;  %1929 = vrot.lane.b32.xlu0 %v1927_v38, %s3339_s27 }
 0xda1   : > { %1935 = vrot.lane.b32.xlu1 %v1933_v18, %s3340_s28  ;;  %2007 = vrot.lane.b32.xlu0 %v2005_v35, %s3331_s21 }
 0xda5   : > { %2013 = vrot.lane.b32.xlu1 %v2011_v37, %s3339_s27  ;;  %2019 = vrot.lane.b32.xlu0 %v2017_v8, %s3340_s28 }
 0xda9   : > { %2091 = vrot.lane.b32.xlu1 %v2089_v58, %s3331_s21  ;;  %2097 = vrot.lane.b32.xlu0 %v2095_v51, %s3339_s27  ;;  %v3205_v58 = vld [vmem:[%s4009_s26] sm:$0xff] }
 0xdaa   : > { %v1676_v51 = vadd.f32 %v3205_v58, %v1674_v6 }
 0xdad   : > { %2103 = vrot.lane.b32.xlu1 %v2101_v12, %s3340_s28  ;;  %2175 = vrot.lane.b32.xlu0 %v2173_v19, %s3331_s21  ;;  %v1758_v12 = vadd.f32 %v1756_v23, %v1676_v51 }
 0xdb1   : > { %2181 = vrot.lane.b32.xlu1 %v2179_v32, %s3339_s27  ;;  %2187 = vrot.lane.b32.xlu0 %v2185_v59, %s3340_s28  ;;  %v1681_v32 = vadd.f32 %v3205_v58, %v1679_v22 }
 0xdb5   : > { %2259 = vrot.lane.b32.xlu1 %v2257_v25, %s3331_s21  ;;  %2265 = vrot.lane.b32.xlu0 %v2263_v13, %s3339_s27 }
 0xdb9   : > { %2271 = vrot.lane.b32.xlu1 %v2269_v46, %s3340_s28  ;;  %2343 = vrot.lane.b32.xlu0 %v2341_v54, %s3331_s21  ;;  %v1686_v54 = vadd.f32 %v3205_v58, %v1684_v10 }
 0xdbd   : > { %2349 = vrot.lane.b32.xlu1 %v2347_v42, %s3339_s27  ;;  %2355 = vrot.lane.b32.xlu0 %v2353_v11, %s3340_s28 }
 0xdc1   : > { %2427 = vrot.lane.b32.xlu1 %v2425_v21, %s3331_s21  ;;  %2433 = vrot.lane.b32.xlu0 %v2431_v17, %s3339_s27 }
 0xdc5   : > { %2439 = vrot.lane.b32.xlu1 %v2437_v3, %s3340_s28  ;;  %2511 = vrot.lane.b32.xlu0 %v2509_v52, %s3331_s21 }
 0xdc9   : > { %2517 = vrot.lane.b32.xlu1 %v2515_v41, %s3339_s27  ;;  %2523 = vrot.lane.b32.xlu0 %v2521_v56, %s3340_s28 }
 0xdf7   : > { %v2535_v5 = vpop.permute.xlu1 %2534 }
 0xdf8   : > { %v2537_v15 = vadd.f32 %v2535_v5, %v2527_v33 }
 0xdfb   : > { %v2559_v49 = vpop.permute.xlu1 %2558  ;;  %v2545_v40 = vpop.permute.xlu0 %2544 }
 0xdfc   : > { %v2547_v36 = vadd.f32 %v2545_v40, %v2537_v15  ;;  %v2561_v45 = vadd.f32 %v2559_v49, %v2552_v1 }
 0xdfe   : > { %v2593_v9 = vmul.f32 2.0876756e-09, %v2547_v36 }
 0xdff   : > { %v2581_v26 = vpop.permute.xlu1 %2580  ;;  %v2568_v28 = vpop.permute.xlu0 %2567 }
 0xe00   : > { %v2570_v16 = vadd.f32 %v2568_v28, %v2561_v45  ;;  %2595 = vrot.lane.b32.xlu1 %v2593_v9, %s3331_s21  ;;  %v2583_v57 = vadd.f32 %v2581_v26, %v2574_v44 }
 0xe02   : > { %v2599_v53 = vmul.f32 2.0876756e-09, %v2570_v16 }
 0xe03   : > { %v2590_v30 = vpop.permute.xlu1 %2589  ;;  %v1762_v39 = vpop.permute.xlu0 %1761 }
 0xe04   : > { %v2592_v63 = vadd.f32 %v2590_v30, %v2583_v57  ;;  %2601 = vrot.lane.b32.xlu0 %v2599_v53, %s3339_s27  ;;  %v1764_v13 = vadd.f32 %v1762_v39, %v1681_v32 }
 0xe06   : > { %v2605_v47 = vmul.f32 2.0876756e-09, %v2592_v63 }
 0xe07   : > { %v1768_v43 = vpop.permute.xlu1 %1767  ;;  %v1840_v0 = vpop.permute.xlu0 %1839 }
 0xe08   : > { %2607 = vrot.lane.b32.xlu1 %v2605_v47, %s3340_s28  ;;  %v1842_v59 = vadd.f32 %v1840_v0, %v1758_v12  ;;  %v1770_v17 = vadd.f32 %v1768_v43, %v1686_v54 }
 0xe0b   : > { %v1846_v24 = vpop.permute.xlu1 %1845  ;;  %v1852_v20 = vpop.permute.xlu0 %1851 }
 0xe0c   : > { %v1848_v42 = vadd.f32 %v1846_v24, %v1764_v13  ;;  %v1854_v56 = vadd.f32 %v1852_v20, %v1770_v17 }
 0xe0f   : > { %v1924_v61 = vpop.permute.xlu1 %1923  ;;  %v1930_v14 = vpop.permute.xlu0 %1929 }
 0xe10   : > { %v1926_v46 = vadd.f32 %v1924_v61, %v1842_v59  ;;  %v1932_v3 = vadd.f32 %v1930_v14, %v1848_v42 }
 0xe13   : > { %v1936_v55 = vpop.permute.xlu1 %1935  ;;  %v2008_v4 = vpop.permute.xlu0 %2007 }
 0xe14   : > { %v2010_v11 = vadd.f32 %v2008_v4, %v1926_v46  ;;  %v1938_v5 = vadd.f32 %v1936_v55, %v1854_v56 }
 0xe17   : > { %v2014_v50 = vpop.permute.xlu1 %2013  ;;  %v2020_v27 = vpop.permute.xlu0 %2019 }
 0xe18   : > { %v2016_v2 = vadd.f32 %v2014_v50, %v1932_v3  ;;  %v2022_v22 = vadd.f32 %v2020_v27, %v1938_v5 }
 0xe1b   : > { %v2092_v62 = vpop.permute.xlu1 %2091  ;;  %v2098_v29 = vpop.permute.xlu0 %2097 }
 0xe1c   : > { %v2094_v52 = vadd.f32 %v2092_v62, %v2010_v11  ;;  %v2100_v6 = vadd.f32 %v2098_v29, %v2016_v2 }
 0xe1f   : > { %v2104_v60 = vpop.permute.xlu1 %2103  ;;  %v2176_v7 = vpop.permute.xlu0 %2175 }
 0xe20   : > { %v2178_v48 = vadd.f32 %v2176_v7, %v2094_v52  ;;  %v2106_v10 = vadd.f32 %v2104_v60, %v2022_v22 }
 0xe23   : > { %v2182_v31 = vpop.permute.xlu1 %2181  ;;  %v2188_v34 = vpop.permute.xlu0 %2187 }
 0xe24   : > { %v2184_v15 = vadd.f32 %v2182_v31, %v2100_v6  ;;  %v2190_v45 = vadd.f32 %v2188_v34, %v2106_v10 }
 0xe27   : > { %v2260_v38 = vpop.permute.xlu1 %2259  ;;  %v2266_v18 = vpop.permute.xlu0 %2265 }
 0xe28   : > { %v2262_v23 = vadd.f32 %v2260_v38, %v2178_v48  ;;  %v2268_v1 = vadd.f32 %v2266_v18, %v2184_v15 }
 0xe2b   : > { %v2272_v35 = vpop.permute.xlu1 %2271  ;;  %v2344_v37 = vpop.permute.xlu0 %2343 }
 0xe2c   : > { %v2346_v49 = vadd.f32 %v2344_v37, %v2262_v23  ;;  %v2274_v16 = vadd.f32 %v2272_v35, %v2190_v45 }
 0xe2f   : > { %v2350_v8 = vpop.permute.xlu1 %2349  ;;  %v2356_v19 = vpop.permute.xlu0 %2355 }
 0xe30   : > { %v2352_v9 = vadd.f32 %v2350_v8, %v2268_v1  ;;  %v2358_v30 = vadd.f32 %v2356_v19, %v2274_v16 }
 0xe33   : > { %v2428_v25 = vpop.permute.xlu1 %2427  ;;  %v2434_v21 = vpop.permute.xlu0 %2433 }
 0xe34   : > { %v2430_v36 = vadd.f32 %v2428_v25, %v2346_v49  ;;  %v2436_v57 = vadd.f32 %v2434_v21, %v2352_v9 }
 0xe37   : > { %v2440_v41 = vpop.permute.xlu1 %2439  ;;  %v2512_v33 = vpop.permute.xlu0 %2511 }
 0xe38   : > { %v2514_v26 = vadd.f32 %v2512_v33, %v2430_v36  ;;  %v2442_v39 = vadd.f32 %v2440_v41, %v2358_v30 }
 0xe3b   : > { %v2518_v40 = vpop.permute.xlu1 %2517  ;;  %v2524_v28 = vpop.permute.xlu0 %2523 }
 0xe3c   : > { %v2520_v63 = vadd.f32 %v2518_v40, %v2436_v57  ;;  %v2526_v0 = vadd.f32 %v2524_v28, %v2442_v39 }
 0xe72   : > { %v2596_v44 = vpop.permute.xlu1 %2595 }
 0xe73   : > { %v2598_v53 = vadd.f32 %v2596_v44, %v2514_v26 }
 0xe75   : > { %2613 = vst.msk [vmem:[%s3859_s14] sm:$0xff] %vm2612_vm8, %v2598_v53 }
 0xe76   : > { %v2602_v47 = vpop.permute.xlu0 %2601 }
 0xe77   : > { %v2604_v43 = vadd.f32 %v2602_v47, %v2520_v63 }
 0xe79   : > { %2615 = vst.msk [vmem:[%s3859_s14] sm:$0xff] %vm2614_vm9, %v2604_v43 }
 0xe7a   : > { %v2608_v24 = vpop.permute.xlu1 %2607 }
 0xe7b   : > { %v2610_v20 = vadd.f32 %v2608_v24, %v2526_v0 }
 0xe7d   : > { %2617 = vst.msk [vmem:[%s3859_s14] sm:$0xff] %vm2616_vm10, %v2610_v20 }
 0xe7e PF: > { %s23_s17 = sadd.s32 1, %s3304_s17  }
 0xe7f   : > { %p20_p5 = scmp.ge.s32.totalorder %s23_s17, 4  }
 0xe81   :  { %22 = sbr.rel (!%p20_p5) target bundleno = 2 (0x2), region = 110 }
 0xe88   :  { %2637 = vsyncpa [#allocation3], 1 }
 0xe89   :  { %2639 = vsyncpa [#allocation3 + $0x1], 1 }
 0xe8a   :  { %2640 = vsyncpa [#allocation5], 1 }

</bundles_post_ra>
